<compile_context>
chip_gen: v7x
topology: tpu7x:2x2x1
jax: 0.10.0
libtpu: 0.0.40
codegen_flags: <defaults>
</compile_context>

<pallas_src>
import functools
import math

import jax
import jax.numpy as jnp
from jax import lax
from jax.experimental import pallas as pl
from jax.experimental.pallas import tpu as pltpu


def _uniform_lse_kernel(x_rows_ref, x_cols_ref, lse_ref, m_ref, s_ref, *,
                        inv_t, n_valid, tn, mask_padded_cols):
    j = pl.program_id(1)

    @pl.when(j == 0)
    def _():
        m_ref[...] = jnp.full_like(m_ref, -jnp.inf)
        s_ref[...] = jnp.zeros_like(s_ref)

    # (TM, D) x (TN, D) NT matmul on the MXU (contract last dims, no transpose).
    g = lax.dot_general(
        x_rows_ref[...],
        x_cols_ref[...],
        dimension_numbers=(((1,), (1,)), ((), ())),
        preferred_element_type=jnp.float32,
    ) * inv_t                                             # (TM, TN) f32

    if mask_padded_cols:
        # Padded rows of x appear as padded *columns* of the Gram matrix;
        # force their contribution to exp(-inf) = 0.
        col = j * tn + lax.broadcasted_iota(jnp.int32, g.shape, 1)
        g = jnp.where(col < n_valid, g, -jnp.inf)

    # Online log-sum-exp across column tiles.
    m_prev = m_ref[...]
    m_new = jnp.maximum(m_prev, jnp.max(g, axis=-1, keepdims=True))
    p = jnp.exp(g - m_new)                                # <= 1, no overflow
    alpha = jnp.exp(m_prev - m_new)
    s_ref[...] = alpha * s_ref[...] + jnp.sum(p, axis=-1, keepdims=True)
    m_ref[...] = m_new

    @pl.when(j == pl.num_programs(1) - 1)
    def _():
        lse_ref[...] = m_ref[...] + jnp.log(s_ref[...])   # per-row logsumexp


def _vmem_limit_bytes(tm, tn, d, mm_itemsize):
    in_tiles = 2 * (tm + tn) * d * mm_itemsize            # double-buffered input tiles
    gram_tmp = 6 * tm * tn * 4                            # gram/exp f32 temporaries
    scratch = 2 * tm * 128 * 4                            # (TM,1) scratches, lane-padded
    out_buf = 2 * tm * 128 * 4                            # (TM,1) output block
    budget = in_tiles + gram_tmp + scratch + out_buf + (4 << 20)
    return int(min(max(budget, 8 << 20), 56 << 20))       # stay under v7x's 64 MiB


def uniform_loss(x, t=0.07, *, tm=256, tn=512, matmul_dtype=jnp.bfloat16):
    """Pallas TPU implementation of uniform_loss.forward.

    tm: row tile (use 128 on v5e, 256 on v6e/v7x).
    tn: column tile of the Gram matrix.
    matmul_dtype: dtype of the MXU operands (bf16 recommended on v6e/v7x;
                  accumulation / exp / log stay in f32).
    """
    x = jnp.asarray(x, jnp.float32)
    n, d = x.shape

    # Pad rows so both tile sizes divide the (shared) row/column extent.
    lcm = math.lcm(tm, tn)
    n_pad = ((n + lcm - 1) // lcm) * lcm
    if n_pad != n:
        x = jnp.pad(x, ((0, n_pad - n), (0, 0)))

    x_mm = x.astype(matmul_dtype)
    itemsize = jnp.dtype(matmul_dtype).itemsize

    kernel = functools.partial(
        _uniform_lse_kernel,
        inv_t=float(1.0 / t),
        n_valid=n,
        tn=tn,
        mask_padded_cols=(n_pad != n),
    )

    lse = pl.pallas_call(
        kernel,
        out_shape=jax.ShapeDtypeStruct((n_pad, 1), jnp.float32),
        grid=(n_pad // tm, n_pad // tn),
        in_specs=[
            # row tile of x (grid-invariant along the column axis -> fetched once)
            pl.BlockSpec((tm, d), lambda i, j: (i, 0)),
            # column tile of x (rows of x reused as Gram columns)
            pl.BlockSpec((tn, d), lambda i, j: (j, 0)),
        ],
        out_specs=pl.BlockSpec((tm, 1), lambda i, j: (i, 0)),
        scratch_shapes=[
            pltpu.VMEM((tm, 1), jnp.float32),   # running max
            pltpu.VMEM((tm, 1), jnp.float32),   # running scaled sum
        ],
        compiler_params=pltpu.CompilerParams(
            dimension_semantics=("parallel", "arbitrary"),
            vmem_limit_bytes=_vmem_limit_bytes(tm, tn, d, itemsize),
        ),
        cost_estimate=pl.CostEstimate(
            flops=2 * n_pad * n_pad * d,
            transcendentals=n_pad * n_pad + 2 * n_pad,
            bytes_accessed=(n_pad // tm + 1) * n_pad * d * itemsize + n_pad * 4,
        ),
    )(x_mm, x_mm)

    # Drop padded rows and finish the mean in JAX (cheap, lane-friendly).
    return jnp.mean(lse[:n, 0])


def uniform_loss_ref(x, t=0.07):
    x = x.astype(jnp.float32)
    return jnp.mean(jnp.log(jnp.sum(jnp.exp((x @ x.T) / t), axis=-1)))


if __name__ == "__main__":
    key = jax.random.PRNGKey(0)
    # Small shape consistent with the module's forward: x is [N, D].
    # N intentionally not a multiple of the tiles to exercise padding/masking.
    N, D = 200, 64
    # Modest magnitudes (typical usage on L2-normalized embeddings).
    x = jax.random.normal(key, (N, D), dtype=jnp.float32) * 0.1

    ref = uniform_loss_ref(x, t=0.07)

    # f32-operand path: tight tolerance.
    out_f32 = jax.block_until_ready(
        uniform_loss(x, t=0.07, matmul_dtype=jnp.float32))
    assert jnp.allclose(out_f32, ref, rtol=1e-4, atol=1e-4), (out_f32, ref)

    # Default bf16-operand path (v6e/v7x recommendation): relaxed tolerance.
    out_bf16 = jax.block_until_ready(uniform_loss(x, t=0.07))
    assert jnp.allclose(out_bf16, ref, rtol=2e-2, atol=2e-2), (out_bf16, ref)

    print("KERNEL_OK")
</pallas_src>

<mosaic_0001>
module attributes {stable_mosaic.version = 11 : i64} {
  func.func @_uniform_lse_kernel(%arg0: i32, %arg1: i32, %arg2: memref<256x64xf32, #tpu.memory_space<vmem>>, %arg3: memref<512x64xf32, #tpu.memory_space<vmem>>, %arg4: memref<256x1xf32, #tpu.memory_space<vmem>>, %arg5: memref<256x1xf32, #tpu.memory_space<vmem>>, %arg6: memref<256x1xf32, #tpu.memory_space<vmem>>) attributes {dimension_semantics = [#tpu.dimension_semantics<parallel>, #tpu.dimension_semantics<arbitrary>], iteration_bounds = array<i64: 2, 1>, scalar_prefetch = 0 : i64, scratch_operands = 2 : i64, tpu.core_type = #tpu.core_type<tc>, window_params = [{transform_indices = @transform_0, window_bounds = array<i64: 256, 64>}, {transform_indices = @transform_1, window_bounds = array<i64: 512, 64>}, {transform_indices = @transform_2, window_bounds = array<i64: 256, 1>}]} {
    %c0_i32 = arith.constant 0 : i32
    %0 = arith.cmpi eq, %arg1, %c0_i32 : i32
    %1 = arith.extui %0 : i1 to i32
    %c0_i32_0 = arith.constant 0 : i32
    %2 = arith.cmpi ne, %1, %c0_i32_0 : i32
    scf.if %2 {
      %cst_18 = arith.constant 0xFF800000 : f32
      %35 = vector.broadcast %cst_18 : f32 to vector<256x1xf32>
      %c0_19 = arith.constant 0 : index
      %c0_20 = arith.constant 0 : index
      %36 = vector.load %arg5[%c0_19, %c0_20] : memref<256x1xf32, #tpu.memory_space<vmem>>, vector<256x1xf32>
      tpu.vector_store %arg5[%c0_19, %c0_20], %35 {strides = array<i32>} : memref<256x1xf32, #tpu.memory_space<vmem>>, vector<256x1xf32>,
      %cst_21 = arith.constant 0.000000e+00 : f32
      %37 = vector.broadcast %cst_21 : f32 to vector<256x1xf32>
      %c0_22 = arith.constant 0 : index
      %c0_23 = arith.constant 0 : index
      %38 = vector.load %arg6[%c0_22, %c0_23] : memref<256x1xf32, #tpu.memory_space<vmem>>, vector<256x1xf32>
      tpu.vector_store %arg6[%c0_22, %c0_23], %37 {strides = array<i32>} : memref<256x1xf32, #tpu.memory_space<vmem>>, vector<256x1xf32>,
    } else {
    }
    %c0 = arith.constant 0 : index
    %c0_1 = arith.constant 0 : index
    %3 = vector.load %arg2[%c0, %c0_1] : memref<256x64xf32, #tpu.memory_space<vmem>>, vector<256x64xf32>
    %c0_2 = arith.constant 0 : index
    %c0_3 = arith.constant 0 : index
    %4 = vector.load %arg3[%c0_2, %c0_3] : memref<512x64xf32, #tpu.memory_space<vmem>>, vector<512x64xf32>
    %cst = arith.constant dense<0.000000e+00> : vector<256x512xf32>
    %5 = tpu.matmul %3, %4, %cst {dimension_numbers = #tpu.dot_dimension_numbers<[1], [1], [0], [0], [0, 0, 1, 0], [], []>} : vector<256x64xf32>, vector<512x64xf32>, vector<256x512xf32> -> vector<256x512xf32>
    %cst_4 = arith.constant 14.2857141 : f32
    %6 = vector.broadcast %cst_4 : f32 to vector<256x512xf32>
    %7 = arith.mulf %5, %6 : vector<256x512xf32>
    %c512_i32 = arith.constant 512 : i32
    %8 = arith.muli %arg1, %c512_i32 : i32
    %9 = tpu.iota {dimensions = array<i32: 1>} : vector<256x512xi32>
    %10 = vector.broadcast %8 : i32 to vector<256x512xi32>
    %11 = arith.addi %10, %9 : vector<256x512xi32>
    %c200_i32 = arith.constant 200 : i32
    %12 = vector.broadcast %c200_i32 : i32 to vector<256x512xi32>
    %13 = arith.cmpi slt, %11, %12 : vector<256x512xi32>
    %cst_5 = arith.constant 0xFF800000 : f32
    %14 = vector.broadcast %cst_5 : f32 to vector<256x512xf32>
    %15 = arith.select %13, %7, %14 : vector<256x512xi1>, vector<256x512xf32>
    %c0_6 = arith.constant 0 : index
    %c0_7 = arith.constant 0 : index
    %16 = vector.load %arg5[%c0_6, %c0_7] : memref<256x1xf32, #tpu.memory_space<vmem>>, vector<256x1xf32>
    %cst_8 = arith.constant dense<0xFF800000> : vector<256xf32>
    %17 = vector.multi_reduction <maximumf>, %15, %cst_8 [1] : vector<256x512xf32> to vector<256xf32>
    %18 = vector.shape_cast %17 : vector<256xf32> to vector<256x1xf32>
    %19 = arith.maximumf %16, %18 : vector<256x1xf32>
    %20 = vector.broadcast %19 : vector<256x1xf32> to vector<256x512xf32>
    %21 = arith.subf %15, %20 : vector<256x512xf32>
    %22 = math.exp %21 : vector<256x512xf32>
    %23 = arith.subf %16, %19 : vector<256x1xf32>
    %24 = math.exp %23 : vector<256x1xf32>
    %c0_9 = arith.constant 0 : index
    %c0_10 = arith.constant 0 : index
    %25 = vector.load %arg6[%c0_9, %c0_10] : memref<256x1xf32, #tpu.memory_space<vmem>>, vector<256x1xf32>
    %26 = arith.mulf %24, %25 : vector<256x1xf32>
    %cst_11 = arith.constant dense<0.000000e+00> : vector<256xf32>
    %27 = vector.multi_reduction <add>, %22, %cst_11 [1] : vector<256x512xf32> to vector<256xf32>
    %28 = vector.shape_cast %27 : vector<256xf32> to vector<256x1xf32>
    %29 = arith.addf %26, %28 : vector<256x1xf32>
    %c0_12 = arith.constant 0 : index
    %c0_13 = arith.constant 0 : index
    %30 = vector.load %arg6[%c0_12, %c0_13] : memref<256x1xf32, #tpu.memory_space<vmem>>, vector<256x1xf32>
    tpu.vector_store %arg6[%c0_12, %c0_13], %29 {strides = array<i32>} : memref<256x1xf32, #tpu.memory_space<vmem>>, vector<256x1xf32>,
    %c0_14 = arith.constant 0 : index
    %c0_15 = arith.constant 0 : index
    %31 = vector.load %arg5[%c0_14, %c0_15] : memref<256x1xf32, #tpu.memory_space<vmem>>, vector<256x1xf32>
    tpu.vector_store %arg5[%c0_14, %c0_15], %19 {strides = array<i32>} : memref<256x1xf32, #tpu.memory_space<vmem>>, vector<256x1xf32>,
    %c0_i32_16 = arith.constant 0 : i32
    %32 = arith.cmpi eq, %arg1, %c0_i32_16 : i32
    %33 = arith.extui %32 : i1 to i32
    %c0_i32_17 = arith.constant 0 : i32
    %34 = arith.cmpi ne, %33, %c0_i32_17 : i32
    scf.if %34 {
      %c0_18 = arith.constant 0 : index
      %c0_19 = arith.constant 0 : index
      %35 = vector.load %arg5[%c0_18, %c0_19] : memref<256x1xf32, #tpu.memory_space<vmem>>, vector<256x1xf32>
      %c0_20 = arith.constant 0 : index
      %c0_21 = arith.constant 0 : index
      %36 = vector.load %arg6[%c0_20, %c0_21] : memref<256x1xf32, #tpu.memory_space<vmem>>, vector<256x1xf32>
      %37 = math.log %36 : vector<256x1xf32>
      %38 = arith.addf %35, %37 : vector<256x1xf32>
      %c0_22 = arith.constant 0 : index
      %c0_23 = arith.constant 0 : index
      %39 = vector.load %arg4[%c0_22, %c0_23] : memref<256x1xf32, #tpu.memory_space<vmem>>, vector<256x1xf32>
      tpu.vector_store %arg4[%c0_22, %c0_23], %38 {strides = array<i32>} : memref<256x1xf32, #tpu.memory_space<vmem>>, vector<256x1xf32>,
    } else {
    }
    return
  }
  func.func @transform_0(%arg0: i32, %arg1: i32) -> (i32, i32) {
    %c0_i32 = arith.constant 0 : i32
    %c0_i32_0 = arith.constant 0 : i32
    return %arg0, %c0_i32 : i32, i32
  }
  func.func @transform_1(%arg0: i32, %arg1: i32) -> (i32, i32) {
    %c0_i32 = arith.constant 0 : i32
    %c0_i32_0 = arith.constant 0 : i32
    return %arg1, %c0_i32 : i32, i32
  }
  func.func @transform_2(%arg0: i32, %arg1: i32) -> (i32, i32) {
    %c0_i32 = arith.constant 0 : i32
    %c0_i32_0 = arith.constant 0 : i32
    return %arg0, %c0_i32 : i32, i32
  }
}

</mosaic_0001>

<bundles_post_ra>
// kernel: tpu_custom_call.1
= control target key start
LH: loop header
LB: loop body
LE: loop exit
PB: predicated region body
PF: predicated region fallthrough
CT: control target
= control target key end

     0   :  { %s3714_s9 = smov 0   ;;  %s3716_s10 = smov 0   ;;  %s5201_s0 = inlined_call_operand.vmem [shape: f32[512,64], index: 0, kind: input, shape index: {}]   ;;  %s5202_s1 = inlined_call_operand.vmem [shape: f32[512,64], index: 1, kind: input, shape index: {}]   ;;  %s5203_s2 = inlined_call_operand.vmem [shape: f32[512,1], index: 2, kind: output, shape index: {}]  }
   0x1   :  { %s3718_s11 = smov 0  }
   0x2 LB: > { %s24_s12 = sadd.s32 1, %s3690_s10  ;;  %p2885_p0 = scmp.ge.s32.totalorder %s3694_s11, 1  ;;  %s3694_s11 = sphi %s3718_s11, %s12_s11   ;;  %s3690_s10 = sphi %s3716_s10, %s5476_s10   ;;  %s3686_s9 = sphi %s3714_s9, %s5475_s9  }
   0x3   : > { %p26_p1 = scmp.ge.s32.totalorder %s24_s12, 2  ;;  %p136_p2 = scmp.lt.s32.totalorder %s3694_s11, 3 }
   0x5   : > { %s5478_s12 = smov (%p26_p1, %s24_s12), 0  ;;  %p137_p3 = pnand %p2885_p0, %p136_p2 }
   0x7   : > { %140 = sbr.rel (%p137_p3) target bundleno = 885 (0x375), region = 28 }
   0xe   : > { %v298_v0 = vld [vmem:[%s5202_s1 + $0x80] sm:$0xff]  ;;  %v299_v1 = vld [vmem:[%s5202_s1 + $0x88] sm:$0xff]  ;;  %vm346_vm0 = vcmask 523264   ;;  %s2886_s19 = sshll.u32 %s3686_s9, 5  ;;  %v300_v6 = vld [vmem:[%s5202_s1 + $0x90] sm:$0xff]  ;;  %vm185_vm3 = vcmask 7168  }
   0xf   : > { %v282_v2 = vld [vmem:[%s5202_s1] sm:$0xff]  ;;  %v3212_v3 = vpack.c.bf16 %v299_v1, %v298_v0  ;;  %vm3743_vm1 = vmpackc.low %vm346_vm0, %vm346_vm0  ;;  %v283_v5 = vld [vmem:[%s5202_s1 + $0x8] sm:$0xff]  ;;  %p164_p4 = scmp.lt.s32.totalorder %s2886_s19, 63 }
  0x10   : > { %v3215_v7 = vpack.c.bf16 %v283_v5, %v282_v2  ;;  %v301_v8 = vld [vmem:[%s5202_s1 + $0x98] sm:$0xff]  ;;  %v284_v10 = vld [vmem:[%s5202_s1 + $0x10] sm:$0xff]  ;;  %v302_v12 = vld [vmem:[%s5202_s1 + $0xa0] sm:$0xff] }
  0x11   : > { %3214 = vmatprep.subr.msk.bf16.mxu0 %vm3743_vm1, %v3212_v3  ;;  %v3218_v9 = vpack.c.bf16 %v301_v8, %v300_v6  ;;  %s5480_s19 = smov (!%p164_p4, %s2886_s19), 63  ;;  %v285_v11 = vld [vmem:[%s5202_s1 + $0x18] sm:$0xff]  ;;  %v303_v13 = vld [vmem:[%s5202_s1 + $0xa8] sm:$0xff]  ;;  %v286_v17 = vld [vmem:[%s5202_s1 + $0x20] sm:$0xff] }
  0x12   : > { %3217 = vmatpush3.bf16.xpose.msk.msra.mxu0 %vm3743_vm1, %v3215_v7  ;;  %s2887_s30 = sshll.u32 %s5480_s19, 3  ;;  %v3221_v14 = vpack.c.bf16 %v285_v11, %v284_v10  ;;  %v3224_v15 = vpack.c.bf16 %v303_v13, %v302_v12  ;;  %v287_v18 = vld [vmem:[%s5202_s1 + $0x28] sm:$0xff]  ;;  %v304_v19 = vld [vmem:[%s5202_s1 + $0xb0] sm:$0xff]  ;;  %v305_v20 = vld [vmem:[%s5202_s1 + $0xb8] sm:$0xff] }
  0x13   : > { %3220 = vmatprep.subr.msk.bf16.mxu0 %vm3743_vm1, %v3218_v9  ;;  %s3782_s9 = scalar_lea.vmem %s5201_s0, %s2887_s30  ;;  %v3227_v21 = vpack.c.bf16 %v287_v18, %v286_v17  ;;  %v3230_v22 = vpack.c.bf16 %v305_v20, %v304_v19  ;;  %v288_v23 = vld [vmem:[%s5202_s1 + $0x30] sm:$0xff]  ;;  %v289_v24 = vld [vmem:[%s5202_s1 + $0x38] sm:$0xff]  ;;  %v306_v25 = vld [vmem:[%s5202_s1 + $0xc0] sm:$0xff]  ;;  %v1278_v19 = vlaneseq  ;;  %s5040_s8 = scalar_lea.vmem %s5203_s2, %s2887_s30 }
  0x14   : > { %v3785_v16 = vld [vmem:[%s3782_s9] sm:$0xff]  ;;  %v307_v26 = vld [vmem:[%s5202_s1 + $0xc8] sm:$0xff]  ;;  %v3233_v27 = vpack.c.bf16 %v289_v24, %v288_v23  ;;  %v308_v31 = vld [vmem:[%s5202_s1 + $0xd0] sm:$0xff] }
  0x15   : > { %3052 = vmatprep.mubr.msk.f32.mxu0 %vm346_vm0, %v3785_v16  ;;  %3148 = vmatprep.mubr.msk.f32.mxu1 %vm346_vm0, %v3785_v16  ;;  %v3236_v28 = vpack.c.bf16 %v307_v26, %v306_v25  ;;  %v290_v29 = vld [vmem:[%s5202_s1 + $0x40] sm:$0xff]  ;;  %v291_v30 = vld [vmem:[%s5202_s1 + $0x48] sm:$0xff]  ;;  %v309_v32 = vld [vmem:[%s5202_s1 + $0xd8] sm:$0xff]  ;;  %v1279_v20 = vand.u32 127, %v1278_v19 }
  0x16   : > { %v3239_v33 = vpack.c.bf16 %v291_v30, %v290_v29  ;;  %v3242_v34 = vpack.c.bf16 %v309_v32, %v308_v31  ;;  %v292_v35 = vld [vmem:[%s5202_s1 + $0x50] sm:$0xff]  ;;  %v293_v36 = vld [vmem:[%s5202_s1 + $0x58] sm:$0xff]  ;;  %v310_v37 = vld [vmem:[%s5202_s1 + $0xe0] sm:$0xff] }
  0x17   : > { %v311_v38 = vld [vmem:[%s5202_s1 + $0xe8] sm:$0xff]  ;;  %v3245_v39 = vpack.c.bf16 %v293_v36, %v292_v35  ;;  %v294_v41 = vld [vmem:[%s5202_s1 + $0x60] sm:$0xff]  ;;  %v312_v43 = vld [vmem:[%s5202_s1 + $0xf0] sm:$0xff] }
  0x18   : > { %v3248_v40 = vpack.c.bf16 %v311_v38, %v310_v37  ;;  %v295_v42 = vld [vmem:[%s5202_s1 + $0x68] sm:$0xff]  ;;  %v313_v44 = vld [vmem:[%s5202_s1 + $0xf8] sm:$0xff]  ;;  %v296_v47 = vld [vmem:[%s5202_s1 + $0x70] sm:$0xff] }
  0x19   : > { %v3251_v45 = vpack.c.bf16 %v295_v42, %v294_v41  ;;  %v3254_v46 = vpack.c.bf16 %v313_v44, %v312_v43  ;;  %v297_v48 = vld [vmem:[%s5202_s1 + $0x78] sm:$0xff]  ;;  %v3884_v50 = vld [vmem:[%s3782_s9 + $0x8] sm:$0xff]  ;;  %v3891_v51 = vld [vmem:[%s3782_s9 + $0x10] sm:$0xff] }
  0x1a   : > { %3223 = vmatpush3.bf16.xpose.msk.msra.mxu0 %vm3743_vm1, %v3221_v14  ;;  %v3257_v49 = vpack.c.bf16 %v297_v48, %v296_v47  ;;  %v3898_v52 = vld [vmem:[%s3782_s9 + $0x18] sm:$0xff]  ;;  %v3905_v53 = vld [vmem:[%s3782_s9 + $0x20] sm:$0xff]  ;;  %v3912_v54 = vld [vmem:[%s3782_s9 + $0x28] sm:$0xff] }
  0x1b   : > { %3226 = vmatprep.subr.msk.bf16.mxu0 %vm3743_vm1, %v3224_v15  ;;  %v3919_v55 = vld [vmem:[%s3782_s9 + $0x30] sm:$0xff]  ;;  %v3926_v56 = vld [vmem:[%s3782_s9 + $0x38] sm:$0xff]  ;;  %v3933_v57 = vld [vmem:[%s3782_s9 + $0x40] sm:$0xff] }
  0x1c   : > { %v3940_v58 = vld [vmem:[%s3782_s9 + $0x48] sm:$0xff]  ;;  %v3947_v59 = vld [vmem:[%s3782_s9 + $0x50] sm:$0xff]  ;;  %v3954_v60 = vld [vmem:[%s3782_s9 + $0x58] sm:$0xff] }
  0x1d   : > { %v3961_v61 = vld [vmem:[%s3782_s9 + $0x60] sm:$0xff]  ;;  %v3968_v62 = vld [vmem:[%s3782_s9 + $0x68] sm:$0xff]  ;;  %v3975_v63 = vld [vmem:[%s3782_s9 + $0x70] sm:$0xff] }
  0x1e   : > { %v3982_v0 = vld [vmem:[%s3782_s9 + $0x78] sm:$0xff]  ;;  %v3989_v1 = vld [vmem:[%s3782_s9 + $0x80] sm:$0xff]  ;;  %v3996_v2 = vld [vmem:[%s3782_s9 + $0x88] sm:$0xff] }
  0x1f   : > { %v268_v3 = vld [vmem:[%s3782_s9 + $0x90] sm:$0xff]  ;;  %v269_v5 = vld [vmem:[%s3782_s9 + $0x98] sm:$0xff]  ;;  %v270_v6 = vld [vmem:[%s3782_s9 + $0xa0] sm:$0xff] }
  0x20   : > { %v271_v7 = vld [vmem:[%s3782_s9 + $0xa8] sm:$0xff]  ;;  %v272_v8 = vld [vmem:[%s3782_s9 + $0xb0] sm:$0xff]  ;;  %v273_v9 = vld [vmem:[%s3782_s9 + $0xb8] sm:$0xff] }
  0x21   : > { %v274_v10 = vld [vmem:[%s3782_s9 + $0xc0] sm:$0xff]  ;;  %v275_v11 = vld [vmem:[%s3782_s9 + $0xc8] sm:$0xff]  ;;  %v276_v12 = vld [vmem:[%s3782_s9 + $0xd0] sm:$0xff] }
  0x22   : > { %3229 = vmatpush3.bf16.xpose.msk.msra.mxu0 %vm3743_vm1, %v3227_v21  ;;  %v277_v13 = vld [vmem:[%s3782_s9 + $0xd8] sm:$0xff]  ;;  %v278_v14 = vld [vmem:[%s3782_s9 + $0xe0] sm:$0xff]  ;;  %v279_v15 = vld [vmem:[%s3782_s9 + $0xe8] sm:$0xff]  ;;  %v4046_v21 = vadd.s32 128, %v1279_v20 }
  0x23   : > { %3232 = vmatprep.subr.msk.bf16.mxu0 %vm3743_vm1, %v3230_v22  ;;  %v280_v17 = vld [vmem:[%s3782_s9 + $0xf0] sm:$0xff]  ;;  %v281_v18 = vld [vmem:[%s3782_s9 + $0xf8] sm:$0xff] }
  0x24   : > { %vm1289_vm2 = vcmp.lt.s32.totalorder %v4046_v21, 200 }
  0x2a   : > { %3235 = vmatpush3.bf16.xpose.msk.msra.mxu0 %vm3743_vm1, %v3233_v27 }
  0x2b   : > { %3238 = vmatprep.subr.msk.bf16.mxu0 %vm3743_vm1, %v3236_v28  ;;  %v3696_v28 = vmov -inf  }
  0x2c   : > { %186 = vst.msk [vmem:[#allocation2] sm:$0xff] %vm185_vm3, %v3696_v28  ;;  %187 = vst.msk [vmem:[#allocation2 + $0x8] sm:$0xff] %vm185_vm3, %v3696_v28 }
  0x2d   : > { %188 = vst.msk [vmem:[#allocation2 + $0x10] sm:$0xff] %vm185_vm3, %v3696_v28  ;;  %189 = vst.msk [vmem:[#allocation2 + $0x18] sm:$0xff] %vm185_vm3, %v3696_v28 }
  0x2e   : > { %190 = vst.msk [vmem:[#allocation2 + $0x20] sm:$0xff] %vm185_vm3, %v3696_v28  ;;  %191 = vst.msk [vmem:[#allocation2 + $0x28] sm:$0xff] %vm185_vm3, %v3696_v28 }
  0x2f   : > { %192 = vst.msk [vmem:[#allocation2 + $0x30] sm:$0xff] %vm185_vm3, %v3696_v28  ;;  %193 = vst.msk [vmem:[#allocation2 + $0x38] sm:$0xff] %vm185_vm3, %v3696_v28 }
  0x30   : > { %194 = vst.msk [vmem:[#allocation2 + $0x40] sm:$0xff] %vm185_vm3, %v3696_v28  ;;  %195 = vst.msk [vmem:[#allocation2 + $0x48] sm:$0xff] %vm185_vm3, %v3696_v28 }
  0x31   : > { %196 = vst.msk [vmem:[#allocation2 + $0x50] sm:$0xff] %vm185_vm3, %v3696_v28  ;;  %197 = vst.msk [vmem:[#allocation2 + $0x58] sm:$0xff] %vm185_vm3, %v3696_v28 }
  0x32   : > { %3241 = vmatpush3.bf16.xpose.msk.msra.mxu0 %vm3743_vm1, %v3239_v33  ;;  %198 = vst.msk [vmem:[#allocation2 + $0x60] sm:$0xff] %vm185_vm3, %v3696_v28  ;;  %199 = vst.msk [vmem:[#allocation2 + $0x68] sm:$0xff] %vm185_vm3, %v3696_v28 }
  0x33   : > { %3244 = vmatprep.subr.msk.bf16.mxu0 %vm3743_vm1, %v3242_v34  ;;  %200 = vst.msk [vmem:[#allocation2 + $0x70] sm:$0xff] %vm185_vm3, %v3696_v28  ;;  %201 = vst.msk [vmem:[#allocation2 + $0x78] sm:$0xff] %vm185_vm3, %v3696_v28 }
  0x34   : > { %202 = vst.msk [vmem:[#allocation2 + $0x80] sm:$0xff] %vm185_vm3, %v3696_v28  ;;  %203 = vst.msk [vmem:[#allocation2 + $0x88] sm:$0xff] %vm185_vm3, %v3696_v28 }
  0x35   : > { %204 = vst.msk [vmem:[#allocation2 + $0x90] sm:$0xff] %vm185_vm3, %v3696_v28  ;;  %205 = vst.msk [vmem:[#allocation2 + $0x98] sm:$0xff] %vm185_vm3, %v3696_v28 }
  0x36   : > { %206 = vst.msk [vmem:[#allocation2 + $0xa0] sm:$0xff] %vm185_vm3, %v3696_v28  ;;  %207 = vst.msk [vmem:[#allocation2 + $0xa8] sm:$0xff] %vm185_vm3, %v3696_v28 }
  0x37   : > { %208 = vst.msk [vmem:[#allocation2 + $0xb0] sm:$0xff] %vm185_vm3, %v3696_v28  ;;  %209 = vst.msk [vmem:[#allocation2 + $0xb8] sm:$0xff] %vm185_vm3, %v3696_v28 }
  0x38   : > { %210 = vst.msk [vmem:[#allocation2 + $0xc0] sm:$0xff] %vm185_vm3, %v3696_v28  ;;  %211 = vst.msk [vmem:[#allocation2 + $0xc8] sm:$0xff] %vm185_vm3, %v3696_v28 }
  0x39   : > { %212 = vst.msk [vmem:[#allocation2 + $0xd0] sm:$0xff] %vm185_vm3, %v3696_v28  ;;  %213 = vst.msk [vmem:[#allocation2 + $0xd8] sm:$0xff] %vm185_vm3, %v3696_v28 }
  0x3a   : > { %3247 = vmatpush3.bf16.xpose.msk.msra.mxu0 %vm3743_vm1, %v3245_v39  ;;  %214 = vst.msk [vmem:[#allocation2 + $0xe0] sm:$0xff] %vm185_vm3, %v3696_v28  ;;  %215 = vst.msk [vmem:[#allocation2 + $0xe8] sm:$0xff] %vm185_vm3, %v3696_v28 }
  0x3b   : > { %3250 = vmatprep.subr.msk.bf16.mxu0 %vm3743_vm1, %v3248_v40  ;;  %216 = vst.msk [vmem:[#allocation2 + $0xf0] sm:$0xff] %vm185_vm3, %v3696_v28  ;;  %217 = vst.msk [vmem:[#allocation2 + $0xf8] sm:$0xff] %vm185_vm3, %v3696_v28 }
  0x42   : > { %3253 = vmatpush3.bf16.xpose.msk.msra.mxu0 %vm3743_vm1, %v3251_v45 }
  0x43   : > { %3256 = vmatprep.subr.msk.bf16.mxu0 %vm3743_vm1, %v3254_v46 }
  0x4a   : > { %3259 = vmatpush3.bf16.xpose.msk.msra.mxu0 %vm3743_vm1, %v3257_v49 }
  0x51   : > { %3053 = vmatmul.mubr.msk.f32.vlgmr.msra.gmra.mrb[0].mxu0 %vm346_vm0, %v3785_v16 }
  0x52   : > { %3054 = vmatprep.mubr.msk.f32.mxu0 %vm346_vm0, %v3884_v50 }
  0x55   : > { %3055 = vmatmul.mubr.msk.f32.gmra.mrb[2].mxu0 %vm346_vm0, %v3884_v50 }
  0x56   : > { %3056 = vmatprep.mubr.msk.f32.mxu0 %vm346_vm0, %v3891_v51 }
  0x59   : > { %3057 = vmatmul.mubr.msk.f32.gmra.mrb[4].mxu0 %vm346_vm0, %v3891_v51 }
  0x5a   : > { %3058 = vmatprep.mubr.msk.f32.mxu0 %vm346_vm0, %v3898_v52 }
  0x5d   : > { %3059 = vmatmul.mubr.msk.f32.gmra.mrb[6].mxu0 %vm346_vm0, %v3898_v52 }
  0x5e   : > { %3060 = vmatprep.mubr.msk.f32.mxu0 %vm346_vm0, %v3905_v53 }
  0x61   : > { %3061 = vmatmul.mubr.msk.f32.gmra.mrb[8].mxu0 %vm346_vm0, %v3905_v53 }
  0x62   : > { %3062 = vmatprep.mubr.msk.f32.mxu0 %vm346_vm0, %v3912_v54 }
  0x65   : > { %3063 = vmatmul.mubr.msk.f32.gmra.mrb[10].mxu0 %vm346_vm0, %v3912_v54 }
  0x66   : > { %3064 = vmatprep.mubr.msk.f32.mxu0 %vm346_vm0, %v3919_v55 }
  0x69   : > { %3065 = vmatmul.mubr.msk.f32.gmra.mrb[12].mxu0 %vm346_vm0, %v3919_v55 }
  0x6a   : > { %3066 = vmatprep.mubr.msk.f32.mxu0 %vm346_vm0, %v3926_v56 }
  0x6d   : > { %3067 = vmatmul.mubr.msk.f32.gmra.mrb[14].mxu0 %vm346_vm0, %v3926_v56 }
  0x6e   : > { %3068 = vmatprep.mubr.msk.f32.mxu0 %vm346_vm0, %v3933_v57 }
  0x71   : > { %3069 = vmatmul.mubr.msk.f32.gmra.mrb[16].mxu0 %vm346_vm0, %v3933_v57 }
  0x72   : > { %3070 = vmatprep.mubr.msk.f32.mxu0 %vm346_vm0, %v3940_v58 }
  0x75   : > { %3071 = vmatmul.mubr.msk.f32.gmra.mrb[18].mxu0 %vm346_vm0, %v3940_v58 }
  0x76   : > { %3072 = vmatprep.mubr.msk.f32.mxu0 %vm346_vm0, %v3947_v59 }
  0x79   : > { %3073 = vmatmul.mubr.msk.f32.gmra.mrb[20].mxu0 %vm346_vm0, %v3947_v59 }
  0x7a   : > { %3074 = vmatprep.mubr.msk.f32.mxu0 %vm346_vm0, %v3954_v60 }
  0x7d   : > { %3075 = vmatmul.mubr.msk.f32.gmra.mrb[22].mxu0 %vm346_vm0, %v3954_v60 }
  0x7e   : > { %3076 = vmatprep.mubr.msk.f32.mxu0 %vm346_vm0, %v3961_v61 }
  0x81   : > { %3077 = vmatmul.mubr.msk.f32.gmra.mrb[24].mxu0 %vm346_vm0, %v3961_v61 }
  0x82   : > { %3078 = vmatprep.mubr.msk.f32.mxu0 %vm346_vm0, %v3968_v62 }
  0x85   : > { %3079 = vmatmul.mubr.msk.f32.gmra.mrb[26].mxu0 %vm346_vm0, %v3968_v62 }
  0x86   : > { %3080 = vmatprep.mubr.msk.f32.mxu0 %vm346_vm0, %v3975_v63 }
  0x89   : > { %3081 = vmatmul.mubr.msk.f32.gmra.mrb[28].mxu0 %vm346_vm0, %v3975_v63 }
  0x8a   : > { %3082 = vmatprep.mubr.msk.f32.mxu0 %vm346_vm0, %v3982_v0 }
  0x8d   : > { %3083 = vmatmul.mubr.msk.f32.gmra.mrb[30].mxu0 %vm346_vm0, %v3982_v0 }
  0x8e   : > { %3084 = vmatprep.mubr.msk.f32.mxu0 %vm346_vm0, %v3989_v1 }
  0x91   : > { %3085 = vmatmul.mubr.msk.f32.gmra.mrb[32].mxu0 %vm346_vm0, %v3989_v1 }
  0x92   : > { %3086 = vmatprep.mubr.msk.f32.mxu0 %vm346_vm0, %v3996_v2 }
  0x95   : > { %3087 = vmatmul.mubr.msk.f32.gmra.mrb[34].mxu0 %vm346_vm0, %v3996_v2 }
  0x96   : > { %3088 = vmatprep.mubr.msk.f32.mxu0 %vm346_vm0, %v268_v3 }
  0x99   : > { %3089 = vmatmul.mubr.msk.f32.gmra.mrb[36].mxu0 %vm346_vm0, %v268_v3 }
  0x9a   : > { %3090 = vmatprep.mubr.msk.f32.mxu0 %vm346_vm0, %v269_v5 }
  0x9d   : > { %3091 = vmatmul.mubr.msk.f32.gmra.mrb[38].mxu0 %vm346_vm0, %v269_v5 }
  0x9e   : > { %3092 = vmatprep.mubr.msk.f32.mxu0 %vm346_vm0, %v270_v6 }
  0xa1   : > { %3093 = vmatmul.mubr.msk.f32.gmra.mrb[40].mxu0 %vm346_vm0, %v270_v6 }
  0xa2   : > { %3094 = vmatprep.mubr.msk.f32.mxu0 %vm346_vm0, %v271_v7 }
  0xa5   : > { %3095 = vmatmul.mubr.msk.f32.gmra.mrb[42].mxu0 %vm346_vm0, %v271_v7 }
  0xa6   : > { %3096 = vmatprep.mubr.msk.f32.mxu0 %vm346_vm0, %v272_v8 }
  0xa9   : > { %3097 = vmatmul.mubr.msk.f32.gmra.mrb[44].mxu0 %vm346_vm0, %v272_v8 }
  0xaa   : > { %3098 = vmatprep.mubr.msk.f32.mxu0 %vm346_vm0, %v273_v9 }
  0xad   : > { %3099 = vmatmul.mubr.msk.f32.gmra.mrb[46].mxu0 %vm346_vm0, %v273_v9 }
  0xae   : > { %3100 = vmatprep.mubr.msk.f32.mxu0 %vm346_vm0, %v274_v10 }
  0xb1   : > { %3101 = vmatmul.mubr.msk.f32.gmra.mrb[48].mxu0 %vm346_vm0, %v274_v10  ;;  %v3697_v10 = vmov 0  }
  0xb2   : > { %3102 = vmatprep.mubr.msk.f32.mxu0 %vm346_vm0, %v275_v11  ;;  %3335 = vset.pattern.permute.xlu0 %v3697_v10 }
  0xb3   : > { %3336 = vset.pattern.permute.xlu1 %v3697_v10 }
  0xb5   : > { %3103 = vmatmul.mubr.msk.f32.gmra.mrb[50].mxu0 %vm346_vm0, %v275_v11 }
  0xb6   : > { %3104 = vmatprep.mubr.msk.f32.mxu0 %vm346_vm0, %v276_v12 }
  0xb9   : > { %3105 = vmatmul.mubr.msk.f32.gmra.mrb[52].mxu0 %vm346_vm0, %v276_v12 }
  0xba   : > { %3106 = vmatprep.mubr.msk.f32.mxu0 %vm346_vm0, %v277_v13 }
  0xbd   : > { %3107 = vmatmul.mubr.msk.f32.gmra.mrb[54].mxu0 %vm346_vm0, %v277_v13 }
  0xbe   : > { %3108 = vmatprep.mubr.msk.f32.mxu0 %vm346_vm0, %v278_v14 }
  0xc1   : > { %3109 = vmatmul.mubr.msk.f32.gmra.mrb[56].mxu0 %vm346_vm0, %v278_v14 }
  0xc2   : > { %3110 = vmatprep.mubr.msk.f32.mxu0 %vm346_vm0, %v279_v15 }
  0xc5   : > { %3111 = vmatmul.mubr.msk.f32.gmra.mrb[58].mxu0 %vm346_vm0, %v279_v15 }
  0xc6   : > { %3112 = vmatprep.mubr.msk.f32.mxu0 %vm346_vm0, %v280_v17 }
  0xc9   : > { %3113 = vmatmul.mubr.msk.f32.gmra.mrb[60].mxu0 %vm346_vm0, %v280_v17 }
  0xca   : > { %3114 = vmatprep.mubr.msk.f32.mxu0 %vm346_vm0, %v281_v18 }
  0xcd   : > { %3115 = vmatmul.mubr.msk.f32.gmra.mrb[62].mxu0 %vm346_vm0, %v281_v18 }
 0x124   : > { %v701_v22 = vpop.f32.mrb[0].mxu0 }
 0x125   : > { %v703_v23 = vpop.f32.mrb[1].mxu0  ;;  %v4049_v25 = vmul.f32 14.285714, %v701_v22 }
 0x126   : > { %v1150_v24 = vmul.f32 14.285714, %v703_v23 }
 0x128   : > { %v707_v26 = vpop.f32.mrb[2].mxu0  ;;  %v4053_v27 = vsel %vm1289_vm2, %v1150_v24, -inf }
 0x129   : > { %v709_v29 = vpop.f32.mrb[3].mxu0  ;;  %v1452_v30 = vmax.f32 %v4049_v25, %v4053_v27  ;;  %v4089_v32 = vmul.f32 14.285714, %v707_v26 }
 0x12a   : > { %v1154_v31 = vmul.f32 14.285714, %v709_v29 }
 0x12b   : > { %1455 = vmax.xlane.f32.xlu0 %v1452_v30  ;;  %v3698_v30 = vmov 0.0  }
 0x12c   : > { %v713_v33 = vpop.f32.mrb[4].mxu0  ;;  %v4093_v34 = vsel %vm1289_vm2, %v1154_v31, -inf  ;;  %219 = vst.msk [vmem:[#allocation3 + $0x8] sm:$0xff] %vm185_vm3, %v3698_v30  ;;  %218 = vst.msk [vmem:[#allocation3] sm:$0xff] %vm185_vm3, %v3698_v30 }
 0x12d   : > { %v715_v35 = vpop.f32.mrb[5].mxu0  ;;  %v1457_v36 = vmax.f32 %v4089_v32, %v4093_v34  ;;  %v4097_v38 = vmul.f32 14.285714, %v713_v33  ;;  %220 = vst.msk [vmem:[#allocation3 + $0x10] sm:$0xff] %vm185_vm3, %v3698_v30  ;;  %221 = vst.msk [vmem:[#allocation3 + $0x18] sm:$0xff] %vm185_vm3, %v3698_v30 }
 0x12e   : > { %v1158_v37 = vmul.f32 14.285714, %v715_v35  ;;  %222 = vst.msk [vmem:[#allocation3 + $0x20] sm:$0xff] %vm185_vm3, %v3698_v30  ;;  %223 = vst.msk [vmem:[#allocation3 + $0x28] sm:$0xff] %vm185_vm3, %v3698_v30 }
 0x12f   : > { %1460 = vmax.xlane.f32.xlu0 %v1457_v36  ;;  %224 = vst.msk [vmem:[#allocation3 + $0x30] sm:$0xff] %vm185_vm3, %v3698_v30  ;;  %225 = vst.msk [vmem:[#allocation3 + $0x38] sm:$0xff] %vm185_vm3, %v3698_v30 }
 0x130   : > { %v719_v39 = vpop.f32.mrb[6].mxu0  ;;  %v4101_v40 = vsel %vm1289_vm2, %v1158_v37, -inf  ;;  %226 = vst.msk [vmem:[#allocation3 + $0x40] sm:$0xff] %vm185_vm3, %v3698_v30  ;;  %227 = vst.msk [vmem:[#allocation3 + $0x48] sm:$0xff] %vm185_vm3, %v3698_v30 }
 0x131   : > { %v721_v41 = vpop.f32.mrb[7].mxu0  ;;  %v1462_v42 = vmax.f32 %v4097_v38, %v4101_v40  ;;  %v4105_v44 = vmul.f32 14.285714, %v719_v39  ;;  %228 = vst.msk [vmem:[#allocation3 + $0x50] sm:$0xff] %vm185_vm3, %v3698_v30  ;;  %229 = vst.msk [vmem:[#allocation3 + $0x58] sm:$0xff] %vm185_vm3, %v3698_v30 }
 0x132   : > { %v1162_v43 = vmul.f32 14.285714, %v721_v41  ;;  %230 = vst.msk [vmem:[#allocation3 + $0x60] sm:$0xff] %vm185_vm3, %v3698_v30  ;;  %231 = vst.msk [vmem:[#allocation3 + $0x68] sm:$0xff] %vm185_vm3, %v3698_v30 }
 0x133   : > { %1465 = vmax.xlane.f32.xlu1 %v1462_v42  ;;  %232 = vst.msk [vmem:[#allocation3 + $0x70] sm:$0xff] %vm185_vm3, %v3698_v30  ;;  %233 = vst.msk [vmem:[#allocation3 + $0x78] sm:$0xff] %vm185_vm3, %v3698_v30 }
 0x134   : > { %v725_v45 = vpop.f32.mrb[8].mxu0  ;;  %v4109_v46 = vsel %vm1289_vm2, %v1162_v43, -inf  ;;  %234 = vst.msk [vmem:[#allocation3 + $0x80] sm:$0xff] %vm185_vm3, %v3698_v30  ;;  %235 = vst.msk [vmem:[#allocation3 + $0x88] sm:$0xff] %vm185_vm3, %v3698_v30 }
 0x135   : > { %v727_v47 = vpop.f32.mrb[9].mxu0  ;;  %v1467_v48 = vmax.f32 %v4105_v44, %v4109_v46  ;;  %v4113_v3 = vmul.f32 14.285714, %v725_v45  ;;  %236 = vst.msk [vmem:[#allocation3 + $0x90] sm:$0xff] %vm185_vm3, %v3698_v30  ;;  %237 = vst.msk [vmem:[#allocation3 + $0x98] sm:$0xff] %vm185_vm3, %v3698_v30 }
 0x136   : > { %v1166_v49 = vmul.f32 14.285714, %v727_v47  ;;  %238 = vst.msk [vmem:[#allocation3 + $0xa0] sm:$0xff] %vm185_vm3, %v3698_v30  ;;  %239 = vst.msk [vmem:[#allocation3 + $0xa8] sm:$0xff] %vm185_vm3, %v3698_v30 }
 0x137   : > { %1470 = vmax.xlane.f32.xlu1 %v1467_v48  ;;  %240 = vst.msk [vmem:[#allocation3 + $0xb0] sm:$0xff] %vm185_vm3, %v3698_v30  ;;  %241 = vst.msk [vmem:[#allocation3 + $0xb8] sm:$0xff] %vm185_vm3, %v3698_v30 }
 0x138   : > { %v731_v5 = vpop.f32.mrb[10].mxu0  ;;  %v4117_v6 = vsel %vm1289_vm2, %v1166_v49, -inf  ;;  %242 = vst.msk [vmem:[#allocation3 + $0xc0] sm:$0xff] %vm185_vm3, %v3698_v30  ;;  %243 = vst.msk [vmem:[#allocation3 + $0xc8] sm:$0xff] %vm185_vm3, %v3698_v30 }
 0x139   : > { %v733_v7 = vpop.f32.mrb[11].mxu0  ;;  %v1472_v8 = vmax.f32 %v4113_v3, %v4117_v6  ;;  %v4121_v11 = vmul.f32 14.285714, %v731_v5  ;;  %244 = vst.msk [vmem:[#allocation3 + $0xd0] sm:$0xff] %vm185_vm3, %v3698_v30  ;;  %245 = vst.msk [vmem:[#allocation3 + $0xd8] sm:$0xff] %vm185_vm3, %v3698_v30 }
 0x13a   : > { %v1170_v9 = vmul.f32 14.285714, %v733_v7  ;;  %246 = vst.msk [vmem:[#allocation3 + $0xe0] sm:$0xff] %vm185_vm3, %v3698_v30  ;;  %247 = vst.msk [vmem:[#allocation3 + $0xe8] sm:$0xff] %vm185_vm3, %v3698_v30 }
 0x13b   : > { %1475 = vmax.xlane.f32.xlu0 %v1472_v8  ;;  %248 = vst.msk [vmem:[#allocation3 + $0xf0] sm:$0xff] %vm185_vm3, %v3698_v30  ;;  %249 = vst.msk [vmem:[#allocation3 + $0xf8] sm:$0xff] %vm185_vm3, %v3698_v30 }
 0x13c   : > { %v737_v12 = vpop.f32.mrb[12].mxu0  ;;  %v4125_v13 = vsel %vm1289_vm2, %v1170_v9, -inf }
 0x13d   : > { %v739_v14 = vpop.f32.mrb[13].mxu0  ;;  %v1477_v15 = vmax.f32 %v4121_v11, %v4125_v13  ;;  %v4129_v18 = vmul.f32 14.285714, %v737_v12 }
 0x13e   : > { %v1174_v17 = vmul.f32 14.285714, %v739_v14 }
 0x13f   : > { %1480 = vmax.xlane.f32.xlu1 %v1477_v15 }
 0x140   : > { %v743_v19 = vpop.f32.mrb[14].mxu0  ;;  %v4133_v20 = vsel %vm1289_vm2, %v1174_v17, -inf }
 0x141   : > { %v745_v22 = vpop.f32.mrb[15].mxu0  ;;  %v1482_v23 = vmax.f32 %v4129_v18, %v4133_v20  ;;  %v4137_v26 = vmul.f32 14.285714, %v743_v19 }
 0x142   : > { %v1178_v24 = vmul.f32 14.285714, %v745_v22 }
 0x143   : > { %1485 = vmax.xlane.f32.xlu0 %v1482_v23 }
 0x144   : > { %v749_v28 = vpop.f32.mrb[16].mxu0  ;;  %v4141_v29 = vsel %vm1289_vm2, %v1178_v24, -inf }
 0x145   : > { %v751_v31 = vpop.f32.mrb[17].mxu0  ;;  %v1487_v33 = vmax.f32 %v4137_v26, %v4141_v29  ;;  %v4177_v36 = vmul.f32 14.285714, %v749_v28 }
 0x146   : > { %v1182_v35 = vmul.f32 14.285714, %v751_v31 }
 0x147   : > { %1490 = vmax.xlane.f32.xlu1 %v1487_v33 }
 0x148   : > { %v755_v37 = vpop.f32.mrb[18].mxu0  ;;  %v4181_v39 = vsel %vm1289_vm2, %v1182_v35, -inf }
 0x149   : > { %v757_v41 = vpop.f32.mrb[19].mxu0  ;;  %v1492_v42 = vmax.f32 %v4177_v36, %v4181_v39  ;;  %v4185_v45 = vmul.f32 14.285714, %v755_v37 }
 0x14a   : > { %v1186_v43 = vmul.f32 14.285714, %v757_v41 }
 0x14b   : > { %1495 = vmax.xlane.f32.xlu0 %v1492_v42 }
 0x14c   : > { %v761_v47 = vpop.f32.mrb[20].mxu0  ;;  %v4189_v48 = vsel %vm1289_vm2, %v1186_v43, -inf }
 0x14d   : > { %v763_v49 = vpop.f32.mrb[21].mxu0  ;;  %v1497_v5 = vmax.f32 %v4185_v45, %v4189_v48  ;;  %v4193_v8 = vmul.f32 14.285714, %v761_v47 }
 0x14e   : > { %v1190_v7 = vmul.f32 14.285714, %v763_v49 }
 0x14f   : > { %1500 = vmax.xlane.f32.xlu1 %v1497_v5 }
 0x150   : > { %v767_v9 = vpop.f32.mrb[22].mxu0  ;;  %v4197_v10 = vsel %vm1289_vm2, %v1190_v7, -inf }
 0x151   : > { %v769_v12 = vpop.f32.mrb[23].mxu0  ;;  %v1502_v14 = vmax.f32 %v4193_v8, %v4197_v10  ;;  %v4201_v17 = vmul.f32 14.285714, %v767_v9 }
 0x152   : > { %v1194_v15 = vmul.f32 14.285714, %v769_v12  ;;  %v330_v12 = vld [vmem:[%s5202_s1 + $0x180] sm:$0xff] }
 0x153   : > { %1505 = vmax.xlane.f32.xlu0 %v1502_v14  ;;  %v331_v14 = vld [vmem:[%s5202_s1 + $0x188] sm:$0xff] }
 0x154   : > { %v773_v19 = vpop.f32.mrb[24].mxu0  ;;  %v4205_v22 = vsel %vm1289_vm2, %v1194_v15, -inf }
 0x155   : > { %v775_v23 = vpop.f32.mrb[25].mxu0  ;;  %v1507_v24 = vmax.f32 %v4201_v17, %v4205_v22  ;;  %v4209_v30 = vmul.f32 14.285714, %v773_v19 }
 0x156   : > { %v1198_v28 = vmul.f32 14.285714, %v775_v23  ;;  %v3260_v23 = vpack.c.bf16 %v331_v14, %v330_v12 }
 0x157   : > { %1510 = vmax.xlane.f32.xlu1 %v1507_v24  ;;  %v314_v24 = vld [vmem:[%s5202_s1 + $0x100] sm:$0xff] }
 0x158   : > { %v779_v31 = vpop.f32.mrb[26].mxu0  ;;  %v4213_v33 = vsel %vm1289_vm2, %v1198_v28, -inf  ;;  %v315_v28 = vld [vmem:[%s5202_s1 + $0x108] sm:$0xff]  ;;  %3262 = vmatprep.subr.msk.bf16.mxu1 %vm3743_vm1, %v3260_v23  ;;  %v333_v23 = vld [vmem:[%s5202_s1 + $0x198] sm:$0xff] }
 0x159   : > { %v781_v35 = vpop.f32.mrb[27].mxu0  ;;  %v1512_v37 = vmax.f32 %v4209_v30, %v4213_v33  ;;  %v4217_v42 = vmul.f32 14.285714, %v779_v31 }
 0x15a   : > { %v1202_v41 = vmul.f32 14.285714, %v781_v35 }
 0x15b   : > { %1515 = vmax.xlane.f32.xlu0 %v1512_v37  ;;  %v3263_v37 = vpack.c.bf16 %v315_v28, %v314_v24 }
 0x15c   : > { %v785_v43 = vpop.f32.mrb[28].mxu0  ;;  %v4221_v47 = vsel %vm1289_vm2, %v1202_v41, -inf }
 0x15d   : > { %v787_v49 = vpop.f32.mrb[29].mxu0  ;;  %v1517_v5 = vmax.f32 %v4217_v42, %v4221_v47  ;;  %v4225_v9 = vmul.f32 14.285714, %v785_v43  ;;  %3265 = vmatpush3.bf16.xpose.msk.msra.mxu1 %vm3743_vm1, %v3263_v37  ;;  %v316_v37 = vld [vmem:[%s5202_s1 + $0x110] sm:$0xff] }
 0x15e   : > { %v1206_v7 = vmul.f32 14.285714, %v787_v49 }
 0x15f   : > { %1520 = vmax.xlane.f32.xlu1 %v1517_v5 }
 0x160   : > { %v791_v15 = vpop.f32.mrb[30].mxu0  ;;  %v4235_v19 = vsel %vm1289_vm2, %v1206_v7, -inf }
 0x161   : > { %v793_v31 = vpop.f32.mrb[31].mxu0  ;;  %v1522_v35 = vmax.f32 %v4225_v9, %v4235_v19  ;;  %v4247_v43 = vmul.f32 14.285714, %v791_v15  ;;  %v332_v15 = vld [vmem:[%s5202_s1 + $0x190] sm:$0xff] }
 0x162   : > { %v1210_v41 = vmul.f32 14.285714, %v793_v31 }
 0x163   : > { %5285 = vst [vmem:[#allocation4_spill] sm:$0xff] %v4247_v43  ;;  %1525 = vmax.xlane.f32.xlu0 %v1522_v35  ;;  %v3266_v35 = vpack.c.bf16 %v333_v23, %v332_v15 }
 0x164   : > { %v797_v49 = vpop.f32.mrb[32].mxu0  ;;  %v4253_v5 = vsel %vm1289_vm2, %v1210_v41, -inf  ;;  %v317_v41 = vld [vmem:[%s5202_s1 + $0x118] sm:$0xff] }
 0x165   : > { %5286 = vst [vmem:[#allocation5_spill] sm:$0xff] %v4253_v5  ;;  %v799_v7 = vpop.f32.mrb[33].mxu0  ;;  %v1527_v12 = vmax.f32 %v4247_v43, %v4253_v5  ;;  %v4257_v24 = vmul.f32 14.285714, %v797_v49  ;;  %3268 = vmatprep.subr.msk.bf16.mxu1 %vm3743_vm1, %v3266_v35  ;;  %v335_v35 = vld [vmem:[%s5202_s1 + $0x1a8] sm:$0xff] }
 0x166   : > { %v1214_v14 = vmul.f32 14.285714, %v799_v7 }
 0x167   : > { %5287 = vst [vmem:[#allocation6_spill] sm:$0xff] %v4257_v24  ;;  %1530 = vmax.xlane.f32.xlu1 %v1527_v12  ;;  %v3269_v12 = vpack.c.bf16 %v317_v41, %v316_v37 }
 0x168   : > { %v803_v28 = vpop.f32.mrb[34].mxu0  ;;  %v4267_v31 = vsel %vm1289_vm2, %v1214_v14, -inf }
 0x169   : > { %5288 = vst [vmem:[#allocation7_spill] sm:$0xff] %v4267_v31  ;;  %v805_v49 = vpop.f32.mrb[35].mxu0  ;;  %v1532_v7 = vmax.f32 %v4257_v24, %v4267_v31  ;;  %v4279_v14 = vmul.f32 14.285714, %v803_v28  ;;  %3271 = vmatpush3.bf16.xpose.msk.msra.mxu1 %vm3743_vm1, %v3269_v12  ;;  %v334_v28 = vld [vmem:[%s5202_s1 + $0x1a0] sm:$0xff] }
 0x16a   : > { %v1218_v5 = vmul.f32 14.285714, %v805_v49 }
 0x16b   : > { %5289 = vst [vmem:[#allocation8_spill] sm:$0xff] %v4279_v14  ;;  %1535 = vmax.xlane.f32.xlu0 %v1532_v7  ;;  %v3272_v7 = vpack.c.bf16 %v335_v35, %v334_v28 }
 0x16c   : > { %v809_v15 = vpop.f32.mrb[36].mxu0  ;;  %v4285_v23 = vsel %vm1289_vm2, %v1218_v5, -inf }
 0x16d   : > { %5290 = vst [vmem:[#allocation9_spill] sm:$0xff] %v4285_v23  ;;  %v811_v43 = vpop.f32.mrb[37].mxu0  ;;  %v1537_v31 = vmax.f32 %v4279_v14, %v4285_v23  ;;  %v4289_v41 = vmul.f32 14.285714, %v809_v15  ;;  %3274 = vmatprep.subr.msk.bf16.mxu1 %vm3743_vm1, %v3272_v7 }
 0x16e   : > { %v1222_v37 = vmul.f32 14.285714, %v811_v43  ;;  %v318_v43 = vld [vmem:[%s5202_s1 + $0x120] sm:$0xff] }
 0x16f   : > { %5291 = vst [vmem:[#allocation10_spill] sm:$0xff] %v4289_v41  ;;  %1540 = vmax.xlane.f32.xlu1 %v1537_v31  ;;  %v319_v31 = vld [vmem:[%s5202_s1 + $0x128] sm:$0xff] }
 0x170   : > { %v815_v49 = vpop.f32.mrb[38].mxu0  ;;  %v4299_v5 = vsel %vm1289_vm2, %v1222_v37, -inf  ;;  %v3275_v23 = vpack.c.bf16 %v319_v31, %v318_v43 }
 0x171   : > { %5292 = vst [vmem:[#allocation11_spill] sm:$0xff] %v4299_v5  ;;  %v817_v12 = vpop.f32.mrb[39].mxu0  ;;  %v1542_v15 = vmax.f32 %v4289_v41, %v4299_v5  ;;  %v4311_v37 = vmul.f32 14.285714, %v815_v49  ;;  %v336_v49 = vld [vmem:[%s5202_s1 + $0x1b0] sm:$0xff] }
 0x172   : > { %v1226_v14 = vmul.f32 14.285714, %v817_v12  ;;  %3277 = vmatpush3.bf16.xpose.msk.msra.mxu1 %vm3743_vm1, %v3275_v23  ;;  %v337_v23 = vld [vmem:[%s5202_s1 + $0x1b8] sm:$0xff] }
 0x173   : > { %5293 = vst [vmem:[#allocation12_spill] sm:$0xff] %v4311_v37  ;;  %1545 = vmax.xlane.f32.xlu0 %v1542_v15  ;;  %v3278_v12 = vpack.c.bf16 %v337_v23, %v336_v49 }
 0x174   : > { %v821_v28 = vpop.f32.mrb[40].mxu0  ;;  %v4317_v35 = vsel %vm1289_vm2, %v1226_v14, -inf }
 0x175   : > { %5294 = vst [vmem:[#allocation13_spill] sm:$0xff] %v4317_v35  ;;  %v823_v24 = vpop.f32.mrb[41].mxu0  ;;  %v1547_v5 = vmax.f32 %v4311_v37, %v4317_v35  ;;  %v4321_v31 = vmul.f32 14.285714, %v821_v28  ;;  %3280 = vmatprep.subr.msk.bf16.mxu1 %vm3743_vm1, %v3278_v12 }
 0x176   : > { %v1230_v43 = vmul.f32 14.285714, %v823_v24  ;;  %v320_v24 = vld [vmem:[%s5202_s1 + $0x130] sm:$0xff] }
 0x177   : > { %5295 = vst [vmem:[#allocation14_spill] sm:$0xff] %v4321_v31  ;;  %1550 = vmax.xlane.f32.xlu1 %v1547_v5  ;;  %v321_v5 = vld [vmem:[%s5202_s1 + $0x138] sm:$0xff] }
 0x178   : > { %v827_v7 = vpop.f32.mrb[42].mxu0  ;;  %v4331_v14 = vsel %vm1289_vm2, %v1230_v43, -inf  ;;  %v3281_v35 = vpack.c.bf16 %v321_v5, %v320_v24 }
 0x179   : > { %5296 = vst [vmem:[#allocation15_spill] sm:$0xff] %v4331_v14  ;;  %v829_v15 = vpop.f32.mrb[43].mxu0  ;;  %v1552_v28 = vmax.f32 %v4321_v31, %v4331_v14  ;;  %v4343_v43 = vmul.f32 14.285714, %v827_v7  ;;  %v338_v7 = vld [vmem:[%s5202_s1 + $0x1c0] sm:$0xff] }
 0x17a   : > { %v1234_v37 = vmul.f32 14.285714, %v829_v15  ;;  %3283 = vmatpush3.bf16.xpose.msk.msra.mxu1 %vm3743_vm1, %v3281_v35  ;;  %v339_v35 = vld [vmem:[%s5202_s1 + $0x1c8] sm:$0xff] }
 0x17b   : > { %5297 = vst [vmem:[#allocation16_spill] sm:$0xff] %v4343_v43  ;;  %1555 = vmax.xlane.f32.xlu0 %v1552_v28  ;;  %v3284_v15 = vpack.c.bf16 %v339_v35, %v338_v7 }
 0x17c   : > { %v833_v49 = vpop.f32.mrb[44].mxu0  ;;  %v4349_v23 = vsel %vm1289_vm2, %v1234_v37, -inf }
 0x17d   : > { %5298 = vst [vmem:[#allocation17_spill] sm:$0xff] %v4349_v23  ;;  %v835_v41 = vpop.f32.mrb[45].mxu0  ;;  %v1557_v14 = vmax.f32 %v4343_v43, %v4349_v23  ;;  %v4353_v5 = vmul.f32 14.285714, %v833_v49  ;;  %3286 = vmatprep.subr.msk.bf16.mxu1 %vm3743_vm1, %v3284_v15 }
 0x17e   : > { %v1238_v24 = vmul.f32 14.285714, %v835_v41  ;;  %v322_v41 = vld [vmem:[%s5202_s1 + $0x140] sm:$0xff] }
 0x17f   : > { %5299 = vst [vmem:[#allocation18_spill] sm:$0xff] %v4353_v5  ;;  %1560 = vmax.xlane.f32.xlu1 %v1557_v14  ;;  %v323_v14 = vld [vmem:[%s5202_s1 + $0x148] sm:$0xff] }
 0x180   : > { %v839_v12 = vpop.f32.mrb[46].mxu0  ;;  %v4363_v37 = vsel %vm1289_vm2, %v1238_v24, -inf  ;;  %v3287_v23 = vpack.c.bf16 %v323_v14, %v322_v41 }
 0x181   : > { %5300 = vst [vmem:[#allocation19_spill] sm:$0xff] %v4363_v37  ;;  %v841_v28 = vpop.f32.mrb[47].mxu0  ;;  %v1562_v49 = vmax.f32 %v4353_v5, %v4363_v37  ;;  %v4375_v24 = vmul.f32 14.285714, %v839_v12  ;;  %v340_v12 = vld [vmem:[%s5202_s1 + $0x1d0] sm:$0xff] }
 0x182   : > { %v1242_v43 = vmul.f32 14.285714, %v841_v28  ;;  %3289 = vmatpush3.bf16.xpose.msk.msra.mxu1 %vm3743_vm1, %v3287_v23  ;;  %v341_v23 = vld [vmem:[%s5202_s1 + $0x1d8] sm:$0xff] }
 0x183   : > { %5301 = vst [vmem:[#allocation20_spill] sm:$0xff] %v4375_v24  ;;  %1565 = vmax.xlane.f32.xlu0 %v1562_v49  ;;  %v3290_v28 = vpack.c.bf16 %v341_v23, %v340_v12 }
 0x184   : > { %v845_v7 = vpop.f32.mrb[48].mxu0  ;;  %v4381_v35 = vsel %vm1289_vm2, %v1242_v43, -inf }
 0x185   : > { %5302 = vst [vmem:[#allocation21_spill] sm:$0xff] %v4381_v35  ;;  %v847_v31 = vpop.f32.mrb[49].mxu0  ;;  %v1567_v37 = vmax.f32 %v4375_v24, %v4381_v35  ;;  %v4385_v14 = vmul.f32 14.285714, %v845_v7  ;;  %3292 = vmatprep.subr.msk.bf16.mxu1 %vm3743_vm1, %v3290_v28 }
 0x186   : > { %v1246_v41 = vmul.f32 14.285714, %v847_v31  ;;  %v324_v31 = vld [vmem:[%s5202_s1 + $0x150] sm:$0xff] }
 0x187   : > { %5303 = vst [vmem:[#allocation22_spill] sm:$0xff] %v4385_v14  ;;  %1570 = vmax.xlane.f32.xlu1 %v1567_v37  ;;  %v325_v37 = vld [vmem:[%s5202_s1 + $0x158] sm:$0xff] }
 0x188   : > { %v851_v15 = vpop.f32.mrb[50].mxu0  ;;  %v4395_v43 = vsel %vm1289_vm2, %v1246_v41, -inf  ;;  %v3293_v35 = vpack.c.bf16 %v325_v37, %v324_v31 }
 0x189   : > { %5304 = vst [vmem:[#allocation23_spill] sm:$0xff] %v4395_v43  ;;  %v853_v49 = vpop.f32.mrb[51].mxu0  ;;  %v1572_v7 = vmax.f32 %v4385_v14, %v4395_v43  ;;  %v4407_v41 = vmul.f32 14.285714, %v851_v15  ;;  %v342_v15 = vld [vmem:[%s5202_s1 + $0x1e0] sm:$0xff] }
 0x18a   : > { %v1250_v24 = vmul.f32 14.285714, %v853_v49  ;;  %3295 = vmatpush3.bf16.xpose.msk.msra.mxu1 %vm3743_vm1, %v3293_v35  ;;  %v343_v35 = vld [vmem:[%s5202_s1 + $0x1e8] sm:$0xff] }
 0x18b   : > { %5305 = vst [vmem:[#allocation24_spill] sm:$0xff] %v4407_v41  ;;  %1575 = vmax.xlane.f32.xlu0 %v1572_v7  ;;  %v3296_v49 = vpack.c.bf16 %v343_v35, %v342_v15 }
 0x18c   : > { %v857_v12 = vpop.f32.mrb[52].mxu0  ;;  %v4413_v23 = vsel %vm1289_vm2, %v1250_v24, -inf }
 0x18d   : > { %5306 = vst [vmem:[#allocation25_spill] sm:$0xff] %v4413_v23  ;;  %v859_v5 = vpop.f32.mrb[53].mxu0  ;;  %v1577_v43 = vmax.f32 %v4407_v41, %v4413_v23  ;;  %v4417_v37 = vmul.f32 14.285714, %v857_v12  ;;  %3298 = vmatprep.subr.msk.bf16.mxu1 %vm3743_vm1, %v3296_v49 }
 0x18e   : > { %v1254_v31 = vmul.f32 14.285714, %v859_v5  ;;  %v326_v5 = vld [vmem:[%s5202_s1 + $0x160] sm:$0xff] }
 0x18f   : > { %5307 = vst [vmem:[#allocation26_spill] sm:$0xff] %v4417_v37  ;;  %1580 = vmax.xlane.f32.xlu1 %v1577_v43  ;;  %v327_v43 = vld [vmem:[%s5202_s1 + $0x168] sm:$0xff] }
 0x190   : > { %v863_v28 = vpop.f32.mrb[54].mxu0  ;;  %v4427_v24 = vsel %vm1289_vm2, %v1254_v31, -inf  ;;  %v3299_v23 = vpack.c.bf16 %v327_v43, %v326_v5 }
 0x191   : > { %5308 = vst [vmem:[#allocation27_spill] sm:$0xff] %v4427_v24  ;;  %v865_v7 = vpop.f32.mrb[55].mxu0  ;;  %v1582_v12 = vmax.f32 %v4417_v37, %v4427_v24  ;;  %v4439_v31 = vmul.f32 14.285714, %v863_v28  ;;  %v344_v28 = vld [vmem:[%s5202_s1 + $0x1f0] sm:$0xff] }
 0x192   : > { %v1258_v41 = vmul.f32 14.285714, %v865_v7  ;;  %3301 = vmatpush3.bf16.xpose.msk.msra.mxu1 %vm3743_vm1, %v3299_v23  ;;  %v345_v23 = vld [vmem:[%s5202_s1 + $0x1f8] sm:$0xff] }
 0x193   : > { %5309 = vst [vmem:[#allocation28_spill] sm:$0xff] %v4439_v31  ;;  %1585 = vmax.xlane.f32.xlu0 %v1582_v12  ;;  %v3302_v7 = vpack.c.bf16 %v345_v23, %v344_v28 }
 0x194   : > { %v869_v15 = vpop.f32.mrb[56].mxu0  ;;  %v4445_v35 = vsel %vm1289_vm2, %v1258_v41, -inf }
 0x195   : > { %5310 = vst [vmem:[#allocation29_spill] sm:$0xff] %v4445_v35  ;;  %v871_v14 = vpop.f32.mrb[57].mxu0  ;;  %v1587_v24 = vmax.f32 %v4439_v31, %v4445_v35  ;;  %v4449_v43 = vmul.f32 14.285714, %v869_v15  ;;  %3304 = vmatprep.subr.msk.bf16.mxu1 %vm3743_vm1, %v3302_v7 }
 0x196   : > { %v1262_v5 = vmul.f32 14.285714, %v871_v14  ;;  %v328_v14 = vld [vmem:[%s5202_s1 + $0x170] sm:$0xff] }
 0x197   : > { %1590 = vmax.xlane.f32.xlu1 %v1587_v24  ;;  %v329_v24 = vld [vmem:[%s5202_s1 + $0x178] sm:$0xff] }
 0x198   : > { %v875_v49 = vpop.f32.mrb[58].mxu0  ;;  %v4459_v41 = vsel %vm1289_vm2, %v1262_v5, -inf  ;;  %v3305_v35 = vpack.c.bf16 %v329_v24, %v328_v14 }
 0x199   : > { %5311 = vst [vmem:[#allocation30_spill] sm:$0xff] %v4459_v41  ;;  %v877_v12 = vpop.f32.mrb[59].mxu0  ;;  %v1592_v15 = vmax.f32 %v4449_v43, %v4459_v41  ;;  %v4471_v5 = vmul.f32 14.285714, %v875_v49 }
 0x19a   : > { %v1266_v31 = vmul.f32 14.285714, %v877_v12  ;;  %3307 = vmatpush3.bf16.xpose.msk.msra.mxu1 %vm3743_vm1, %v3305_v35 }
 0x19b   : > { %1595 = vmax.xlane.f32.xlu0 %v1592_v15  ;;  %v4540_v15 = vld [vmem:[#allocation2 + $0x10] sm:$0xff] }
 0x19c   : > { %v881_v28 = vpop.f32.mrb[60].mxu0  ;;  %v4477_v23 = vsel %vm1289_vm2, %v1266_v31, -inf }
 0x19d   : > { %v883_v37 = vpop.f32.mrb[61].mxu0  ;;  %v1597_v41 = vmax.f32 %v4471_v5, %v4477_v23  ;;  %v4481_v24 = vmul.f32 14.285714, %v881_v28 }
 0x19e   : > { %v1270_v14 = vmul.f32 14.285714, %v883_v37 }
 0x19f   : > { %1600 = vmax.xlane.f32.xlu1 %v1597_v41 }
 0x1a0   : > { %v887_v7 = vpop.f32.mrb[62].mxu0  ;;  %v4485_v49 = vsel %vm1289_vm2, %v1270_v14, -inf }
 0x1a1   : > { %v889_v4 = vpop.f32.mrb[63].mxu0  ;;  %v1602_v35 = vmax.f32 %v4481_v24, %v4485_v49  ;;  %3149 = vmatmul.mubr.msk.f32.vlgmr.msra.gmra.mrb[0].mxu1 %vm346_vm0, %v3785_v16  ;;  %v4491_v31 = vmul.f32 14.285714, %v887_v7  ;;  %v4517_v16 = vld [vmem:[#allocation2] sm:$0xff]  ;;  %v4554_v7 = vld [vmem:[#allocation2 + $0x18] sm:$0xff] }
 0x1a2   : > { %v1274_v12 = vmul.f32 14.285714, %v889_v4  ;;  %3150 = vmatprep.mubr.msk.f32.mxu1 %vm346_vm0, %v3884_v50 }
 0x1a3   : > { %1605 = vmax.xlane.f32.xlu0 %v1602_v35 }
 0x1a4   : > { %v4497_v37 = vsel %vm1289_vm2, %v1274_v12, -inf  ;;  %v4568_v12 = vld [vmem:[#allocation2 + $0x20] sm:$0xff] }
 0x1a5   : > { %v1607_v41 = vmax.f32 %v4491_v31, %v4497_v37  ;;  %3151 = vmatmul.mubr.msk.f32.gmra.mrb[2].mxu1 %vm346_vm0, %v3884_v50 }
 0x1a6   : > { %3152 = vmatprep.mubr.msk.f32.mxu1 %vm346_vm0, %v3891_v51 }
 0x1a7   : > { %1610 = vmax.xlane.f32.xlu1 %v1607_v41 }
 0x1a9   : > { %3153 = vmatmul.mubr.msk.f32.gmra.mrb[4].mxu1 %vm346_vm0, %v3891_v51 }
 0x1aa   : > { %3154 = vmatprep.mubr.msk.f32.mxu1 %vm346_vm0, %v3898_v52 }
 0x1ad   : > { %3155 = vmatmul.mubr.msk.f32.gmra.mrb[6].mxu1 %vm346_vm0, %v3898_v52  ;;  %v4526_v52 = vld [vmem:[#allocation2 + $0x8] sm:$0xff] }
 0x1ae   : > { %3156 = vmatprep.mubr.msk.f32.mxu1 %vm346_vm0, %v3905_v53 }
 0x1b1   : > { %3157 = vmatmul.mubr.msk.f32.gmra.mrb[8].mxu1 %vm346_vm0, %v3905_v53  ;;  %v4638_v53 = vld [vmem:[#allocation2 + $0x48] sm:$0xff] }
 0x1b2   : > { %3158 = vmatprep.mubr.msk.f32.mxu1 %vm346_vm0, %v3912_v54  ;;  %5318 = vst [vmem:[#allocation37_spill] sm:$0xff] %v4638_v53 }
 0x1b5   : > { %3159 = vmatmul.mubr.msk.f32.gmra.mrb[10].mxu1 %vm346_vm0, %v3912_v54 }
 0x1b6   : > { %3160 = vmatprep.mubr.msk.f32.mxu1 %vm346_vm0, %v3919_v55 }
 0x1b8   : > { %v1456_v50 = vpop.xlane.xlu0 %1455 }
 0x1b9   : > { %v4524_v51 = vmax.f32 %v4517_v16, %v1456_v50  ;;  %3161 = vmatmul.mubr.msk.f32.gmra.mrb[12].mxu1 %vm346_vm0, %v3919_v55  ;;  %v4652_v55 = vld [vmem:[#allocation2 + $0x50] sm:$0xff] }
 0x1ba   : > { %3162 = vmatprep.mubr.msk.f32.mxu1 %vm346_vm0, %v3926_v56  ;;  %5320 = vst [vmem:[#allocation39_spill] sm:$0xff] %v4652_v55 }
 0x1bb   : > { %2573 = vst.msk [vmem:[#allocation2] sm:$0xff] %vm185_vm3, %v4524_v51  ;;  %1646 = vperm.xlu0 %3335, %v4524_v51  }
 0x1bc   : > { %v1461_v54 = vpop.xlane.xlu0 %1460 }
 0x1bd   : > { %v4538_v21 = vmax.f32 %v4526_v52, %v1461_v54  ;;  %3163 = vmatmul.mubr.msk.f32.gmra.mrb[14].mxu1 %vm346_vm0, %v3926_v56  ;;  %v4582_v54 = vld [vmem:[#allocation2 + $0x28] sm:$0xff]  ;;  %v4624_v56 = vld [vmem:[#allocation2 + $0x40] sm:$0xff] }
 0x1be   : > { %3164 = vmatprep.mubr.msk.f32.mxu1 %vm346_vm0, %v3933_v57  ;;  %5316 = vst [vmem:[#allocation35_spill] sm:$0xff] %v4624_v56 }
 0x1bf   : > { %2574 = vst.msk [vmem:[#allocation2 + $0x8] sm:$0xff] %vm185_vm3, %v4538_v21  ;;  %1651 = vperm.xlu1 %3336, %v4538_v21  }
 0x1c0   : > { %v1466_v28 = vpop.xlane.xlu1 %1465 }
 0x1c1   : > { %v4552_v14 = vmax.f32 %v4540_v15, %v1466_v28  ;;  %3165 = vmatmul.mubr.msk.f32.gmra.mrb[16].mxu1 %vm346_vm0, %v3933_v57  ;;  %v4610_v57 = vld [vmem:[#allocation2 + $0x38] sm:$0xff] }
 0x1c2   : > { %3166 = vmatprep.mubr.msk.f32.mxu1 %vm346_vm0, %v3940_v58  ;;  %5314 = vst [vmem:[#allocation33_spill] sm:$0xff] %v4610_v57 }
 0x1c3   : > { %2575 = vst.msk [vmem:[#allocation2 + $0x10] sm:$0xff] %vm185_vm3, %v4552_v14  ;;  %1656 = vperm.xlu1 %3336, %v4552_v14  }
 0x1c4   : > { %v1471_v4 = vpop.xlane.xlu1 %1470 }
 0x1c5   : > { %v4566_v35 = vmax.f32 %v4554_v7, %v1471_v4  ;;  %3167 = vmatmul.mubr.msk.f32.gmra.mrb[18].mxu1 %vm346_vm0, %v3940_v58 }
 0x1c6   : > { %3168 = vmatprep.mubr.msk.f32.mxu1 %vm346_vm0, %v3947_v59 }
 0x1c7   : > { %2576 = vst.msk [vmem:[#allocation2 + $0x18] sm:$0xff] %vm185_vm3, %v4566_v35  ;;  %1661 = vperm.xlu1 %3336, %v4566_v35  }
 0x1c8   : > { %v1476_v41 = vpop.xlane.xlu0 %1475 }
 0x1c9   : > { %v4580_v50 = vmax.f32 %v4568_v12, %v1476_v41  ;;  %3169 = vmatmul.mubr.msk.f32.gmra.mrb[20].mxu1 %vm346_vm0, %v3947_v59  ;;  %v4596_v41 = vld [vmem:[#allocation2 + $0x30] sm:$0xff] }
 0x1ca   : > { %3170 = vmatprep.mubr.msk.f32.mxu1 %vm346_vm0, %v3954_v60  ;;  %5312 = vst [vmem:[#allocation31_spill] sm:$0xff] %v4596_v41 }
 0x1cb   : > { %2577 = vst.msk [vmem:[#allocation2 + $0x20] sm:$0xff] %vm185_vm3, %v4580_v50  ;;  %1666 = vperm.xlu1 %3336, %v4580_v50  }
 0x1cc   : > { %v1481_v28 = vpop.xlane.xlu1 %1480 }
 0x1cd   : > { %v4594_v4 = vmax.f32 %v4582_v54, %v1481_v28  ;;  %3171 = vmatmul.mubr.msk.f32.gmra.mrb[22].mxu1 %vm346_vm0, %v3954_v60 }
 0x1ce   : > { %3172 = vmatprep.mubr.msk.f32.mxu1 %vm346_vm0, %v3961_v61 }
 0x1cf   : > { %2578 = vst.msk [vmem:[#allocation2 + $0x28] sm:$0xff] %vm185_vm3, %v4594_v4  ;;  %1671 = vperm.xlu1 %3336, %v4594_v4  }
 0x1d0   : > { %v1486_v58 = vpop.xlane.xlu0 %1485 }
 0x1d1   : > { %v4608_v28 = vmax.f32 %v4596_v41, %v1486_v58  ;;  %3173 = vmatmul.mubr.msk.f32.gmra.mrb[24].mxu1 %vm346_vm0, %v3961_v61 }
 0x1d2   : > { %3174 = vmatprep.mubr.msk.f32.mxu1 %vm346_vm0, %v3968_v62 }
 0x1d3   : > { %5313 = vst [vmem:[#allocation32_spill] sm:$0xff] %v4608_v28  ;;  %2579 = vst.msk [vmem:[#allocation2 + $0x30] sm:$0xff] %vm185_vm3, %v4608_v28  ;;  %1676 = vperm.xlu1 %3336, %v4608_v28  }
 0x1d4   : > { %v1491_v59 = vpop.xlane.xlu1 %1490 }
 0x1d5   : > { %v4622_v58 = vmax.f32 %v4610_v57, %v1491_v59  ;;  %3175 = vmatmul.mubr.msk.f32.gmra.mrb[26].mxu1 %vm346_vm0, %v3968_v62 }
 0x1d6   : > { %3176 = vmatprep.mubr.msk.f32.mxu1 %vm346_vm0, %v3975_v63 }
 0x1d7   : > { %5315 = vst [vmem:[#allocation34_spill] sm:$0xff] %v4622_v58  ;;  %2580 = vst.msk [vmem:[#allocation2 + $0x38] sm:$0xff] %vm185_vm3, %v4622_v58  ;;  %1681 = vperm.xlu1 %3336, %v4622_v58  }
 0x1d8   : > { %v1496_v60 = vpop.xlane.xlu0 %1495 }
 0x1d9   : > { %v4636_v59 = vmax.f32 %v4624_v56, %v1496_v60  ;;  %3177 = vmatmul.mubr.msk.f32.gmra.mrb[28].mxu1 %vm346_vm0, %v3975_v63 }
 0x1da   : > { %3178 = vmatprep.mubr.msk.f32.mxu1 %vm346_vm0, %v3982_v0 }
 0x1db   : > { %5317 = vst [vmem:[#allocation36_spill] sm:$0xff] %v4636_v59  ;;  %2581 = vst.msk [vmem:[#allocation2 + $0x40] sm:$0xff] %vm185_vm3, %v4636_v59  ;;  %1686 = vperm.xlu1 %3336, %v4636_v59   ;;  %v4666_v59 = vld [vmem:[#allocation2 + $0x58] sm:$0xff] }
 0x1dc   : > { %v1501_v61 = vpop.xlane.xlu1 %1500  ;;  %5322 = vst [vmem:[#allocation41_spill] sm:$0xff] %v4666_v59 }
 0x1dd   : > { %v4650_v60 = vmax.f32 %v4638_v53, %v1501_v61  ;;  %3179 = vmatmul.mubr.msk.f32.gmra.mrb[30].mxu1 %vm346_vm0, %v3982_v0  ;;  %v3657_v53 = vld [vmem:[%s3782_s9 + $0x88] sm:$0xff]  ;;  %v3658_v0 = vld [vmem:[%s3782_s9 + $0x90] sm:$0xff] }
 0x1de   : > { %3180 = vmatprep.mubr.msk.f32.mxu1 %vm346_vm0, %v3989_v1 }
 0x1df   : > { %5319 = vst [vmem:[#allocation38_spill] sm:$0xff] %v4650_v60  ;;  %2582 = vst.msk [vmem:[#allocation2 + $0x48] sm:$0xff] %vm185_vm3, %v4650_v60  ;;  %1691 = vperm.xlu0 %3335, %v4650_v60   ;;  %v4680_v60 = vld [vmem:[#allocation2 + $0x60] sm:$0xff] }
 0x1e0   : > { %v1506_v62 = vpop.xlane.xlu0 %1505  ;;  %5324 = vst [vmem:[#allocation43_spill] sm:$0xff] %v4680_v60 }
 0x1e1   : > { %v4664_v61 = vmax.f32 %v4652_v55, %v1506_v62  ;;  %3181 = vmatmul.mubr.msk.f32.gmra.mrb[32].mxu1 %vm346_vm0, %v3989_v1  ;;  %v3659_v1 = vld [vmem:[%s3782_s9 + $0x98] sm:$0xff] }
 0x1e2   : > { %3182 = vmatprep.mubr.msk.f32.mxu1 %vm346_vm0, %v3996_v2 }
 0x1e3   : > { %5321 = vst [vmem:[#allocation40_spill] sm:$0xff] %v4664_v61  ;;  %2583 = vst.msk [vmem:[#allocation2 + $0x50] sm:$0xff] %vm185_vm3, %v4664_v61  ;;  %1696 = vperm.xlu1 %3336, %v4664_v61   ;;  %v4694_v61 = vld [vmem:[#allocation2 + $0x68] sm:$0xff] }
 0x1e4   : > { %v1511_v63 = vpop.xlane.xlu1 %1510  ;;  %5326 = vst [vmem:[#allocation45_spill] sm:$0xff] %v4694_v61 }
 0x1e5   : > { %v4678_v62 = vmax.f32 %v4666_v59, %v1511_v63  ;;  %3183 = vmatmul.mubr.msk.f32.gmra.mrb[34].mxu1 %vm346_vm0, %v3657_v53  ;;  %v4707_v59 = vld [vmem:[#allocation2 + $0x70] sm:$0xff]  ;;  %v3660_v53 = vld [vmem:[%s3782_s9 + $0xa0] sm:$0xff] }
 0x1e6   : > { %3184 = vmatprep.mubr.msk.f32.mxu1 %vm346_vm0, %v3658_v0  ;;  %5328 = vst [vmem:[#allocation47_spill] sm:$0xff] %v4707_v59 }
 0x1e7   : > { %5323 = vst [vmem:[#allocation42_spill] sm:$0xff] %v4678_v62  ;;  %2584 = vst.msk [vmem:[#allocation2 + $0x58] sm:$0xff] %vm185_vm3, %v4678_v62  ;;  %1701 = vperm.xlu0 %3335, %v4678_v62  }
 0x1e8   : > { %v1516_v2 = vpop.xlane.xlu0 %1515 }
 0x1e9   : > { %v4692_v63 = vmax.f32 %v4680_v60, %v1516_v2  ;;  %3185 = vmatmul.mubr.msk.f32.gmra.mrb[36].mxu1 %vm346_vm0, %v3658_v0  ;;  %v4720_v60 = vld [vmem:[#allocation2 + $0x78] sm:$0xff]  ;;  %v3661_v0 = vld [vmem:[%s3782_s9 + $0xa8] sm:$0xff] }
 0x1ea   : > { %3186 = vmatprep.mubr.msk.f32.mxu1 %vm346_vm0, %v3659_v1  ;;  %5330 = vst [vmem:[#allocation49_spill] sm:$0xff] %v4720_v60 }
 0x1eb   : > { %5325 = vst [vmem:[#allocation44_spill] sm:$0xff] %v4692_v63  ;;  %2585 = vst.msk [vmem:[#allocation2 + $0x60] sm:$0xff] %vm185_vm3, %v4692_v63  ;;  %1706 = vperm.xlu1 %3336, %v4692_v63  }
 0x1ec   : > { %v1521_v62 = vpop.xlane.xlu1 %1520 }
 0x1ed   : > { %v4705_v2 = vmax.f32 %v4694_v61, %v1521_v62  ;;  %3187 = vmatmul.mubr.msk.f32.gmra.mrb[38].mxu1 %vm346_vm0, %v3659_v1  ;;  %v4733_v61 = vld [vmem:[#allocation2 + $0x80] sm:$0xff]  ;;  %v3662_v1 = vld [vmem:[%s3782_s9 + $0xb0] sm:$0xff] }
 0x1ee   : > { %3188 = vmatprep.mubr.msk.f32.mxu1 %vm346_vm0, %v3660_v53  ;;  %5332 = vst [vmem:[#allocation51_spill] sm:$0xff] %v4733_v61 }
 0x1ef   : > { %5327 = vst [vmem:[#allocation46_spill] sm:$0xff] %v4705_v2  ;;  %2586 = vst.msk [vmem:[#allocation2 + $0x68] sm:$0xff] %vm185_vm3, %v4705_v2  ;;  %1711 = vperm.xlu0 %3335, %v4705_v2  }
 0x1f0   : > { %v1526_v63 = vpop.xlane.xlu0 %1525 }
 0x1f1   : > { %v4718_v62 = vmax.f32 %v4707_v59, %v1526_v63  ;;  %3189 = vmatmul.mubr.msk.f32.gmra.mrb[40].mxu1 %vm346_vm0, %v3660_v53  ;;  %v4746_v59 = vld [vmem:[#allocation2 + $0x88] sm:$0xff]  ;;  %v3663_v53 = vld [vmem:[%s3782_s9 + $0xb8] sm:$0xff] }
 0x1f2   : > { %3190 = vmatprep.mubr.msk.f32.mxu1 %vm346_vm0, %v3661_v0  ;;  %5334 = vst [vmem:[#allocation53_spill] sm:$0xff] %v4746_v59 }
 0x1f3   : > { %5329 = vst [vmem:[#allocation48_spill] sm:$0xff] %v4718_v62  ;;  %2587 = vst.msk [vmem:[#allocation2 + $0x70] sm:$0xff] %vm185_vm3, %v4718_v62  ;;  %1716 = vperm.xlu1 %3336, %v4718_v62  }
 0x1f4   : > { %v1531_v2 = vpop.xlane.xlu1 %1530 }
 0x1f5   : > { %v4731_v63 = vmax.f32 %v4720_v60, %v1531_v2  ;;  %3191 = vmatmul.mubr.msk.f32.gmra.mrb[42].mxu1 %vm346_vm0, %v3661_v0  ;;  %v4759_v60 = vld [vmem:[#allocation2 + $0x90] sm:$0xff]  ;;  %v3664_v0 = vld [vmem:[%s3782_s9 + $0xc0] sm:$0xff] }
 0x1f6   : > { %3192 = vmatprep.mubr.msk.f32.mxu1 %vm346_vm0, %v3662_v1  ;;  %5336 = vst [vmem:[#allocation55_spill] sm:$0xff] %v4759_v60 }
 0x1f7   : > { %5331 = vst [vmem:[#allocation50_spill] sm:$0xff] %v4731_v63  ;;  %2588 = vst.msk [vmem:[#allocation2 + $0x78] sm:$0xff] %vm185_vm3, %v4731_v63  ;;  %1721 = vperm.xlu0 %3335, %v4731_v63  }
 0x1f8   : > { %v1536_v62 = vpop.xlane.xlu0 %1535 }
 0x1f9   : > { %v4744_v2 = vmax.f32 %v4733_v61, %v1536_v62  ;;  %3193 = vmatmul.mubr.msk.f32.gmra.mrb[44].mxu1 %vm346_vm0, %v3662_v1  ;;  %v4772_v61 = vld [vmem:[#allocation2 + $0x98] sm:$0xff]  ;;  %v3665_v1 = vld [vmem:[%s3782_s9 + $0xc8] sm:$0xff] }
 0x1fa   : > { %3194 = vmatprep.mubr.msk.f32.mxu1 %vm346_vm0, %v3663_v53  ;;  %5338 = vst [vmem:[#allocation57_spill] sm:$0xff] %v4772_v61 }
 0x1fb   : > { %5333 = vst [vmem:[#allocation52_spill] sm:$0xff] %v4744_v2  ;;  %2589 = vst.msk [vmem:[#allocation2 + $0x80] sm:$0xff] %vm185_vm3, %v4744_v2  ;;  %1726 = vperm.xlu1 %3336, %v4744_v2  }
 0x1fc   : > { %v1541_v63 = vpop.xlane.xlu1 %1540 }
 0x1fd   : > { %v4757_v62 = vmax.f32 %v4746_v59, %v1541_v63  ;;  %3195 = vmatmul.mubr.msk.f32.gmra.mrb[46].mxu1 %vm346_vm0, %v3663_v53  ;;  %v4785_v59 = vld [vmem:[#allocation2 + $0xa0] sm:$0xff]  ;;  %v3666_v53 = vld [vmem:[%s3782_s9 + $0xd0] sm:$0xff] }
 0x1fe   : > { %3196 = vmatprep.mubr.msk.f32.mxu1 %vm346_vm0, %v3664_v0  ;;  %5340 = vst [vmem:[#allocation59_spill] sm:$0xff] %v4785_v59 }
 0x1ff   : > { %5335 = vst [vmem:[#allocation54_spill] sm:$0xff] %v4757_v62  ;;  %2590 = vst.msk [vmem:[#allocation2 + $0x88] sm:$0xff] %vm185_vm3, %v4757_v62  ;;  %1731 = vperm.xlu0 %3335, %v4757_v62  }
 0x200   : > { %v1546_v2 = vpop.xlane.xlu0 %1545 }
 0x201   : > { %v4770_v63 = vmax.f32 %v4759_v60, %v1546_v2  ;;  %3197 = vmatmul.mubr.msk.f32.gmra.mrb[48].mxu1 %vm346_vm0, %v3664_v0  ;;  %v4798_v60 = vld [vmem:[#allocation2 + $0xa8] sm:$0xff]  ;;  %v3667_v0 = vld [vmem:[%s3782_s9 + $0xd8] sm:$0xff] }
 0x202   : > { %3198 = vmatprep.mubr.msk.f32.mxu1 %vm346_vm0, %v3665_v1  ;;  %5342 = vst [vmem:[#allocation61_spill] sm:$0xff] %v4798_v60 }
 0x203   : > { %5337 = vst [vmem:[#allocation56_spill] sm:$0xff] %v4770_v63  ;;  %2591 = vst.msk [vmem:[#allocation2 + $0x90] sm:$0xff] %vm185_vm3, %v4770_v63  ;;  %1736 = vperm.xlu1 %3336, %v4770_v63  }
 0x204   : > { %v1551_v62 = vpop.xlane.xlu1 %1550 }
 0x205   : > { %v4783_v2 = vmax.f32 %v4772_v61, %v1551_v62  ;;  %3199 = vmatmul.mubr.msk.f32.gmra.mrb[50].mxu1 %vm346_vm0, %v3665_v1  ;;  %v4811_v61 = vld [vmem:[#allocation2 + $0xb0] sm:$0xff]  ;;  %v3668_v1 = vld [vmem:[%s3782_s9 + $0xe0] sm:$0xff] }
 0x206   : > { %3200 = vmatprep.mubr.msk.f32.mxu1 %vm346_vm0, %v3666_v53  ;;  %5344 = vst [vmem:[#allocation63_spill] sm:$0xff] %v4811_v61 }
 0x207   : > { %5339 = vst [vmem:[#allocation58_spill] sm:$0xff] %v4783_v2  ;;  %2592 = vst.msk [vmem:[#allocation2 + $0x98] sm:$0xff] %vm185_vm3, %v4783_v2  ;;  %1741 = vperm.xlu0 %3335, %v4783_v2  }
 0x208   : > { %v1556_v63 = vpop.xlane.xlu0 %1555 }
 0x209   : > { %v4796_v62 = vmax.f32 %v4785_v59, %v1556_v63  ;;  %3201 = vmatmul.mubr.msk.f32.gmra.mrb[52].mxu1 %vm346_vm0, %v3666_v53  ;;  %v4824_v59 = vld [vmem:[#allocation2 + $0xb8] sm:$0xff]  ;;  %v3669_v53 = vld [vmem:[%s3782_s9 + $0xe8] sm:$0xff] }
 0x20a   : > { %3202 = vmatprep.mubr.msk.f32.mxu1 %vm346_vm0, %v3667_v0  ;;  %5346 = vst [vmem:[#allocation65_spill] sm:$0xff] %v4824_v59 }
 0x20b   : > { %5341 = vst [vmem:[#allocation60_spill] sm:$0xff] %v4796_v62  ;;  %2593 = vst.msk [vmem:[#allocation2 + $0xa0] sm:$0xff] %vm185_vm3, %v4796_v62  ;;  %1746 = vperm.xlu1 %3336, %v4796_v62  }
 0x20c   : > { %v1561_v2 = vpop.xlane.xlu1 %1560 }
 0x20d   : > { %v4809_v63 = vmax.f32 %v4798_v60, %v1561_v2  ;;  %3203 = vmatmul.mubr.msk.f32.gmra.mrb[54].mxu1 %vm346_vm0, %v3667_v0  ;;  %v4837_v60 = vld [vmem:[#allocation2 + $0xc0] sm:$0xff]  ;;  %v3670_v0 = vld [vmem:[%s3782_s9 + $0xf0] sm:$0xff] }
 0x20e   : > { %3204 = vmatprep.mubr.msk.f32.mxu1 %vm346_vm0, %v3668_v1  ;;  %5348 = vst [vmem:[#allocation67_spill] sm:$0xff] %v4837_v60 }
 0x20f   : > { %5343 = vst [vmem:[#allocation62_spill] sm:$0xff] %v4809_v63  ;;  %2594 = vst.msk [vmem:[#allocation2 + $0xa8] sm:$0xff] %vm185_vm3, %v4809_v63  ;;  %1751 = vperm.xlu0 %3335, %v4809_v63  }
 0x210   : > { %v1566_v62 = vpop.xlane.xlu0 %1565 }
 0x211   : > { %v4822_v2 = vmax.f32 %v4811_v61, %v1566_v62  ;;  %3205 = vmatmul.mubr.msk.f32.gmra.mrb[56].mxu1 %vm346_vm0, %v3668_v1  ;;  %v3671_v1 = vld [vmem:[%s3782_s9 + $0xf8] sm:$0xff] }
 0x212   : > { %3206 = vmatprep.mubr.msk.f32.mxu1 %vm346_vm0, %v3669_v53 }
 0x213   : > { %5345 = vst [vmem:[#allocation64_spill] sm:$0xff] %v4822_v2  ;;  %2595 = vst.msk [vmem:[#allocation2 + $0xb0] sm:$0xff] %vm185_vm3, %v4822_v2  ;;  %1756 = vperm.xlu1 %3336, %v4822_v2  }
 0x214   : > { %v1571_v63 = vpop.xlane.xlu1 %1570 }
 0x215   : > { %v4835_v62 = vmax.f32 %v4824_v59, %v1571_v63  ;;  %3207 = vmatmul.mubr.msk.f32.gmra.mrb[58].mxu1 %vm346_vm0, %v3669_v53  ;;  %v4850_v63 = vld [vmem:[#allocation2 + $0xc8] sm:$0xff] }
 0x216   : > { %3208 = vmatprep.mubr.msk.f32.mxu1 %vm346_vm0, %v3670_v0  ;;  %5350 = vst [vmem:[#allocation69_spill] sm:$0xff] %v4850_v63 }
 0x217   : > { %5347 = vst [vmem:[#allocation66_spill] sm:$0xff] %v4835_v62  ;;  %2596 = vst.msk [vmem:[#allocation2 + $0xb8] sm:$0xff] %vm185_vm3, %v4835_v62  ;;  %1761 = vperm.xlu0 %3335, %v4835_v62  }
 0x218   : > { %v1576_v2 = vpop.xlane.xlu0 %1575 }
 0x219   : > { %v4848_v61 = vmax.f32 %v4837_v60, %v1576_v2  ;;  %3209 = vmatmul.mubr.msk.f32.gmra.mrb[60].mxu1 %vm346_vm0, %v3670_v0  ;;  %v4863_v2 = vld [vmem:[#allocation2 + $0xd0] sm:$0xff]  ;;  %v4874_v60 = vld [vmem:[#allocation2 + $0xd8] sm:$0xff] }
 0x21a   : > { %3210 = vmatprep.mubr.msk.f32.mxu1 %vm346_vm0, %v3671_v1  ;;  %5352 = vst [vmem:[#allocation71_spill] sm:$0xff] %v4863_v2  ;;  %5354 = vst [vmem:[#allocation73_spill] sm:$0xff] %v4874_v60 }
 0x21b   : > { %5349 = vst [vmem:[#allocation68_spill] sm:$0xff] %v4848_v61  ;;  %2597 = vst.msk [vmem:[#allocation2 + $0xc0] sm:$0xff] %vm185_vm3, %v4848_v61  ;;  %1766 = vperm.xlu1 %3336, %v4848_v61  }
 0x21c   : > { %v1581_v62 = vpop.xlane.xlu1 %1580 }
 0x21d   : > { %v4861_v59 = vmax.f32 %v4850_v63, %v1581_v62  ;;  %3211 = vmatmul.mubr.msk.f32.gmra.mrb[62].mxu1 %vm346_vm0, %v3671_v1  ;;  %v4884_v63 = vld [vmem:[#allocation2 + $0xe0] sm:$0xff] }
 0x21e   : > { %5356 = vst [vmem:[#allocation75_spill] sm:$0xff] %v4884_v63 }
 0x21f   : > { %5351 = vst [vmem:[#allocation70_spill] sm:$0xff] %v4861_v59  ;;  %2598 = vst.msk [vmem:[#allocation2 + $0xc8] sm:$0xff] %vm185_vm3, %v4861_v59  ;;  %1771 = vperm.xlu0 %3335, %v4861_v59   ;;  %v4894_v59 = vld [vmem:[#allocation2 + $0xe8] sm:$0xff] }
 0x220   : > { %v1586_v53 = vpop.xlane.xlu0 %1585  ;;  %5358 = vst [vmem:[#allocation77_spill] sm:$0xff] %v4894_v59 }
 0x221   : > { %v4872_v61 = vmax.f32 %v4863_v2, %v1586_v53 }
 0x223   : > { %5353 = vst [vmem:[#allocation72_spill] sm:$0xff] %v4872_v61  ;;  %2599 = vst.msk [vmem:[#allocation2 + $0xd0] sm:$0xff] %vm185_vm3, %v4872_v61  ;;  %1776 = vperm.xlu1 %3336, %v4872_v61   ;;  %v4904_v61 = vld [vmem:[#allocation2 + $0xf0] sm:$0xff] }
 0x224   : > { %v1591_v1 = vpop.xlane.xlu1 %1590  ;;  %5360 = vst [vmem:[#allocation79_spill] sm:$0xff] %v4904_v61 }
 0x225   : > { %v4882_v0 = vmax.f32 %v4874_v60, %v1591_v1 }
 0x227   : > { %5355 = vst [vmem:[#allocation74_spill] sm:$0xff] %v4882_v0  ;;  %2600 = vst.msk [vmem:[#allocation2 + $0xd8] sm:$0xff] %vm185_vm3, %v4882_v0  ;;  %1781 = vperm.xlu0 %3335, %v4882_v0   ;;  %v4914_v0 = vld [vmem:[#allocation2 + $0xf8] sm:$0xff] }
 0x228   : > { %v1596_v62 = vpop.xlane.xlu0 %1595  ;;  %5362 = vst [vmem:[#allocation81_spill] sm:$0xff] %v4914_v0 }
 0x229   : > { %v4892_v2 = vmax.f32 %v4884_v63, %v1596_v62 }
 0x22b   : > { %5357 = vst [vmem:[#allocation76_spill] sm:$0xff] %v4892_v2  ;;  %2601 = vst.msk [vmem:[#allocation2 + $0xe0] sm:$0xff] %vm185_vm3, %v4892_v2  ;;  %1786 = vperm.xlu1 %3336, %v4892_v2  }
 0x22c   : > { %v1601_v53 = vpop.xlane.xlu1 %1600 }
 0x22d   : > { %v4902_v60 = vmax.f32 %v4894_v59, %v1601_v53 }
 0x22f   : > { %5359 = vst [vmem:[#allocation78_spill] sm:$0xff] %v4902_v60  ;;  %2602 = vst.msk [vmem:[#allocation2 + $0xe8] sm:$0xff] %vm185_vm3, %v4902_v60  ;;  %1791 = vperm.xlu0 %3335, %v4902_v60  }
 0x230   : > { %v1606_v1 = vpop.xlane.xlu0 %1605 }
 0x231   : > { %v4912_v63 = vmax.f32 %v4904_v61, %v1606_v1 }
 0x233   : > { %5361 = vst [vmem:[#allocation80_spill] sm:$0xff] %v4912_v63  ;;  %2603 = vst.msk [vmem:[#allocation2 + $0xf0] sm:$0xff] %vm185_vm3, %v4912_v63  ;;  %1796 = vperm.xlu1 %3336, %v4912_v63  }
 0x234   : > { %v1611_v62 = vpop.xlane.xlu1 %1610 }
 0x235   : > { %v4922_v59 = vmax.f32 %v4914_v0, %v1611_v62 }
 0x237   : > { %5363 = vst [vmem:[#allocation82_spill] sm:$0xff] %v4922_v59  ;;  %2604 = vst.msk [vmem:[#allocation2 + $0xf8] sm:$0xff] %vm185_vm3, %v4922_v59  ;;  %1801 = vperm.xlu0 %3335, %v4922_v59  }
 0x23a   : > { %v1647_v1 = vpop.permute.xlu0 %1646 }
 0x23b   : > { %v1804_v53 = vsub.f32 %v4049_v25, %v1647_v1  ;;  %v1805_v61 = vsub.f32 %v4053_v27, %v1647_v1  ;;  %v1806_v2 = vsub.f32 -inf, %v1647_v1 }
 0x23d   : > { %v1932_v55 = vmul.f32 1.442695, %v1804_v53  ;;  %v1934_v63 = vmul.f32 1.442695, %v1805_v61  ;;  %v1936_v0 = vmul.f32 1.442695, %v1806_v2 }
 0x23e   : > { %v1652_v56 = vpop.permute.xlu1 %1651 }
 0x23f   : > { %3337 = vpow2.f32 %v1932_v55  ;;  %v1808_v62 = vsub.f32 %v4089_v32, %v1652_v56  ;;  %v1809_v58 = vsub.f32 %v4093_v34, %v1652_v56  ;;  %v1810_v60 = vsub.f32 -inf, %v1652_v56 }
 0x240   : > { %3339 = vpow2.f32 %v1934_v63 }
 0x241   : > { %v1940_v57 = vmul.f32 1.442695, %v1808_v62  ;;  %v1942_v28 = vmul.f32 1.442695, %v1809_v58  ;;  %v1944_v59 = vmul.f32 1.442695, %v1810_v60 }
 0x242   : > { %v1657_v41 = vpop.permute.xlu1 %1656 }
 0x243   : > { %3341 = vpow2.f32 %v1940_v57  ;;  %v1812_v25 = vsub.f32 %v4097_v38, %v1657_v41  ;;  %v1813_v27 = vsub.f32 %v4101_v40, %v1657_v41  ;;  %v1814_v53 = vsub.f32 -inf, %v1657_v41 }
 0x244   : > { %3343 = vpow2.f32 %v1942_v28 }
 0x245   : > { %3345 = vpow2.f32 %v1936_v0  ;;  %v1948_v55 = vmul.f32 1.442695, %v1812_v25  ;;  %v1950_v61 = vmul.f32 1.442695, %v1813_v27  ;;  %v1952_v32 = vmul.f32 1.442695, %v1814_v53 }
 0x246   : > { %3347 = vpow2.f32 %v1944_v59  ;;  %v1662_v34 = vpop.permute.xlu1 %1661 }
 0x247   : > { %3349 = vpow2.f32 %v1948_v55  ;;  %v1816_v56 = vsub.f32 %v4105_v44, %v1662_v34  ;;  %v1817_v58 = vsub.f32 %v4109_v46, %v1662_v34  ;;  %v1818_v60 = vsub.f32 -inf, %v1662_v34 }
 0x248   : > { %3351 = vpow2.f32 %v1950_v61 }
 0x249   : > { %v3338_v57 = vpop.eup %3337  ;;  %v1956_v63 = vmul.f32 1.442695, %v1816_v56  ;;  %v1958_v38 = vmul.f32 1.442695, %v1817_v58  ;;  %3353 = vpow2.f32 %v1952_v32  ;;  %v1960_v40 = vmul.f32 1.442695, %v1818_v60 }
 0x24a   : > { %v3340_v2 = vpop.eup %3339  ;;  %v1667_v41 = vpop.permute.xlu1 %1666 }
 0x24b   : > { %3355 = vpow2.f32 %v1956_v63  ;;  %v1820_v28 = vsub.f32 %v4113_v3, %v1667_v41  ;;  %v1821_v59 = vsub.f32 %v4117_v6, %v1667_v41  ;;  %v1822_v0 = vsub.f32 -inf, %v1667_v41 }
 0x24c   : > { %3357 = vpow2.f32 %v1958_v38  ;;  %v2348_v46 = vadd.f32 %v3340_v2, %v3338_v57 }
 0x24d   : > { %v3342_v1 = vpop.eup %3341  ;;  %v1964_v44 = vmul.f32 1.442695, %v1820_v28  ;;  %v1966_v62 = vmul.f32 1.442695, %v1821_v59  ;;  %3359 = vpow2.f32 %v1960_v40  ;;  %v1968_v27 = vmul.f32 1.442695, %v1822_v0 }
 0x24e   : > { %v3344_v25 = vpop.eup %3343  ;;  %v1672_v53 = vpop.permute.xlu1 %1671 }
 0x24f   : > { %v3346_v55 = vpop.eup %3345  ;;  %3361 = vpow2.f32 %v1964_v44  ;;  %v1824_v61 = vsub.f32 %v4121_v11, %v1672_v53  ;;  %v1825_v32 = vsub.f32 %v4125_v13, %v1672_v53  ;;  %v1826_v34 = vsub.f32 -inf, %v1672_v53 }
 0x250   : > { %v3348_v3 = vpop.eup %3347  ;;  %3363 = vpow2.f32 %v1966_v62  ;;  %v2353_v6 = vadd.f32 %v3344_v25, %v3342_v1  ;;  %v2349_v63 = vadd.f32 %v3346_v55, %v2348_v46 }
 0x251   : > { %v3350_v56 = vpop.eup %3349  ;;  %v1972_v58 = vmul.f32 1.442695, %v1824_v61  ;;  %v1974_v60 = vmul.f32 1.442695, %v1825_v32  ;;  %3365 = vpow2.f32 %v1968_v27  ;;  %v1976_v57 = vmul.f32 1.442695, %v1826_v34 }
 0x252   : > { %v3352_v38 = vpop.eup %3351  ;;  %v1677_v2 = vpop.permute.xlu1 %1676  ;;  %v2354_v40 = vadd.f32 %v3348_v3, %v2353_v6  ;;  %v2350_v25 = vadd.f32 %v3346_v55, %v2349_v63 }
 0x253   : > { %3367 = vpow2.f32 %v1972_v58  ;;  %v1828_v41 = vsub.f32 %v4129_v18, %v1677_v2  ;;  %v1829_v11 = vsub.f32 %v4133_v20, %v1677_v2  ;;  %v1830_v28 = vsub.f32 -inf, %v1677_v2  ;;  %v3354_v13 = vpop.eup %3353 }
 0x254   : > { %3369 = vpow2.f32 %v1974_v60  ;;  %v2355_v59 = vadd.f32 %v3348_v3, %v2354_v40  ;;  %v2358_v0 = vadd.f32 %v3352_v38, %v3350_v56 }
 0x255   : > { %v3356_v1 = vpop.eup %3355  ;;  %v1980_v44 = vmul.f32 1.442695, %v1828_v41  ;;  %v1982_v62 = vmul.f32 1.442695, %v1829_v11  ;;  %3371 = vpow2.f32 %v1976_v57  ;;  %v1984_v27 = vmul.f32 1.442695, %v1830_v28 }
 0x256   : > { %v3358_v46 = vpop.eup %3357  ;;  %2356 = vadd.xlane.f32.xlu0 %v2355_v59  ;;  %v1682_v53 = vpop.permute.xlu1 %1681  ;;  %v2359_v61 = vadd.f32 %v3354_v13, %v2358_v0 }
 0x257   : > { %3373 = vpow2.f32 %v1980_v44  ;;  %v1832_v18 = vsub.f32 %v4137_v26, %v1682_v53  ;;  %v1833_v20 = vsub.f32 %v4141_v29, %v1682_v53  ;;  %v1834_v32 = vsub.f32 -inf, %v1682_v53  ;;  %2351 = vadd.xlane.f32.xlu1 %v2350_v25  ;;  %v3360_v34 = vpop.eup %3359 }
 0x258   : > { %3375 = vpow2.f32 %v1982_v62  ;;  %v2360_v3 = vadd.f32 %v3354_v13, %v2359_v61  ;;  %v2363_v6 = vadd.f32 %v3358_v46, %v3356_v1 }
 0x259   : > { %v3362_v56 = vpop.eup %3361  ;;  %v1988_v58 = vmul.f32 1.442695, %v1832_v18  ;;  %v1990_v55 = vmul.f32 1.442695, %v1833_v20  ;;  %3377 = vpow2.f32 %v1984_v27  ;;  %v1992_v63 = vmul.f32 1.442695, %v1834_v32 }
 0x25a   : > { %v3364_v60 = vpop.eup %3363  ;;  %2361 = vadd.xlane.f32.xlu0 %v2360_v3  ;;  %v1687_v38 = vpop.permute.xlu1 %1686  ;;  %v2364_v57 = vadd.f32 %v3360_v34, %v2363_v6 }
 0x25b   : > { %3379 = vpow2.f32 %v1988_v58  ;;  %v1836_v26 = vsub.f32 %v4177_v36, %v1687_v38  ;;  %v1837_v29 = vsub.f32 %v4181_v39, %v1687_v38  ;;  %v1838_v2 = vsub.f32 -inf, %v1687_v38  ;;  %v3366_v40 = vpop.eup %3365 }
 0x25c   : > { %3381 = vpow2.f32 %v1990_v55  ;;  %v2365_v41 = vadd.f32 %v3360_v34, %v2364_v57  ;;  %v2368_v11 = vadd.f32 %v3364_v60, %v3362_v56 }
 0x25d   : > { %v3368_v28 = vpop.eup %3367  ;;  %v1996_v13 = vmul.f32 1.442695, %v1836_v26  ;;  %v1998_v59 = vmul.f32 1.442695, %v1837_v29  ;;  %3383 = vpow2.f32 %v1992_v63  ;;  %v2000_v1 = vmul.f32 1.442695, %v1838_v2 }
 0x25e   : > { %v3370_v0 = vpop.eup %3369  ;;  %2366 = vadd.xlane.f32.xlu1 %v2365_v41  ;;  %v1692_v44 = vpop.permute.xlu0 %1691  ;;  %v2369_v62 = vadd.f32 %v3366_v40, %v2368_v11 }
 0x25f   : > { %3385 = vpow2.f32 %v1996_v13  ;;  %v1840_v25 = vsub.f32 %v4185_v45, %v1692_v44  ;;  %v1841_v36 = vsub.f32 %v4189_v48, %v1692_v44  ;;  %v1842_v39 = vsub.f32 -inf, %v1692_v44  ;;  %v3372_v46 = vpop.eup %3371 }
 0x260   : > { %3387 = vpow2.f32 %v1998_v59  ;;  %v2370_v27 = vadd.f32 %v3366_v40, %v2369_v62  ;;  %v2373_v53 = vadd.f32 %v3370_v0, %v3368_v28 }
 0x261   : > { %v3374_v61 = vpop.eup %3373  ;;  %v2004_v18 = vmul.f32 1.442695, %v1840_v25  ;;  %v2006_v20 = vmul.f32 1.442695, %v1841_v36  ;;  %3389 = vpow2.f32 %v2000_v1  ;;  %v2008_v34 = vmul.f32 1.442695, %v1842_v39 }
 0x262   : > { %v3376_v32 = vpop.eup %3375  ;;  %2371 = vadd.xlane.f32.xlu0 %v2370_v27  ;;  %v1697_v3 = vpop.permute.xlu1 %1696  ;;  %v2374_v6 = vadd.f32 %v3372_v46, %v2373_v53 }
 0x263   : > { %3391 = vpow2.f32 %v2004_v18  ;;  %v1844_v56 = vsub.f32 %v4193_v8, %v1697_v3  ;;  %v1845_v45 = vsub.f32 %v4197_v10, %v1697_v3  ;;  %v1846_v48 = vsub.f32 -inf, %v1697_v3  ;;  %v3378_v58 = vpop.eup %3377 }
 0x264   : > { %3393 = vpow2.f32 %v2006_v20  ;;  %v2375_v55 = vadd.f32 %v3372_v46, %v2374_v6  ;;  %v2378_v60 = vadd.f32 %v3376_v32, %v3374_v61 }
 0x265   : > { %v3380_v63 = vpop.eup %3379  ;;  %v2012_v38 = vmul.f32 1.442695, %v1844_v56  ;;  %v2014_v57 = vmul.f32 1.442695, %v1845_v45  ;;  %3395 = vpow2.f32 %v2008_v34  ;;  %v2016_v29 = vmul.f32 1.442695, %v1846_v48 }
 0x266   : > { %v3382_v26 = vpop.eup %3381  ;;  %2376 = vadd.xlane.f32.xlu1 %v2375_v55  ;;  %v1702_v2 = vpop.permute.xlu0 %1701  ;;  %v2379_v40 = vadd.f32 %v3378_v58, %v2378_v60 }
 0x267   : > { %3397 = vpow2.f32 %v2012_v38  ;;  %v1848_v41 = vsub.f32 %v4201_v17, %v1702_v2  ;;  %v1849_v8 = vsub.f32 %v4205_v22, %v1702_v2  ;;  %v1850_v10 = vsub.f32 -inf, %v1702_v2  ;;  %v3384_v11 = vpop.eup %3383 }
 0x268   : > { %3399 = vpow2.f32 %v2014_v57  ;;  %v2380_v28 = vadd.f32 %v3378_v58, %v2379_v40  ;;  %v2383_v13 = vadd.f32 %v3382_v26, %v3380_v63 }
 0x269   : > { %v3386_v59 = vpop.eup %3385  ;;  %v2020_v0 = vmul.f32 1.442695, %v1848_v41  ;;  %v2022_v1 = vmul.f32 1.442695, %v1849_v8  ;;  %3401 = vpow2.f32 %v2016_v29  ;;  %v2024_v62 = vmul.f32 1.442695, %v1850_v10 }
 0x26a   : > { %v3388_v44 = vpop.eup %3387  ;;  %2381 = vadd.xlane.f32.xlu0 %v2380_v28  ;;  %v1707_v25 = vpop.permute.xlu1 %1706  ;;  %v2384_v36 = vadd.f32 %v3384_v11, %v2383_v13 }
 0x26b   : > { %3403 = vpow2.f32 %v2020_v0  ;;  %v1852_v39 = vsub.f32 %v4209_v30, %v1707_v25  ;;  %v1853_v17 = vsub.f32 %v4213_v33, %v1707_v25  ;;  %v1854_v22 = vsub.f32 -inf, %v1707_v25  ;;  %v3390_v46 = vpop.eup %3389  ;;  %v5365_v25 = vld [vmem:[#allocation5_spill] sm:$0xff] }
 0x26c   : > { %3405 = vpow2.f32 %v2022_v1  ;;  %v2385_v27 = vadd.f32 %v3384_v11, %v2384_v36  ;;  %v2388_v53 = vadd.f32 %v3388_v44, %v3386_v59 }
 0x26d   : > { %v3392_v61 = vpop.eup %3391  ;;  %v2028_v18 = vmul.f32 1.442695, %v1852_v39  ;;  %v2030_v20 = vmul.f32 1.442695, %v1853_v17  ;;  %3407 = vpow2.f32 %v2024_v62  ;;  %v2032_v34 = vmul.f32 1.442695, %v1854_v22 }
 0x26e   : > { %v3394_v32 = vpop.eup %3393  ;;  %2386 = vadd.xlane.f32.xlu1 %v2385_v27  ;;  %v1712_v3 = vpop.permute.xlu0 %1711  ;;  %v2389_v6 = vadd.f32 %v3390_v46, %v2388_v53  ;;  %v5364_v62 = vld [vmem:[#allocation4_spill] sm:$0xff] }
 0x26f   : > { %3409 = vpow2.f32 %v2028_v18  ;;  %v1856_v56 = vsub.f32 %v4217_v42, %v1712_v3  ;;  %v1857_v30 = vsub.f32 %v4221_v47, %v1712_v3  ;;  %v1858_v33 = vsub.f32 -inf, %v1712_v3  ;;  %v3396_v45 = vpop.eup %3395 }
 0x270   : > { %3411 = vpow2.f32 %v2030_v20  ;;  %v2390_v48 = vadd.f32 %v3390_v46, %v2389_v6  ;;  %v2393_v58 = vadd.f32 %v3394_v32, %v3392_v61  ;;  %v5366_v6 = vld [vmem:[#allocation6_spill] sm:$0xff] }
 0x271   : > { %v3398_v55 = vpop.eup %3397  ;;  %v2036_v60 = vmul.f32 1.442695, %v1856_v56  ;;  %v2038_v63 = vmul.f32 1.442695, %v1857_v30  ;;  %3413 = vpow2.f32 %v2032_v34  ;;  %v2040_v57 = vmul.f32 1.442695, %v1858_v33 }
 0x272   : > { %v3400_v38 = vpop.eup %3399  ;;  %2391 = vadd.xlane.f32.xlu0 %v2390_v48  ;;  %v1717_v26 = vpop.permute.xlu1 %1716  ;;  %v2394_v29 = vadd.f32 %v3396_v45, %v2393_v58  ;;  %v5367_v30 = vld [vmem:[#allocation7_spill] sm:$0xff] }
 0x273   : > { %3415 = vpow2.f32 %v2036_v60  ;;  %v1860_v2 = vsub.f32 %v4225_v9, %v1717_v26  ;;  %v1861_v42 = vsub.f32 %v4235_v19, %v1717_v26  ;;  %v1862_v47 = vsub.f32 -inf, %v1717_v26  ;;  %v3402_v40 = vpop.eup %3401 }
 0x274   : > { %3417 = vpow2.f32 %v2038_v63  ;;  %v2395_v41 = vadd.f32 %v3396_v45, %v2394_v29  ;;  %v2398_v8 = vadd.f32 %v3400_v38, %v3398_v55  ;;  %v958_v44 = vpop.f32.mrb[0].mxu1 }
 0x275   : > { %v3404_v10 = vpop.eup %3403  ;;  %v2044_v11 = vmul.f32 1.442695, %v1860_v2  ;;  %v2046_v28 = vmul.f32 1.442695, %v1861_v42  ;;  %3419 = vpow2.f32 %v2040_v57  ;;  %v2048_v59 = vmul.f32 1.442695, %v1862_v47 }
 0x276   : > { %v3406_v13 = vpop.eup %3405  ;;  %2396 = vadd.xlane.f32.xlu1 %v2395_v41  ;;  %v1722_v0 = vpop.permute.xlu0 %1721  ;;  %v2399_v1 = vadd.f32 %v3402_v40, %v2398_v8  ;;  %v5369_v8 = vld [vmem:[#allocation9_spill] sm:$0xff] }
 0x277   : > { %3421 = vpow2.f32 %v2044_v11  ;;  %v1864_v9 = vsub.f32 %v5364_v62, %v1722_v0  ;;  %v1865_v19 = vsub.f32 %v5365_v25, %v1722_v0  ;;  %v1866_v36 = vsub.f32 -inf, %v1722_v0  ;;  %v960_v39 = vpop.f32.mrb[1].mxu1  ;;  %v3408_v17 = vpop.eup %3407 }
 0x278   : > { %3423 = vpow2.f32 %v2046_v28  ;;  %v2400_v22 = vadd.f32 %v3402_v40, %v2399_v1  ;;  %v2403_v46 = vadd.f32 %v3406_v13, %v3404_v10  ;;  %v964_v3 = vpop.f32.mrb[2].mxu1  ;;  %v5368_v40 = vld [vmem:[#allocation8_spill] sm:$0xff] }
 0x279   : > { %v3410_v27 = vpop.eup %3409  ;;  %v2052_v53 = vmul.f32 1.442695, %v1864_v9  ;;  %v2054_v61 = vmul.f32 1.442695, %v1865_v19  ;;  %3425 = vpow2.f32 %v2048_v59  ;;  %v2056_v20 = vmul.f32 1.442695, %v1866_v36 }
 0x27a   : > { %v3412_v18 = vpop.eup %3411  ;;  %2401 = vadd.xlane.f32.xlu0 %v2400_v22  ;;  %v1727_v32 = vpop.permute.xlu1 %1726  ;;  %v2404_v34 = vadd.f32 %v3408_v17, %v2403_v46  ;;  %v5371_v46 = vld [vmem:[#allocation11_spill] sm:$0xff] }
 0x27b   : > { %3427 = vpow2.f32 %v2052_v53  ;;  %v1868_v56 = vsub.f32 %v5366_v6, %v1727_v32  ;;  %v1869_v33 = vsub.f32 %v5367_v30, %v1727_v32  ;;  %v1870_v45 = vsub.f32 -inf, %v1727_v32  ;;  %v966_v48 = vpop.f32.mrb[3].mxu1  ;;  %v3414_v58 = vpop.eup %3413 }
 0x27c   : > { %3429 = vpow2.f32 %v2054_v61  ;;  %v2405_v55 = vadd.f32 %v3408_v17, %v2404_v34  ;;  %v2408_v60 = vadd.f32 %v3412_v18, %v3410_v27  ;;  %v970_v47 = vpop.f32.mrb[4].mxu1  ;;  %v5370_v17 = vld [vmem:[#allocation10_spill] sm:$0xff] }
 0x27d   : > { %v3416_v63 = vpop.eup %3415  ;;  %v2060_v38 = vmul.f32 1.442695, %v1868_v56  ;;  %v2062_v57 = vmul.f32 1.442695, %v1869_v33  ;;  %3431 = vpow2.f32 %v2056_v20  ;;  %v2064_v29 = vmul.f32 1.442695, %v1870_v45 }
 0x27e   : > { %v3418_v26 = vpop.eup %3417  ;;  %2406 = vadd.xlane.f32.xlu1 %v2405_v55  ;;  %v1732_v2 = vpop.permute.xlu0 %1731  ;;  %v2409_v42 = vadd.f32 %v3414_v58, %v2408_v60  ;;  %v5373_v60 = vld [vmem:[#allocation13_spill] sm:$0xff] }
 0x27f   : > { %3433 = vpow2.f32 %v2060_v38  ;;  %v1872_v41 = vsub.f32 %v5368_v40, %v1732_v2  ;;  %v1873_v10 = vsub.f32 %v5369_v8, %v1732_v2  ;;  %v1874_v11 = vsub.f32 -inf, %v1732_v2  ;;  %v972_v28 = vpop.f32.mrb[5].mxu1  ;;  %v3420_v13 = vpop.eup %3419 }
 0x280   : > { %3435 = vpow2.f32 %v2062_v57  ;;  %v2410_v59 = vadd.f32 %v3414_v58, %v2409_v42  ;;  %v2413_v0 = vadd.f32 %v3418_v26, %v3416_v63  ;;  %v976_v39 = vpop.f32.mrb[6].mxu1  ;;  %v5372_v58 = vld [vmem:[#allocation12_spill] sm:$0xff] }
 0x281   : > { %v3422_v1 = vpop.eup %3421  ;;  %v2068_v44 = vmul.f32 1.442695, %v1872_v41  ;;  %v2070_v62 = vmul.f32 1.442695, %v1873_v10  ;;  %3437 = vpow2.f32 %v2064_v29  ;;  %v2072_v25 = vmul.f32 1.442695, %v1874_v11 }
 0x282   : > { %v3424_v9 = vpop.eup %3423  ;;  %2411 = vadd.xlane.f32.xlu0 %v2410_v59  ;;  %v1737_v19 = vpop.permute.xlu1 %1736  ;;  %v2414_v36 = vadd.f32 %v3420_v13, %v2413_v0  ;;  %v5375_v0 = vld [vmem:[#allocation15_spill] sm:$0xff] }
 0x283   : > { %3439 = vpow2.f32 %v2068_v44  ;;  %v1876_v22 = vsub.f32 %v5370_v17, %v1737_v19  ;;  %v1877_v27 = vsub.f32 %v5371_v46, %v1737_v19  ;;  %v1878_v53 = vsub.f32 -inf, %v1737_v19  ;;  %v978_v61 = vpop.f32.mrb[7].mxu1  ;;  %v3426_v18 = vpop.eup %3425 }
 0x284   : > { %3441 = vpow2.f32 %v2070_v62  ;;  %v2415_v20 = vadd.f32 %v3420_v13, %v2414_v36  ;;  %v2418_v32 = vadd.f32 %v3424_v9, %v3422_v1  ;;  %v982_v48 = vpop.f32.mrb[8].mxu1  ;;  %v5374_v13 = vld [vmem:[#allocation14_spill] sm:$0xff] }
 0x285   : > { %v3428_v34 = vpop.eup %3427  ;;  %v2076_v3 = vmul.f32 1.442695, %v1876_v22  ;;  %v2078_v6 = vmul.f32 1.442695, %v1877_v27  ;;  %3443 = vpow2.f32 %v2072_v25  ;;  %v2080_v30 = vmul.f32 1.442695, %v1878_v53 }
 0x286   : > { %v3430_v56 = vpop.eup %3429  ;;  %2416 = vadd.xlane.f32.xlu1 %v2415_v20  ;;  %v1742_v33 = vpop.permute.xlu0 %1741  ;;  %v2419_v45 = vadd.f32 %v3426_v18, %v2418_v32  ;;  %v5377_v32 = vld [vmem:[#allocation17_spill] sm:$0xff] }
 0x287   : > { %3445 = vpow2.f32 %v2076_v3  ;;  %v1880_v55 = vsub.f32 %v5372_v58, %v1742_v33  ;;  %v1881_v63 = vsub.f32 %v5373_v60, %v1742_v33  ;;  %v1882_v38 = vsub.f32 -inf, %v1742_v33  ;;  %v984_v57 = vpop.f32.mrb[9].mxu1  ;;  %v3432_v26 = vpop.eup %3431 }
 0x288   : > { %3447 = vpow2.f32 %v2078_v6  ;;  %v2420_v29 = vadd.f32 %v3426_v18, %v2419_v45  ;;  %v2423_v2 = vadd.f32 %v3430_v56, %v3428_v34  ;;  %v988_v28 = vpop.f32.mrb[10].mxu1  ;;  %v5376_v18 = vld [vmem:[#allocation16_spill] sm:$0xff] }
 0x289   : > { %v3434_v42 = vpop.eup %3433  ;;  %v2084_v47 = vmul.f32 1.442695, %v1880_v55  ;;  %v2086_v40 = vmul.f32 1.442695, %v1881_v63  ;;  %3449 = vpow2.f32 %v2080_v30  ;;  %v2088_v8 = vmul.f32 1.442695, %v1882_v38 }
 0x28a   : > { %v3436_v41 = vpop.eup %3435  ;;  %2421 = vadd.xlane.f32.xlu0 %v2420_v29  ;;  %v1747_v10 = vpop.permute.xlu1 %1746  ;;  %v2424_v11 = vadd.f32 %v3432_v26, %v2423_v2  ;;  %v5379_v2 = vld [vmem:[#allocation19_spill] sm:$0xff] }
 0x28b   : > { %3451 = vpow2.f32 %v2084_v47  ;;  %v1884_v59 = vsub.f32 %v5374_v13, %v1747_v10  ;;  %v1885_v1 = vsub.f32 %v5375_v0, %v1747_v10  ;;  %v1886_v44 = vsub.f32 -inf, %v1747_v10  ;;  %v990_v62 = vpop.f32.mrb[11].mxu1  ;;  %v3438_v9 = vpop.eup %3437 }
 0x28c   : > { %3453 = vpow2.f32 %v2086_v40  ;;  %v2425_v25 = vadd.f32 %v3432_v26, %v2424_v11  ;;  %v2428_v19 = vadd.f32 %v3436_v41, %v3434_v42  ;;  %v994_v61 = vpop.f32.mrb[12].mxu1  ;;  %v5378_v26 = vld [vmem:[#allocation18_spill] sm:$0xff] }
 0x28d   : > { %v3440_v36 = vpop.eup %3439  ;;  %v2092_v39 = vmul.f32 1.442695, %v1884_v59  ;;  %v2094_v17 = vmul.f32 1.442695, %v1885_v1  ;;  %3455 = vpow2.f32 %v2088_v8  ;;  %v2096_v46 = vmul.f32 1.442695, %v1886_v44 }
 0x28e   : > { %v3442_v22 = vpop.eup %3441  ;;  %2426 = vadd.xlane.f32.xlu1 %v2425_v25  ;;  %v1752_v27 = vpop.permute.xlu0 %1751  ;;  %v2429_v53 = vadd.f32 %v3438_v9, %v2428_v19  ;;  %v5381_v19 = vld [vmem:[#allocation21_spill] sm:$0xff] }
 0x28f   : > { %3457 = vpow2.f32 %v2092_v39  ;;  %v1888_v20 = vsub.f32 %v5376_v18, %v1752_v27  ;;  %v1889_v34 = vsub.f32 %v5377_v32, %v1752_v27  ;;  %v1890_v3 = vsub.f32 -inf, %v1752_v27  ;;  %v996_v6 = vpop.f32.mrb[13].mxu1  ;;  %v3444_v56 = vpop.eup %3443 }
 0x290   : > { %3459 = vpow2.f32 %v2094_v17  ;;  %v2430_v30 = vadd.f32 %v3438_v9, %v2429_v53  ;;  %v2433_v33 = vadd.f32 %v3442_v22, %v3440_v36  ;;  %v1000_v57 = vpop.f32.mrb[14].mxu1  ;;  %v5380_v9 = vld [vmem:[#allocation20_spill] sm:$0xff] }
 0x291   : > { %v3446_v45 = vpop.eup %3445  ;;  %v2100_v48 = vmul.f32 1.442695, %v1888_v20  ;;  %v2102_v58 = vmul.f32 1.442695, %v1889_v34  ;;  %3461 = vpow2.f32 %v2096_v46  ;;  %v2104_v60 = vmul.f32 1.442695, %v1890_v3 }
 0x292   : > { %v3448_v55 = vpop.eup %3447  ;;  %2431 = vadd.xlane.f32.xlu0 %v2430_v30  ;;  %v1757_v63 = vpop.permute.xlu1 %1756  ;;  %v2434_v38 = vadd.f32 %v3444_v56, %v2433_v33  ;;  %v5383_v33 = vld [vmem:[#allocation23_spill] sm:$0xff] }
 0x293   : > { %3463 = vpow2.f32 %v2100_v48  ;;  %v1892_v29 = vsub.f32 %v5378_v26, %v1757_v63  ;;  %v1893_v42 = vsub.f32 %v5379_v2, %v1757_v63  ;;  %v1894_v47 = vsub.f32 -inf, %v1757_v63  ;;  %v1002_v40 = vpop.f32.mrb[15].mxu1  ;;  %v3450_v41 = vpop.eup %3449 }
 0x294   : > { %3465 = vpow2.f32 %v2102_v58  ;;  %v2435_v8 = vadd.f32 %v3444_v56, %v2434_v38  ;;  %v2438_v10 = vadd.f32 %v3448_v55, %v3446_v45  ;;  %v1006_v62 = vpop.f32.mrb[16].mxu1  ;;  %v5382_v56 = vld [vmem:[#allocation22_spill] sm:$0xff] }
 0x295   : > { %v3452_v11 = vpop.eup %3451  ;;  %v2108_v28 = vmul.f32 1.442695, %v1892_v29  ;;  %v2110_v13 = vmul.f32 1.442695, %v1893_v42  ;;  %3467 = vpow2.f32 %v2104_v60  ;;  %v2112_v0 = vmul.f32 1.442695, %v1894_v47 }
 0x296   : > { %v3454_v59 = vpop.eup %3453  ;;  %2436 = vadd.xlane.f32.xlu1 %v2435_v8  ;;  %v1762_v1 = vpop.permute.xlu0 %1761  ;;  %v2439_v44 = vadd.f32 %v3450_v41, %v2438_v10  ;;  %v5385_v10 = vld [vmem:[#allocation25_spill] sm:$0xff] }
 0x297   : > { %3469 = vpow2.f32 %v2108_v28  ;;  %v1896_v25 = vsub.f32 %v5380_v9, %v1762_v1  ;;  %v1897_v36 = vsub.f32 %v5381_v19, %v1762_v1  ;;  %v1898_v39 = vsub.f32 -inf, %v1762_v1  ;;  %v1008_v17 = vpop.f32.mrb[17].mxu1  ;;  %v3456_v22 = vpop.eup %3455 }
 0x298   : > { %3471 = vpow2.f32 %v2110_v13  ;;  %v2440_v46 = vadd.f32 %v3450_v41, %v2439_v44  ;;  %v2443_v27 = vadd.f32 %v3454_v59, %v3452_v11  ;;  %v1012_v6 = vpop.f32.mrb[18].mxu1  ;;  %v5384_v41 = vld [vmem:[#allocation24_spill] sm:$0xff] }
 0x299   : > { %v3458_v53 = vpop.eup %3457  ;;  %v2116_v61 = vmul.f32 1.442695, %v1896_v25  ;;  %v2118_v18 = vmul.f32 1.442695, %v1897_v36  ;;  %3473 = vpow2.f32 %v2112_v0  ;;  %v2120_v32 = vmul.f32 1.442695, %v1898_v39 }
 0x29a   : > { %v3460_v20 = vpop.eup %3459  ;;  %2441 = vadd.xlane.f32.xlu0 %v2440_v46  ;;  %v1767_v34 = vpop.permute.xlu1 %1766  ;;  %v2444_v3 = vadd.f32 %v3456_v22, %v2443_v27  ;;  %v5387_v27 = vld [vmem:[#allocation27_spill] sm:$0xff] }
 0x29b   : > { %3475 = vpow2.f32 %v2116_v61  ;;  %v1900_v30 = vsub.f32 %v5382_v56, %v1767_v34  ;;  %v1901_v45 = vsub.f32 %v5383_v33, %v1767_v34  ;;  %v1902_v48 = vsub.f32 -inf, %v1767_v34  ;;  %v1014_v58 = vpop.f32.mrb[19].mxu1  ;;  %v3462_v55 = vpop.eup %3461 }
 0x29c   : > { %3477 = vpow2.f32 %v2118_v18  ;;  %v2445_v60 = vadd.f32 %v3456_v22, %v2444_v3  ;;  %v2448_v63 = vadd.f32 %v3460_v20, %v3458_v53  ;;  %v1018_v40 = vpop.f32.mrb[20].mxu1  ;;  %v5386_v22 = vld [vmem:[#allocation26_spill] sm:$0xff] }
 0x29d   : > { %v3464_v38 = vpop.eup %3463  ;;  %v2124_v57 = vmul.f32 1.442695, %v1900_v30  ;;  %v2126_v26 = vmul.f32 1.442695, %v1901_v45  ;;  %3479 = vpow2.f32 %v2120_v32  ;;  %v2128_v2 = vmul.f32 1.442695, %v1902_v48 }
 0x29e   : > { %v3466_v29 = vpop.eup %3465  ;;  %2446 = vadd.xlane.f32.xlu1 %v2445_v60  ;;  %v1772_v42 = vpop.permute.xlu0 %1771  ;;  %v2449_v47 = vadd.f32 %v3462_v55, %v2448_v63  ;;  %v5389_v63 = vld [vmem:[#allocation29_spill] sm:$0xff] }
 0x29f   : > { %3481 = vpow2.f32 %v2124_v57  ;;  %v1904_v8 = vsub.f32 %v5384_v41, %v1772_v42  ;;  %v1905_v11 = vsub.f32 %v5385_v10, %v1772_v42  ;;  %v1906_v28 = vsub.f32 -inf, %v1772_v42  ;;  %v1020_v13 = vpop.f32.mrb[21].mxu1  ;;  %v3468_v59 = vpop.eup %3467 }
 0x2a0   : > { %3483 = vpow2.f32 %v2126_v26  ;;  %v2450_v0 = vadd.f32 %v3462_v55, %v2449_v47  ;;  %v2453_v1 = vadd.f32 %v3466_v29, %v3464_v38  ;;  %v1024_v17 = vpop.f32.mrb[22].mxu1  ;;  %v5388_v55 = vld [vmem:[#allocation28_spill] sm:$0xff] }
 0x2a1   : > { %v3470_v44 = vpop.eup %3469  ;;  %v2132_v62 = vmul.f32 1.442695, %v1904_v8  ;;  %v2134_v9 = vmul.f32 1.442695, %v1905_v11  ;;  %3485 = vpow2.f32 %v2128_v2  ;;  %v2136_v19 = vmul.f32 1.442695, %v1906_v28 }
 0x2a2   : > { %v3472_v25 = vpop.eup %3471  ;;  %2451 = vadd.xlane.f32.xlu0 %v2450_v0  ;;  %v1777_v36 = vpop.permute.xlu1 %1776  ;;  %v2454_v39 = vadd.f32 %v3468_v59, %v2453_v1  ;;  %v5390_v0 = vld [vmem:[#allocation30_spill] sm:$0xff] }
 0x2a3   : > { %3487 = vpow2.f32 %v2132_v62  ;;  %v1908_v46 = vsub.f32 %v5386_v22, %v1777_v36  ;;  %v1909_v53 = vsub.f32 %v5387_v27, %v1777_v36  ;;  %v1910_v61 = vsub.f32 -inf, %v1777_v36  ;;  %v1026_v18 = vpop.f32.mrb[23].mxu1  ;;  %v3474_v20 = vpop.eup %3473 }
 0x2a4   : > { %3489 = vpow2.f32 %v2134_v9  ;;  %v2455_v32 = vadd.f32 %v3468_v59, %v2454_v39  ;;  %v2458_v34 = vadd.f32 %v3472_v25, %v3470_v44  ;;  %v1030_v58 = vpop.f32.mrb[24].mxu1 }
 0x2a5   : > { %v3476_v3 = vpop.eup %3475  ;;  %v2140_v6 = vmul.f32 1.442695, %v1908_v46  ;;  %v2142_v56 = vmul.f32 1.442695, %v1909_v53  ;;  %3491 = vpow2.f32 %v2136_v19  ;;  %v2144_v33 = vmul.f32 1.442695, %v1910_v61 }
 0x2a6   : > { %v3478_v30 = vpop.eup %3477  ;;  %2456 = vadd.xlane.f32.xlu1 %v2455_v32  ;;  %v1782_v45 = vpop.permute.xlu0 %1781  ;;  %v2459_v48 = vadd.f32 %v3474_v20, %v2458_v34 }
 0x2a7   : > { %3493 = vpow2.f32 %v2140_v6  ;;  %v1912_v60 = vsub.f32 %v5388_v55, %v1782_v45  ;;  %v1913_v38 = vsub.f32 %v5389_v63, %v1782_v45  ;;  %v1914_v57 = vsub.f32 -inf, %v1782_v45  ;;  %v1032_v26 = vpop.f32.mrb[25].mxu1  ;;  %v3480_v29 = vpop.eup %3479 }
 0x2a8   : > { %3495 = vpow2.f32 %v2142_v56  ;;  %v2460_v2 = vadd.f32 %v3474_v20, %v2459_v48  ;;  %v2463_v42 = vadd.f32 %v3478_v30, %v3476_v3  ;;  %v1036_v13 = vpop.f32.mrb[26].mxu1 }
 0x2a9   : > { %v3482_v47 = vpop.eup %3481  ;;  %v2148_v40 = vmul.f32 1.442695, %v1912_v60  ;;  %v2150_v41 = vmul.f32 1.442695, %v1913_v38  ;;  %3497 = vpow2.f32 %v2144_v33  ;;  %v2152_v10 = vmul.f32 1.442695, %v1914_v57 }
 0x2aa   : > { %v3484_v8 = vpop.eup %3483  ;;  %2461 = vadd.xlane.f32.xlu0 %v2460_v2  ;;  %v1787_v11 = vpop.permute.xlu1 %1786  ;;  %v2464_v28 = vadd.f32 %v3480_v29, %v2463_v42 }
 0x2ab   : > { %3499 = vpow2.f32 %v2148_v40  ;;  %v1916_v59 = vsub.f32 %v4449_v43, %v1787_v11  ;;  %v1917_v1 = vsub.f32 %v5390_v0, %v1787_v11  ;;  %v1918_v44 = vsub.f32 -inf, %v1787_v11  ;;  %v1038_v62 = vpop.f32.mrb[27].mxu1  ;;  %v3486_v9 = vpop.eup %3485 }
 0x2ac   : > { %3501 = vpow2.f32 %v2150_v41  ;;  %v2465_v25 = vadd.f32 %v3480_v29, %v2464_v28  ;;  %v2468_v19 = vadd.f32 %v3484_v8, %v3482_v47  ;;  %v1042_v61 = vpop.f32.mrb[28].mxu1 }
 0x2ad   : > { %v3488_v36 = vpop.eup %3487  ;;  %v2156_v39 = vmul.f32 1.442695, %v1916_v59  ;;  %v2158_v17 = vmul.f32 1.442695, %v1917_v1  ;;  %3503 = vpow2.f32 %v2152_v10  ;;  %v2160_v46 = vmul.f32 1.442695, %v1918_v44 }
 0x2ae   : > { %v3490_v22 = vpop.eup %3489  ;;  %2466 = vadd.xlane.f32.xlu1 %v2465_v25  ;;  %v1792_v27 = vpop.permute.xlu0 %1791  ;;  %v2469_v53 = vadd.f32 %v3486_v9, %v2468_v19 }
 0x2af   : > { %3505 = vpow2.f32 %v2156_v39  ;;  %v1920_v43 = vsub.f32 %v4471_v5, %v1792_v27  ;;  %v1921_v18 = vsub.f32 %v4477_v23, %v1792_v27  ;;  %v1922_v20 = vsub.f32 -inf, %v1792_v27  ;;  %v1044_v32 = vpop.f32.mrb[29].mxu1  ;;  %v3492_v34 = vpop.eup %3491 }
 0x2b0   : > { %3507 = vpow2.f32 %v2158_v17  ;;  %v2470_v3 = vadd.f32 %v3486_v9, %v2469_v53  ;;  %v2473_v6 = vadd.f32 %v3490_v22, %v3488_v36  ;;  %v1048_v60 = vpop.f32.mrb[30].mxu1 }
 0x2b1   : > { %v3494_v56 = vpop.eup %3493  ;;  %v2164_v30 = vmul.f32 1.442695, %v1920_v43  ;;  %v2166_v33 = vmul.f32 1.442695, %v1921_v18  ;;  %3509 = vpow2.f32 %v2160_v46  ;;  %v2168_v48 = vmul.f32 1.442695, %v1922_v20 }
 0x2b2   : > { %v3496_v45 = vpop.eup %3495  ;;  %2471 = vadd.xlane.f32.xlu0 %v2470_v3  ;;  %v1797_v58 = vpop.permute.xlu1 %1796  ;;  %v2474_v55 = vadd.f32 %v3492_v34, %v2473_v6 }
 0x2b3   : > { %3511 = vpow2.f32 %v2164_v30  ;;  %v1924_v5 = vsub.f32 %v4481_v24, %v1797_v58  ;;  %v1925_v23 = vsub.f32 %v4485_v49, %v1797_v58  ;;  %v1926_v63 = vsub.f32 -inf, %v1797_v58  ;;  %v1050_v38 = vpop.f32.mrb[31].mxu1  ;;  %v3498_v57 = vpop.eup %3497 }
 0x2b4   : > { %3513 = vpow2.f32 %v2166_v33  ;;  %v2475_v26 = vadd.f32 %v3492_v34, %v2474_v55  ;;  %v2478_v29 = vadd.f32 %v3496_v45, %v3494_v56  ;;  %v1054_v11 = vpop.f32.mrb[32].mxu1 }
 0x2b5   : > { %v3500_v2 = vpop.eup %3499  ;;  %v2172_v42 = vmul.f32 1.442695, %v1924_v5  ;;  %v2174_v47 = vmul.f32 1.442695, %v1925_v23  ;;  %3515 = vpow2.f32 %v2168_v48  ;;  %v2176_v41 = vmul.f32 1.442695, %v1926_v63 }
 0x2b6   : > { %v3502_v40 = vpop.eup %3501  ;;  %2476 = vadd.xlane.f32.xlu1 %v2475_v26  ;;  %v1802_v8 = vpop.permute.xlu0 %1801  ;;  %v2479_v10 = vadd.f32 %v3498_v57, %v2478_v29  ;;  %v5392_v11 = vsub.f32 %v4517_v16, %v4524_v51  ;;  %v5395_v16 = vsub.f32 %v4568_v12, %v4580_v50 }
 0x2b7   : > { %3517 = vpow2.f32 %v2172_v42  ;;  %v1928_v24 = vsub.f32 %v4491_v31, %v1802_v8  ;;  %v1929_v49 = vsub.f32 %v4497_v37, %v1802_v8  ;;  %v1930_v28 = vsub.f32 -inf, %v1802_v8  ;;  %v1056_v13 = vpop.f32.mrb[33].mxu1  ;;  %v3504_v59 = vpop.eup %3503 }
 0x2b8   : > { %3519 = vpow2.f32 %v2174_v47  ;;  %v2480_v0 = vadd.f32 %v3498_v57, %v2479_v10  ;;  %v2483_v1 = vadd.f32 %v3502_v40, %v3500_v2  ;;  %v1060_v39 = vpop.f32.mrb[34].mxu1  ;;  %v2228_v51 = vmul.f32 1.442695, %v5395_v16 }
 0x2b9   : > { %v3506_v44 = vpop.eup %3505  ;;  %v2180_v62 = vmul.f32 1.442695, %v1928_v24  ;;  %v2182_v9 = vmul.f32 1.442695, %v1929_v49  ;;  %3521 = vpow2.f32 %v2176_v41  ;;  %v2184_v19 = vmul.f32 1.442695, %v1930_v28 }
 0x2ba   : > { %v3508_v25 = vpop.eup %3507  ;;  %2481 = vadd.xlane.f32.xlu0 %v2480_v0  ;;  %v2484_v36 = vadd.f32 %v3504_v59, %v2483_v1  ;;  %v1062_v31 = vpop.f32.mrb[35].mxu1  ;;  %v5391_v41 = vsub.f32 %v4526_v52, %v4538_v21  ;;  %v2220_v24 = vmul.f32 1.442695, %v5392_v11  ;;  %v5393_v28 = vsub.f32 %v4540_v15, %v4552_v14  ;;  %v2285_v15 = vld [vmem:[#allocation3 + $0x8] sm:$0xff] }
 0x2bb   : > { %3523 = vpow2.f32 %v2180_v62  ;;  %v2488_v17 = vadd.f32 %v3508_v25, %v3506_v44  ;;  %v3510_v22 = vpop.eup %3509  ;;  %v5394_v1 = vsub.f32 %v4554_v7, %v4566_v35  ;;  %v2289_v11 = vld [vmem:[#allocation3 + $0x28] sm:$0xff] }
 0x2bc   : > { %3525 = vpow2.f32 %v2182_v9  ;;  %v2485_v37 = vadd.f32 %v3504_v59, %v2484_v36  ;;  %v1066_v53 = vpop.f32.mrb[36].mxu1  ;;  %v2222_v8 = vmul.f32 1.442695, %v5391_v41  ;;  %v2224_v13 = vmul.f32 1.442695, %v5393_v28  ;;  %v5407_v28 = vld [vmem:[#allocation38_spill] sm:$0xff] }
 0x2bd   : > { %v3512_v46 = vpop.eup %3511  ;;  %v2489_v27 = vadd.f32 %v3510_v22, %v2488_v17  ;;  %3527 = vpow2.f32 %v2184_v19  ;;  %v1068_v43 = vpop.f32.mrb[37].mxu1  ;;  %v2226_v52 = vmul.f32 1.442695, %v5394_v1  ;;  %v2284_v19 = vld [vmem:[#allocation3] sm:$0xff]  ;;  %v5396_v36 = vsub.f32 %v4582_v54, %v4594_v4 }
 0x2be   : > { %v3514_v61 = vpop.eup %3513  ;;  %2486 = vadd.xlane.f32.xlu1 %v2485_v37  ;;  %3529 = vpow2.f32 %v2222_v8  ;;  %v5398_v53 = vld [vmem:[#allocation32_spill] sm:$0xff] }
 0x2bf   : > { %v2490_v18 = vadd.f32 %v3510_v22, %v2489_v27  ;;  %v2493_v20 = vadd.f32 %v3514_v61, %v3512_v46  ;;  %v3516_v32 = vpop.eup %3515  ;;  %3531 = vpow2.f32 %v2220_v24  ;;  %v2230_v39 = vmul.f32 1.442695, %v5396_v36  ;;  %v2286_v46 = vld [vmem:[#allocation3 + $0x10] sm:$0xff]  ;;  %v5397_v27 = vld [vmem:[#allocation31_spill] sm:$0xff] }
 0x2c0   : > { %v1072_v6 = vpop.f32.mrb[38].mxu1  ;;  %3533 = vpow2.f32 %v2224_v13  ;;  %v5399_v61 = vsub.f32 %v5397_v27, %v5398_v53 }
 0x2c1   : > { %v3518_v34 = vpop.eup %3517  ;;  %2491 = vadd.xlane.f32.xlu0 %v2490_v18  ;;  %v2494_v3 = vadd.f32 %v3516_v32, %v2493_v20  ;;  %v1074_v30 = vpop.f32.mrb[39].mxu1  ;;  %3535 = vpow2.f32 %v2226_v52 }
 0x2c2   : > { %v3520_v56 = vpop.eup %3519  ;;  %3537 = vpow2.f32 %v2228_v51  ;;  %v2232_v43 = vmul.f32 1.442695, %v5399_v61  ;;  %v5401_v30 = vld [vmem:[#allocation34_spill] sm:$0xff]  ;;  %v2609_v61 = vld [vmem:[#allocation2 + $0x8] sm:$0xff] }
 0x2c3   : > { %v2495_v33 = vadd.f32 %v3516_v32, %v2494_v3  ;;  %v2498_v45 = vadd.f32 %v3520_v56, %v3518_v34  ;;  %v3522_v48 = vpop.eup %3521  ;;  %3539 = vpow2.f32 %v2230_v39  ;;  %v2287_v3 = vld [vmem:[#allocation3 + $0x18] sm:$0xff]  ;;  %v5400_v56 = vld [vmem:[#allocation33_spill] sm:$0xff]  ;;  %v2290_v51 = vld [vmem:[#allocation3 + $0x30] sm:$0xff] }
 0x2c4   : > { %v1078_v60 = vpop.f32.mrb[40].mxu1  ;;  %3541 = vpow2.f32 %v2232_v43 }
 0x2c5   : > { %v3524_v58 = vpop.eup %3523  ;;  %2496 = vadd.xlane.f32.xlu1 %v2495_v33  ;;  %v2499_v55 = vadd.f32 %v3522_v48, %v2498_v45  ;;  %v1080_v23 = vpop.f32.mrb[41].mxu1  ;;  %v5402_v33 = vsub.f32 %v5400_v56, %v5401_v30  ;;  %v5415_v30 = vld [vmem:[#allocation43_spill] sm:$0xff] }
 0x2c6   : > { %v3526_v5 = vpop.eup %3525  ;;  %v2288_v23 = vld [vmem:[#allocation3 + $0x20] sm:$0xff] }
 0x2c7   : > { %v2500_v63 = vadd.f32 %v3522_v48, %v2499_v55  ;;  %v2503_v38 = vadd.f32 %v3526_v5, %v3524_v58  ;;  %v3528_v57 = vpop.eup %3527  ;;  %v2234_v45 = vmul.f32 1.442695, %v5402_v33  ;;  %v5416_v33 = vld [vmem:[#allocation44_spill] sm:$0xff] }
 0x2c8   : > { %v1084_v29 = vpop.f32.mrb[42].mxu1  ;;  %v3530_v25 = vpop.eup %3529 }
 0x2c9   : > { %2501 = vadd.xlane.f32.xlu0 %v2500_v63  ;;  %v2504_v26 = vadd.f32 %v3528_v57, %v2503_v38  ;;  %v1086_v2 = vpop.f32.mrb[43].mxu1  ;;  %v3532_v14 = vpop.eup %3531  ;;  %v2317_v35 = vmul.f32 %v3530_v25, %v2285_v15  ;;  %3543 = vpow2.f32 %v2234_v45  ;;  %v5403_v38 = vld [vmem:[#allocation35_spill] sm:$0xff]  ;;  %v5410_v25 = vld [vmem:[#allocation40_spill] sm:$0xff]  ;;  %v5417_v45 = vsub.f32 %v5415_v30, %v5416_v33 }
 0x2ca   : > { %v3534_v31 = vpop.eup %3533  ;;  %v2316_v37 = vmul.f32 %v3532_v14, %v2284_v19 }
 0x2cb   : > { %v2505_v42 = vadd.f32 %v3528_v57, %v2504_v26  ;;  %v2318_v54 = vmul.f32 %v3534_v31, %v2286_v46  ;;  %v3536_v32 = vpop.eup %3535  ;;  %v5404_v57 = vld [vmem:[#allocation36_spill] sm:$0xff]  ;;  %v5413_v46 = vld [vmem:[#allocation42_spill] sm:$0xff] }
 0x2cc   : > { %v1090_v47 = vpop.f32.mrb[44].mxu1  ;;  %v2319_v58 = vmul.f32 %v3536_v32, %v2287_v3  ;;  %v3538_v60 = vpop.eup %3537  ;;  %v5405_v26 = vsub.f32 %v5403_v38, %v5404_v57  ;;  %v2293_v57 = vld [vmem:[#allocation3 + $0x48] sm:$0xff] }
 0x2cd   : > { %2506 = vadd.xlane.f32.xlu1 %v2505_v42  ;;  %v1092_v40 = vpop.f32.mrb[45].mxu1  ;;  %v3540_v8 = vpop.eup %3539 }
 0x2ce   : > { %v2236_v29 = vmul.f32 1.442695, %v5405_v26  ;;  %v2320_v40 = vmul.f32 %v3538_v60, %v2288_v23  ;;  %v2321_v52 = vmul.f32 %v3540_v8, %v2289_v11  ;;  %v2610_v60 = vld [vmem:[#allocation2 + $0x10] sm:$0xff] }
 0x2d0   : > { %v1096_v10 = vpop.f32.mrb[46].mxu1 }
 0x2d1   : > { %v1098_v49 = vpop.f32.mrb[47].mxu1 }
 0x2d2   : > { %v5406_v49 = vld [vmem:[#allocation37_spill] sm:$0xff] }
 0x2d3   : > { %v5408_v13 = vsub.f32 %v5406_v49, %v5407_v28 }
 0x2d4   : > { %v1102_v59 = vpop.f32.mrb[48].mxu1 }
 0x2d5   : > { %v1104_v0 = vpop.f32.mrb[49].mxu1  ;;  %v2238_v59 = vmul.f32 1.442695, %v5408_v13  ;;  %v2294_v13 = vld [vmem:[#allocation3 + $0x50] sm:$0xff] }
 0x2d8   : > { %v1108_v21 = vpop.f32.mrb[50].mxu1 }
 0x2d9   : > { %v1110_v44 = vpop.f32.mrb[51].mxu1 }
 0x2da   : > { %v3542_v44 = vpop.eup %3541 }
 0x2db   : > { %v2322_v36 = vmul.f32 %v3542_v44, %v2290_v51  ;;  %v3544_v39 = vpop.eup %3543 }
 0x2dc   : > { %v1114_v62 = vpop.f32.mrb[52].mxu1 }
 0x2dd   : > { %v1116_v9 = vpop.f32.mrb[53].mxu1 }
 0x2de   : > { %v5409_v9 = vld [vmem:[#allocation39_spill] sm:$0xff] }
 0x2df   : > { %v5411_v15 = vsub.f32 %v5409_v9, %v5410_v25 }
 0x2e0   : > { %v1120_v7 = vpop.f32.mrb[54].mxu1 }
 0x2e1   : > { %v1122_v17 = vpop.f32.mrb[55].mxu1  ;;  %v2240_v14 = vmul.f32 1.442695, %v5411_v15 }
 0x2e3   : > { %v2357_v22 = vpop.xlane.xlu0 %2356 }
 0x2e4   : > { %v2509_v12 = vadd.f32 %v2357_v22, %v2317_v35  ;;  %v2352_v50 = vpop.xlane.xlu1 %2351  ;;  %v1126_v20 = vpop.f32.mrb[56].mxu1  ;;  %v2291_v35 = vld [vmem:[#allocation3 + $0x38] sm:$0xff] }
 0x2e5   : > { %v2508_v18 = vadd.f32 %v2352_v50, %v2316_v37  ;;  %v1128_v4 = vpop.f32.mrb[57].mxu1  ;;  %v5412_v37 = vld [vmem:[#allocation41_spill] sm:$0xff] }
 0x2e6   : > { %2542 = vst.msk [vmem:[#allocation3 + $0x8] sm:$0xff] %vm185_vm3, %v2509_v12  ;;  %v5414_v12 = vsub.f32 %v5412_v37, %v5413_v46  ;;  %v2613_v46 = vld [vmem:[#allocation2 + $0x28] sm:$0xff] }
 0x2e7   : > { %2541 = vst.msk [vmem:[#allocation3] sm:$0xff] %vm185_vm3, %v2508_v18  ;;  %v2362_v34 = vpop.xlane.xlu0 %2361  ;;  %v2323_v18 = vmul.f32 %v3544_v39, %v2291_v35  ;;  %v5425_v35 = vld [vmem:[#allocation50_spill] sm:$0xff] }
 0x2e8   : > { %v2510_v6 = vadd.f32 %v2362_v34, %v2318_v54  ;;  %v1132_v48 = vpop.f32.mrb[58].mxu1  ;;  %v2242_v50 = vmul.f32 1.442695, %v5414_v12  ;;  %v2608_v54 = vld [vmem:[#allocation2] sm:$0xff] }
 0x2e9   : > { %v1134_v55 = vpop.f32.mrb[59].mxu1  ;;  %v2292_v34 = vld [vmem:[#allocation3 + $0x40] sm:$0xff]  ;;  %v2244_v48 = vmul.f32 1.442695, %v5417_v45 }
 0x2ea   : > { %2543 = vst.msk [vmem:[#allocation3 + $0x10] sm:$0xff] %vm185_vm3, %v2510_v6 }
 0x2eb   : > { %v2367_v5 = vpop.xlane.xlu1 %2366 }
 0x2ec   : > { %v2511_v63 = vadd.f32 %v2367_v5, %v2319_v58  ;;  %v1138_v42 = vpop.f32.mrb[60].mxu1 }
 0x2ed   : > { %v2641_v2 = vld [vmem:[#allocation3 + $0x8] sm:$0xff]  ;;  %v1140_v41 = vpop.f32.mrb[61].mxu1  ;;  %v5419_v42 = vld [vmem:[#allocation46_spill] sm:$0xff] }
 0x2ee   : > { %3545 = vlog2.f32 %v2641_v2  ;;  %v2640_v47 = vld [vmem:[#allocation3] sm:$0xff]  ;;  %2544 = vst.msk [vmem:[#allocation3 + $0x18] sm:$0xff] %vm185_vm3, %v2511_v63  ;;  %v5418_v2 = vld [vmem:[#allocation45_spill] sm:$0xff] }
 0x2ef   : > { %3547 = vlog2.f32 %v2640_v47  ;;  %v2372_v10 = vpop.xlane.xlu0 %2371  ;;  %v5420_v47 = vsub.f32 %v5418_v2, %v5419_v42 }
 0x2f0   : > { %v2512_v24 = vadd.f32 %v2372_v10, %v2320_v40  ;;  %3549 = vpow2.f32 %v2236_v29  ;;  %v1144_v1 = vpop.f32.mrb[62].mxu1  ;;  %v2611_v10 = vld [vmem:[#allocation2 + $0x18] sm:$0xff] }
 0x2f1   : > { %v2642_v0 = vld [vmem:[#allocation3 + $0x10] sm:$0xff]  ;;  %v1146_v21 = vpop.f32.mrb[63].mxu1  ;;  %v2246_v40 = vmul.f32 1.442695, %v5420_v47  ;;  %v5421_v1 = vld [vmem:[#allocation47_spill] sm:$0xff] }
 0x2f2   : > { %3551 = vlog2.f32 %v2642_v0  ;;  %2545 = vst.msk [vmem:[#allocation3 + $0x20] sm:$0xff] %vm185_vm3, %v2512_v24 }
 0x2f3   : > { %v2377_v16 = vpop.xlane.xlu1 %2376  ;;  %3553 = vpow2.f32 %v2238_v59 }
 0x2f4   : > { %v2513_v62 = vadd.f32 %v2377_v16, %v2321_v52  ;;  %v5422_v52 = vld [vmem:[#allocation48_spill] sm:$0xff] }
 0x2f5   : > { %v2643_v19 = vld [vmem:[#allocation3 + $0x18] sm:$0xff]  ;;  %v5423_v21 = vsub.f32 %v5421_v1, %v5422_v52 }
 0x2f6   : > { %3555 = vlog2.f32 %v2643_v19  ;;  %2546 = vst.msk [vmem:[#allocation3 + $0x28] sm:$0xff] %vm185_vm3, %v2513_v62  ;;  %v2612_v62 = vld [vmem:[#allocation2 + $0x20] sm:$0xff]  ;;  %v2295_v19 = vld [vmem:[#allocation3 + $0x58] sm:$0xff] }
 0x2f7   : > { %v2382_v7 = vpop.xlane.xlu0 %2381  ;;  %3557 = vpow2.f32 %v2240_v14  ;;  %v2248_v44 = vmul.f32 1.442695, %v5423_v21 }
 0x2f8   : > { %v3546_v17 = vpop.eup %3545  ;;  %v2514_v31 = vadd.f32 %v2382_v7, %v2322_v36  ;;  %v5424_v7 = vld [vmem:[#allocation49_spill] sm:$0xff] }
 0x2f9   : > { %v3548_v22 = vpop.eup %3547  ;;  %v2675_v27 = vmul.f32 0.6931472, %v3546_v17  ;;  %v2644_v53 = vld [vmem:[#allocation3 + $0x20] sm:$0xff]  ;;  %v5426_v17 = vsub.f32 %v5424_v7, %v5425_v35 }
 0x2fa   : > { %v2673_v43 = vmul.f32 0.6931472, %v3548_v22  ;;  %3559 = vlog2.f32 %v2644_v53  ;;  %2547 = vst.msk [vmem:[#allocation3 + $0x30] sm:$0xff] %vm185_vm3, %v2514_v31  ;;  %v3550_v20 = vpop.eup %3549 }
 0x2fb   : > { %v2737_v4 = vadd.f32 %v2675_v27, %v2609_v61  ;;  %v2387_v32 = vpop.xlane.xlu1 %2386  ;;  %3561 = vpow2.f32 %v2242_v50  ;;  %v2324_v5 = vmul.f32 %v3550_v20, %v2292_v34  ;;  %v2250_v31 = vmul.f32 1.442695, %v5426_v17  ;;  %v2296_v61 = vld [vmem:[#allocation3 + $0x60] sm:$0xff]  ;;  %v5427_v20 = vld [vmem:[#allocation51_spill] sm:$0xff] }
 0x2fc   : > { %v3552_v3 = vpop.eup %3551  ;;  %v2736_v6 = vadd.f32 %v2673_v43, %v2608_v54  ;;  %v2515_v56 = vadd.f32 %v2387_v32, %v2323_v18  ;;  %v5428_v54 = vld [vmem:[#allocation52_spill] sm:$0xff] }
 0x2fd   : > { %2769 = vst.msk [vmem:[%s5040_s8 + $0x8] sm:$0xff] %vm185_vm3, %v2737_v4  ;;  %v2677_v58 = vmul.f32 0.6931472, %v3552_v3  ;;  %v2645_v55 = vld [vmem:[#allocation3 + $0x28] sm:$0xff]  ;;  %v3554_v23 = vpop.eup %3553  ;;  %v5429_v4 = vsub.f32 %v5427_v20, %v5428_v54 }
 0x2fe   : > { %2768 = vst.msk [vmem:[%s5040_s8] sm:$0xff] %vm185_vm3, %v2736_v6  ;;  %3563 = vlog2.f32 %v2645_v55  ;;  %2548 = vst.msk [vmem:[#allocation3 + $0x38] sm:$0xff] %vm185_vm3, %v2515_v56  ;;  %v2325_v11 = vmul.f32 %v3554_v23, %v2293_v57  ;;  %v2614_v6 = vld [vmem:[#allocation2 + $0x30] sm:$0xff] }
 0x2ff   : > { %v2738_v63 = vadd.f32 %v2677_v58, %v2610_v60  ;;  %v2392_v38 = vpop.xlane.xlu0 %2391  ;;  %3565 = vpow2.f32 %v2244_v48  ;;  %v2252_v32 = vmul.f32 1.442695, %v5429_v4  ;;  %v2297_v48 = vld [vmem:[#allocation3 + $0x68] sm:$0xff] }
 0x300   : > { %v3556_v26 = vpop.eup %3555  ;;  %v2516_v29 = vadd.f32 %v2392_v38, %v2324_v5  ;;  %v5430_v60 = vld [vmem:[#allocation53_spill] sm:$0xff]  ;;  %v5431_v5 = vld [vmem:[#allocation54_spill] sm:$0xff] }
 0x301   : > { %2770 = vst.msk [vmem:[%s5040_s8 + $0x10] sm:$0xff] %vm185_vm3, %v2738_v63  ;;  %v2679_v41 = vmul.f32 0.6931472, %v3556_v26  ;;  %v2646_v8 = vld [vmem:[#allocation3 + $0x30] sm:$0xff]  ;;  %v3558_v24 = vpop.eup %3557  ;;  %v5432_v23 = vsub.f32 %v5430_v60, %v5431_v5  ;;  %v2615_v26 = vld [vmem:[#allocation2 + $0x38] sm:$0xff] }
 0x302   : > { %3567 = vlog2.f32 %v2646_v8  ;;  %2549 = vst.msk [vmem:[#allocation3 + $0x40] sm:$0xff] %vm185_vm3, %v2516_v29  ;;  %v2326_v9 = vmul.f32 %v3558_v24, %v2294_v13 }
 0x303   : > { %v2739_v49 = vadd.f32 %v2679_v41, %v2611_v10  ;;  %v2397_v28 = vpop.xlane.xlu1 %2396  ;;  %3569 = vpow2.f32 %v2246_v40  ;;  %v2254_v63 = vmul.f32 1.442695, %v5432_v23  ;;  %v2298_v40 = vld [vmem:[#allocation3 + $0x70] sm:$0xff]  ;;  %v5433_v10 = vld [vmem:[#allocation55_spill] sm:$0xff] }
 0x304   : > { %v3560_v59 = vpop.eup %3559  ;;  %v2517_v0 = vadd.f32 %v2397_v28, %v2325_v11  ;;  %v5434_v11 = vld [vmem:[#allocation56_spill] sm:$0xff] }
 0x305   : > { %2771 = vst.msk [vmem:[%s5040_s8 + $0x18] sm:$0xff] %vm185_vm3, %v2739_v49  ;;  %v2681_v16 = vmul.f32 0.6931472, %v3560_v59  ;;  %v2647_v51 = vld [vmem:[#allocation3 + $0x38] sm:$0xff]  ;;  %v3562_v25 = vpop.eup %3561  ;;  %v5435_v24 = vsub.f32 %v5433_v10, %v5434_v11  ;;  %v2616_v59 = vld [vmem:[#allocation2 + $0x40] sm:$0xff] }
 0x306   : > { %3571 = vlog2.f32 %v2647_v51  ;;  %2550 = vst.msk [vmem:[#allocation3 + $0x48] sm:$0xff] %vm185_vm3, %v2517_v0  ;;  %v2327_v12 = vmul.f32 %v3562_v25, %v2295_v19 }
 0x307   : > { %v2740_v15 = vadd.f32 %v2681_v16, %v2612_v62  ;;  %v2402_v14 = vpop.xlane.xlu0 %2401  ;;  %3573 = vpow2.f32 %v2248_v44  ;;  %v2256_v49 = vmul.f32 1.442695, %v5435_v24  ;;  %v2299_v44 = vld [vmem:[#allocation3 + $0x78] sm:$0xff]  ;;  %v5436_v62 = vld [vmem:[#allocation57_spill] sm:$0xff] }
 0x308   : > { %v3564_v36 = vpop.eup %3563  ;;  %v2518_v39 = vadd.f32 %v2402_v14, %v2326_v9  ;;  %v5437_v9 = vld [vmem:[#allocation58_spill] sm:$0xff] }
 0x309   : > { %2772 = vst.msk [vmem:[%s5040_s8 + $0x20] sm:$0xff] %vm185_vm3, %v2740_v15  ;;  %v2683_v22 = vmul.f32 0.6931472, %v3564_v36  ;;  %v2648_v37 = vld [vmem:[#allocation3 + $0x40] sm:$0xff]  ;;  %v3566_v50 = vpop.eup %3565  ;;  %v5438_v25 = vsub.f32 %v5436_v62, %v5437_v9  ;;  %v2617_v36 = vld [vmem:[#allocation2 + $0x48] sm:$0xff] }
 0x30a   : > { %3575 = vlog2.f32 %v2648_v37  ;;  %2551 = vst.msk [vmem:[#allocation3 + $0x50] sm:$0xff] %vm185_vm3, %v2518_v39  ;;  %v2328_v56 = vmul.f32 %v3566_v50, %v2296_v61 }
 0x30b   : > { %v2741_v27 = vadd.f32 %v2683_v22, %v2613_v46  ;;  %v2407_v53 = vpop.xlane.xlu1 %2406  ;;  %3577 = vpow2.f32 %v2250_v31  ;;  %v2258_v15 = vmul.f32 1.442695, %v5438_v25  ;;  %v2300_v31 = vld [vmem:[#allocation3 + $0x80] sm:$0xff]  ;;  %v5439_v46 = vld [vmem:[#allocation59_spill] sm:$0xff] }
 0x30c   : > { %v3568_v43 = vpop.eup %3567  ;;  %v2519_v18 = vadd.f32 %v2407_v53, %v2327_v12  ;;  %v5440_v12 = vld [vmem:[#allocation60_spill] sm:$0xff] }
 0x30d   : > { %2773 = vst.msk [vmem:[%s5040_s8 + $0x28] sm:$0xff] %vm185_vm3, %v2741_v27  ;;  %v2685_v34 = vmul.f32 0.6931472, %v3568_v43  ;;  %v2649_v3 = vld [vmem:[#allocation3 + $0x48] sm:$0xff]  ;;  %v3570_v30 = vpop.eup %3569  ;;  %v5441_v50 = vsub.f32 %v5439_v46, %v5440_v12  ;;  %v2618_v43 = vld [vmem:[#allocation2 + $0x50] sm:$0xff] }
 0x30e   : > { %3579 = vlog2.f32 %v2649_v3  ;;  %2552 = vst.msk [vmem:[#allocation3 + $0x58] sm:$0xff] %vm185_vm3, %v2519_v18  ;;  %v2329_v29 = vmul.f32 %v3570_v30, %v2297_v48 }
 0x30f   : > { %v2742_v33 = vadd.f32 %v2685_v34, %v2614_v6  ;;  %v2412_v45 = vpop.xlane.xlu0 %2411  ;;  %3581 = vpow2.f32 %v2252_v32  ;;  %v2260_v27 = vmul.f32 1.442695, %v5441_v50  ;;  %v2301_v32 = vld [vmem:[#allocation3 + $0x88] sm:$0xff] }
 0x310   : > { %v3572_v58 = vpop.eup %3571  ;;  %v2520_v55 = vadd.f32 %v2412_v45, %v2328_v56  ;;  %v5442_v6 = vld [vmem:[#allocation61_spill] sm:$0xff]  ;;  %v5443_v56 = vld [vmem:[#allocation62_spill] sm:$0xff] }
 0x311   : > { %2774 = vst.msk [vmem:[%s5040_s8 + $0x30] sm:$0xff] %vm185_vm3, %v2742_v33  ;;  %v2687_v38 = vmul.f32 0.6931472, %v3572_v58  ;;  %v2650_v57 = vld [vmem:[#allocation3 + $0x50] sm:$0xff]  ;;  %v3574_v2 = vpop.eup %3573  ;;  %v5444_v30 = vsub.f32 %v5442_v6, %v5443_v56  ;;  %v2619_v58 = vld [vmem:[#allocation2 + $0x58] sm:$0xff] }
 0x312   : > { %3583 = vlog2.f32 %v2650_v57  ;;  %2553 = vst.msk [vmem:[#allocation3 + $0x60] sm:$0xff] %vm185_vm3, %v2520_v55  ;;  %v2330_v0 = vmul.f32 %v3574_v2, %v2298_v40 }
 0x313   : > { %v2743_v42 = vadd.f32 %v2687_v38, %v2615_v26  ;;  %v2417_v47 = vpop.xlane.xlu1 %2416  ;;  %3585 = vpow2.f32 %v2254_v63  ;;  %v2262_v33 = vmul.f32 1.442695, %v5444_v30  ;;  %v2302_v63 = vld [vmem:[#allocation3 + $0x90] sm:$0xff]  ;;  %v5445_v26 = vld [vmem:[#allocation63_spill] sm:$0xff] }
 0x314   : > { %v3576_v41 = vpop.eup %3575  ;;  %v2521_v8 = vadd.f32 %v2417_v47, %v2329_v29  ;;  %v5446_v29 = vld [vmem:[#allocation64_spill] sm:$0xff] }
 0x315   : > { %2775 = vst.msk [vmem:[%s5040_s8 + $0x38] sm:$0xff] %vm185_vm3, %v2743_v42  ;;  %v2689_v28 = vmul.f32 0.6931472, %v3576_v41  ;;  %v2651_v13 = vld [vmem:[#allocation3 + $0x58] sm:$0xff]  ;;  %v3578_v1 = vpop.eup %3577  ;;  %v5447_v2 = vsub.f32 %v5445_v26, %v5446_v29  ;;  %v2620_v41 = vld [vmem:[#allocation2 + $0x60] sm:$0xff] }
 0x316   : > { %3587 = vlog2.f32 %v2651_v13  ;;  %2554 = vst.msk [vmem:[#allocation3 + $0x68] sm:$0xff] %vm185_vm3, %v2521_v8  ;;  %v2331_v39 = vmul.f32 %v3578_v1, %v2299_v44 }
 0x317   : > { %v2744_v52 = vadd.f32 %v2689_v28, %v2616_v59  ;;  %v2422_v21 = vpop.xlane.xlu0 %2421  ;;  %3589 = vpow2.f32 %v2256_v49  ;;  %v2264_v42 = vmul.f32 1.442695, %v5447_v2  ;;  %v2303_v49 = vld [vmem:[#allocation3 + $0x98] sm:$0xff]  ;;  %v5448_v59 = vld [vmem:[#allocation65_spill] sm:$0xff] }
 0x318   : > { %v3580_v16 = vpop.eup %3579  ;;  %v2522_v51 = vadd.f32 %v2422_v21, %v2330_v0  ;;  %v5449_v0 = vld [vmem:[#allocation66_spill] sm:$0xff] }
 0x319   : > { %2776 = vst.msk [vmem:[%s5040_s8 + $0x40] sm:$0xff] %vm185_vm3, %v2744_v52  ;;  %v2691_v14 = vmul.f32 0.6931472, %v3580_v16  ;;  %v2652_v19 = vld [vmem:[#allocation3 + $0x60] sm:$0xff]  ;;  %v3582_v7 = vpop.eup %3581  ;;  %v5450_v1 = vsub.f32 %v5448_v59, %v5449_v0  ;;  %v2621_v16 = vld [vmem:[#allocation2 + $0x68] sm:$0xff] }
 0x31a   : > { %3591 = vlog2.f32 %v2652_v19  ;;  %2555 = vst.msk [vmem:[#allocation3 + $0x70] sm:$0xff] %vm185_vm3, %v2522_v51  ;;  %v2332_v18 = vmul.f32 %v3582_v7, %v2300_v31 }
 0x31b   : > { %v2745_v35 = vadd.f32 %v2691_v14, %v2617_v36  ;;  %v2427_v17 = vpop.xlane.xlu1 %2426  ;;  %3593 = vpow2.f32 %v2258_v15  ;;  %v2266_v52 = vmul.f32 1.442695, %v5450_v1  ;;  %v2304_v15 = vld [vmem:[#allocation3 + $0xa0] sm:$0xff]  ;;  %v5451_v36 = vld [vmem:[#allocation67_spill] sm:$0xff] }
 0x31c   : > { %v3584_v22 = vpop.eup %3583  ;;  %v2523_v37 = vadd.f32 %v2427_v17, %v2331_v39  ;;  %v5452_v39 = vld [vmem:[#allocation68_spill] sm:$0xff] }
 0x31d   : > { %2777 = vst.msk [vmem:[%s5040_s8 + $0x48] sm:$0xff] %vm185_vm3, %v2745_v35  ;;  %v2693_v53 = vmul.f32 0.6931472, %v3584_v22  ;;  %v2653_v61 = vld [vmem:[#allocation3 + $0x68] sm:$0xff]  ;;  %v3586_v20 = vpop.eup %3585  ;;  %v5453_v7 = vsub.f32 %v5451_v36, %v5452_v39  ;;  %v2622_v22 = vld [vmem:[#allocation2 + $0x70] sm:$0xff] }
 0x31e   : > { %3595 = vlog2.f32 %v2653_v61  ;;  %2556 = vst.msk [vmem:[#allocation3 + $0x78] sm:$0xff] %vm185_vm3, %v2523_v37  ;;  %v2333_v55 = vmul.f32 %v3586_v20, %v2301_v32 }
 0x31f   : > { %v2746_v54 = vadd.f32 %v2693_v53, %v2618_v43  ;;  %v2432_v4 = vpop.xlane.xlu0 %2431  ;;  %3597 = vpow2.f32 %v2260_v27  ;;  %v2268_v35 = vmul.f32 1.442695, %v5453_v7  ;;  %v2305_v27 = vld [vmem:[#allocation3 + $0xa8] sm:$0xff] }
 0x320   : > { %v3588_v34 = vpop.eup %3587  ;;  %v2524_v3 = vadd.f32 %v2432_v4, %v2332_v18  ;;  %v5454_v43 = vld [vmem:[#allocation69_spill] sm:$0xff]  ;;  %v5455_v18 = vld [vmem:[#allocation70_spill] sm:$0xff] }
 0x321   : > { %2778 = vst.msk [vmem:[%s5040_s8 + $0x50] sm:$0xff] %vm185_vm3, %v2746_v54  ;;  %v2695_v45 = vmul.f32 0.6931472, %v3588_v34  ;;  %v2654_v48 = vld [vmem:[#allocation3 + $0x70] sm:$0xff]  ;;  %v3590_v60 = vpop.eup %3589  ;;  %v5456_v20 = vsub.f32 %v5454_v43, %v5455_v18  ;;  %v2623_v34 = vld [vmem:[#allocation2 + $0x78] sm:$0xff] }
 0x322   : > { %3599 = vlog2.f32 %v2654_v48  ;;  %2557 = vst.msk [vmem:[#allocation3 + $0x80] sm:$0xff] %vm185_vm3, %v2524_v3  ;;  %v2334_v8 = vmul.f32 %v3590_v60, %v2302_v63 }
 0x323   : > { %v2747_v5 = vadd.f32 %v2695_v45, %v2619_v58  ;;  %v2437_v23 = vpop.xlane.xlu1 %2436  ;;  %3601 = vpow2.f32 %v2262_v33  ;;  %v2270_v54 = vmul.f32 1.442695, %v5456_v20  ;;  %v2306_v33 = vld [vmem:[#allocation3 + $0xb0] sm:$0xff]  ;;  %v5457_v58 = vld [vmem:[#allocation71_spill] sm:$0xff] }
 0x324   : > { %v3592_v38 = vpop.eup %3591  ;;  %v2525_v57 = vadd.f32 %v2437_v23, %v2333_v55  ;;  %v5458_v55 = vld [vmem:[#allocation72_spill] sm:$0xff] }
 0x325   : > { %2779 = vst.msk [vmem:[%s5040_s8 + $0x58] sm:$0xff] %vm185_vm3, %v2747_v5  ;;  %v2697_v47 = vmul.f32 0.6931472, %v3592_v38  ;;  %v2655_v40 = vld [vmem:[#allocation3 + $0x78] sm:$0xff]  ;;  %v3594_v10 = vpop.eup %3593  ;;  %v5459_v60 = vsub.f32 %v5457_v58, %v5458_v55  ;;  %v2624_v38 = vld [vmem:[#allocation2 + $0x80] sm:$0xff] }
 0x326   : > { %3603 = vlog2.f32 %v2655_v40  ;;  %2558 = vst.msk [vmem:[#allocation3 + $0x88] sm:$0xff] %vm185_vm3, %v2525_v57  ;;  %v2335_v51 = vmul.f32 %v3594_v10, %v2303_v49 }
 0x327   : > { %v2748_v11 = vadd.f32 %v2697_v47, %v2620_v41  ;;  %v2442_v24 = vpop.xlane.xlu0 %2441  ;;  %3605 = vpow2.f32 %v2264_v42  ;;  %v2272_v5 = vmul.f32 1.442695, %v5459_v60  ;;  %v2307_v42 = vld [vmem:[#allocation3 + $0xb8] sm:$0xff]  ;;  %v5460_v41 = vld [vmem:[#allocation73_spill] sm:$0xff] }
 0x328   : > { %v3596_v28 = vpop.eup %3595  ;;  %v2526_v13 = vadd.f32 %v2442_v24, %v2334_v8  ;;  %v5461_v8 = vld [vmem:[#allocation74_spill] sm:$0xff] }
 0x329   : > { %2780 = vst.msk [vmem:[%s5040_s8 + $0x60] sm:$0xff] %vm185_vm3, %v2748_v11  ;;  %v2699_v21 = vmul.f32 0.6931472, %v3596_v28  ;;  %v2656_v44 = vld [vmem:[#allocation3 + $0x80] sm:$0xff]  ;;  %v3598_v62 = vpop.eup %3597  ;;  %v5462_v10 = vsub.f32 %v5460_v41, %v5461_v8  ;;  %v2625_v28 = vld [vmem:[#allocation2 + $0x88] sm:$0xff] }
 0x32a   : > { %3607 = vlog2.f32 %v2656_v44  ;;  %2559 = vst.msk [vmem:[#allocation3 + $0x90] sm:$0xff] %vm185_vm3, %v2526_v13  ;;  %v2336_v37 = vmul.f32 %v3598_v62, %v2304_v15  ;;  %v5463_v44 = vld [vmem:[#allocation75_spill] sm:$0xff]  ;;  %v2312_v8 = vld [vmem:[#allocation3 + $0xe0] sm:$0xff] }
 0x32b   : > { %v2749_v9 = vadd.f32 %v2699_v21, %v2621_v16  ;;  %v2447_v25 = vpop.xlane.xlu1 %2446  ;;  %3609 = vpow2.f32 %v2266_v52  ;;  %v2274_v11 = vmul.f32 1.442695, %v5462_v10  ;;  %v2308_v52 = vld [vmem:[#allocation3 + $0xc0] sm:$0xff] }
 0x32c   : > { %v3600_v14 = vpop.eup %3599  ;;  %v2527_v19 = vadd.f32 %v2447_v25, %v2335_v51  ;;  %v5464_v16 = vld [vmem:[#allocation76_spill] sm:$0xff] }
 0x32d   : > { %2781 = vst.msk [vmem:[%s5040_s8 + $0x68] sm:$0xff] %vm185_vm3, %v2749_v9  ;;  %v2701_v17 = vmul.f32 0.6931472, %v3600_v14  ;;  %v2657_v31 = vld [vmem:[#allocation3 + $0x88] sm:$0xff]  ;;  %v3602_v46 = vpop.eup %3601  ;;  %v5465_v51 = vsub.f32 %v5463_v44, %v5464_v16  ;;  %v2626_v14 = vld [vmem:[#allocation2 + $0x90] sm:$0xff] }
 0x32e   : > { %3611 = vlog2.f32 %v2657_v31  ;;  %2560 = vst.msk [vmem:[#allocation3 + $0x98] sm:$0xff] %vm185_vm3, %v2527_v19  ;;  %v2337_v3 = vmul.f32 %v3602_v46, %v2305_v27  ;;  %v5466_v31 = vld [vmem:[#allocation77_spill] sm:$0xff] }
 0x32f   : > { %v2750_v12 = vadd.f32 %v2701_v17, %v2622_v22  ;;  %v2452_v50 = vpop.xlane.xlu0 %2451  ;;  %3613 = vpow2.f32 %v2268_v35  ;;  %v2276_v62 = vmul.f32 1.442695, %v5465_v51  ;;  %v2309_v35 = vld [vmem:[#allocation3 + $0xc8] sm:$0xff]  ;;  %v5467_v22 = vld [vmem:[#allocation78_spill] sm:$0xff] }
 0x330   : > { %v3604_v53 = vpop.eup %3603  ;;  %v2528_v61 = vadd.f32 %v2452_v50, %v2336_v37  ;;  %v5468_v37 = vsub.f32 %v5466_v31, %v5467_v22 }
 0x331   : > { %2782 = vst.msk [vmem:[%s5040_s8 + $0x70] sm:$0xff] %vm185_vm3, %v2750_v12  ;;  %v2703_v4 = vmul.f32 0.6931472, %v3604_v53  ;;  %v2658_v32 = vld [vmem:[#allocation3 + $0x90] sm:$0xff]  ;;  %v3606_v6 = vpop.eup %3605  ;;  %v2627_v53 = vld [vmem:[#allocation2 + $0x98] sm:$0xff] }
 0x332   : > { %3615 = vlog2.f32 %v2658_v32  ;;  %2561 = vst.msk [vmem:[#allocation3 + $0xa0] sm:$0xff] %vm185_vm3, %v2528_v61  ;;  %v2338_v57 = vmul.f32 %v3606_v6, %v2306_v33  ;;  %v2278_v46 = vmul.f32 1.442695, %v5468_v37  ;;  %v5469_v32 = vld [vmem:[#allocation79_spill] sm:$0xff] }
 0x333   : > { %v2751_v56 = vadd.f32 %v2703_v4, %v2623_v34  ;;  %v2457_v30 = vpop.xlane.xlu1 %2456  ;;  %3617 = vpow2.f32 %v2270_v54  ;;  %v2310_v54 = vld [vmem:[#allocation3 + $0xd0] sm:$0xff]  ;;  %v5470_v34 = vld [vmem:[#allocation80_spill] sm:$0xff] }
 0x334   : > { %v3608_v45 = vpop.eup %3607  ;;  %v2529_v48 = vadd.f32 %v2457_v30, %v2337_v3  ;;  %v5471_v3 = vsub.f32 %v5469_v32, %v5470_v34 }
 0x335   : > { %2783 = vst.msk [vmem:[%s5040_s8 + $0x78] sm:$0xff] %vm185_vm3, %v2751_v56  ;;  %v2705_v23 = vmul.f32 0.6931472, %v3608_v45  ;;  %v2659_v63 = vld [vmem:[#allocation3 + $0x98] sm:$0xff]  ;;  %v3610_v26 = vpop.eup %3609  ;;  %v2628_v45 = vld [vmem:[#allocation2 + $0xa0] sm:$0xff] }
 0x336   : > { %3619 = vlog2.f32 %v2659_v63  ;;  %2562 = vst.msk [vmem:[#allocation3 + $0xa8] sm:$0xff] %vm185_vm3, %v2529_v48  ;;  %v2339_v13 = vmul.f32 %v3610_v26, %v2307_v42  ;;  %v2280_v6 = vmul.f32 1.442695, %v5471_v3  ;;  %v5472_v63 = vld [vmem:[#allocation81_spill] sm:$0xff] }
 0x337   : > { %v2752_v29 = vadd.f32 %v2705_v23, %v2624_v38  ;;  %v2462_v2 = vpop.xlane.xlu0 %2461  ;;  %3621 = vpow2.f32 %v2272_v5  ;;  %v2311_v5 = vld [vmem:[#allocation3 + $0xd8] sm:$0xff]  ;;  %v5473_v38 = vld [vmem:[#allocation82_spill] sm:$0xff] }
 0x338   : > { %v3612_v47 = vpop.eup %3611  ;;  %v2530_v40 = vadd.f32 %v2462_v2, %v2338_v57  ;;  %v5474_v57 = vsub.f32 %v5472_v63, %v5473_v38  ;;  %v2636_v38 = vld [vmem:[#allocation2 + $0xe0] sm:$0xff] }
 0x339   : > { %2784 = vst.msk [vmem:[%s5040_s8 + $0x80] sm:$0xff] %vm185_vm3, %v2752_v29  ;;  %v2707_v24 = vmul.f32 0.6931472, %v3612_v47  ;;  %v2660_v49 = vld [vmem:[#allocation3 + $0xa0] sm:$0xff]  ;;  %v3614_v59 = vpop.eup %3613 }
 0x33a   : > { %3623 = vlog2.f32 %v2660_v49  ;;  %2563 = vst.msk [vmem:[#allocation3 + $0xb0] sm:$0xff] %vm185_vm3, %v2530_v40  ;;  %v2340_v19 = vmul.f32 %v3614_v59, %v2308_v52  ;;  %v2282_v26 = vmul.f32 1.442695, %v5474_v57  ;;  %v2629_v40 = vld [vmem:[#allocation2 + $0xa8] sm:$0xff] }
 0x33b   : > { %v2753_v0 = vadd.f32 %v2707_v24, %v2625_v28  ;;  %v2467_v1 = vpop.xlane.xlu1 %2466  ;;  %3625 = vpow2.f32 %v2274_v11 }
 0x33c   : > { %v3616_v21 = vpop.eup %3615  ;;  %v2531_v9 = vadd.f32 %v2467_v1, %v2339_v13  ;;  %v2630_v1 = vld [vmem:[#allocation2 + $0xb0] sm:$0xff] }
 0x33d   : > { %2785 = vst.msk [vmem:[%s5040_s8 + $0x88] sm:$0xff] %vm185_vm3, %v2753_v0  ;;  %v2709_v25 = vmul.f32 0.6931472, %v3616_v21  ;;  %v2661_v15 = vld [vmem:[#allocation3 + $0xa8] sm:$0xff]  ;;  %v3618_v36 = vpop.eup %3617 }
 0x33e   : > { %3627 = vlog2.f32 %v2661_v15  ;;  %2564 = vst.msk [vmem:[#allocation3 + $0xb8] sm:$0xff] %vm185_vm3, %v2531_v9  ;;  %v2341_v61 = vmul.f32 %v3618_v36, %v2309_v35  ;;  %v2313_v21 = vld [vmem:[#allocation3 + $0xe8] sm:$0xff]  ;;  %v2314_v36 = vld [vmem:[#allocation3 + $0xf0] sm:$0xff] }
 0x33f   : > { %v2754_v39 = vadd.f32 %v2709_v25, %v2626_v14  ;;  %v2472_v7 = vpop.xlane.xlu0 %2471  ;;  %3629 = vpow2.f32 %v2276_v62  ;;  %v2631_v14 = vld [vmem:[#allocation2 + $0xb8] sm:$0xff] }
 0x340   : > { %v3620_v17 = vpop.eup %3619  ;;  %v2532_v12 = vadd.f32 %v2472_v7, %v2340_v19 }
 0x341   : > { %2786 = vst.msk [vmem:[%s5040_s8 + $0x90] sm:$0xff] %vm185_vm3, %v2754_v39  ;;  %v2711_v50 = vmul.f32 0.6931472, %v3620_v17  ;;  %v2662_v27 = vld [vmem:[#allocation3 + $0xb0] sm:$0xff]  ;;  %v3622_v43 = vpop.eup %3621 }
 0x342   : > { %3631 = vlog2.f32 %v2662_v27  ;;  %2565 = vst.msk [vmem:[#allocation3 + $0xc0] sm:$0xff] %vm185_vm3, %v2532_v12  ;;  %v2342_v48 = vmul.f32 %v3622_v43, %v2310_v54  ;;  %v2633_v54 = vld [vmem:[#allocation2 + $0xc8] sm:$0xff] }
 0x343   : > { %v2755_v18 = vadd.f32 %v2711_v50, %v2627_v53  ;;  %v2477_v20 = vpop.xlane.xlu1 %2476  ;;  %3633 = vpow2.f32 %v2278_v46  ;;  %v2632_v46 = vld [vmem:[#allocation2 + $0xc0] sm:$0xff]  ;;  %v2315_v50 = vld [vmem:[#allocation3 + $0xf8] sm:$0xff] }
 0x344   : > { %v3624_v4 = vpop.eup %3623  ;;  %v2533_v56 = vadd.f32 %v2477_v20, %v2341_v61 }
 0x345   : > { %2787 = vst.msk [vmem:[%s5040_s8 + $0x98] sm:$0xff] %vm185_vm3, %v2755_v18  ;;  %v2713_v30 = vmul.f32 0.6931472, %v3624_v4  ;;  %v2663_v33 = vld [vmem:[#allocation3 + $0xb8] sm:$0xff]  ;;  %v3626_v58 = vpop.eup %3625 }
 0x346   : > { %3635 = vlog2.f32 %v2663_v33  ;;  %2566 = vst.msk [vmem:[#allocation3 + $0xc8] sm:$0xff] %vm185_vm3, %v2533_v56  ;;  %v2343_v41 = vmul.f32 %v3626_v58, %v2311_v5 }
 0x347   : > { %v2756_v55 = vadd.f32 %v2713_v30, %v2628_v45  ;;  %v2482_v60 = vpop.xlane.xlu0 %2481  ;;  %3637 = vpow2.f32 %v2280_v6  ;;  %v2634_v30 = vld [vmem:[#allocation2 + $0xd0] sm:$0xff] }
 0x348   : > { %v3628_v23 = vpop.eup %3627  ;;  %v2534_v29 = vadd.f32 %v2482_v60, %v2342_v48 }
 0x349   : > { %2788 = vst.msk [vmem:[%s5040_s8 + $0xa0] sm:$0xff] %vm185_vm3, %v2756_v55  ;;  %v2715_v2 = vmul.f32 0.6931472, %v3628_v23  ;;  %v2664_v42 = vld [vmem:[#allocation3 + $0xc0] sm:$0xff]  ;;  %v3630_v47 = vpop.eup %3629  ;;  %v2635_v55 = vld [vmem:[#allocation2 + $0xd8] sm:$0xff] }
 0x34a   : > { %3639 = vlog2.f32 %v2664_v42  ;;  %2567 = vst.msk [vmem:[#allocation3 + $0xd0] sm:$0xff] %vm185_vm3, %v2534_v29  ;;  %v2344_v59 = vmul.f32 %v3630_v47, %v2312_v8 }
 0x34b   : > { %v2757_v10 = vadd.f32 %v2715_v2, %v2629_v40  ;;  %v2487_v11 = vpop.xlane.xlu1 %2486  ;;  %3641 = vpow2.f32 %v2282_v26  ;;  %v2637_v2 = vld [vmem:[#allocation2 + $0xe8] sm:$0xff] }
 0x34c   : > { %v3632_v24 = vpop.eup %3631  ;;  %v2535_v49 = vadd.f32 %v2487_v11, %v2343_v41  ;;  %v2638_v41 = vld [vmem:[#allocation2 + $0xf0] sm:$0xff] }
 0x34d   : > { %2789 = vst.msk [vmem:[%s5040_s8 + $0xa8] sm:$0xff] %vm185_vm3, %v2757_v10  ;;  %v2717_v28 = vmul.f32 0.6931472, %v3632_v24  ;;  %v2665_v13 = vld [vmem:[#allocation3 + $0xc8] sm:$0xff]  ;;  %v3634_v0 = vpop.eup %3633  ;;  %v2639_v24 = vld [vmem:[#allocation2 + $0xf8] sm:$0xff] }
 0x34e   : > { %3643 = vlog2.f32 %v2665_v13  ;;  %2568 = vst.msk [vmem:[#allocation3 + $0xd8] sm:$0xff] %vm185_vm3, %v2535_v49  ;;  %v2492_v52 = vpop.xlane.xlu0 %2491  ;;  %v2345_v25 = vmul.f32 %v3634_v0, %v2313_v21 }
 0x34f   : > { %v2758_v44 = vadd.f32 %v2717_v28, %v2630_v1  ;;  %v2536_v16 = vadd.f32 %v2492_v52, %v2344_v59 }
 0x350   : > { %v3636_v51 = vpop.eup %3635 }
 0x351   : > { %2790 = vst.msk [vmem:[%s5040_s8 + $0xb0] sm:$0xff] %vm185_vm3, %v2758_v44  ;;  %v2719_v62 = vmul.f32 0.6931472, %v3636_v51  ;;  %v2666_v9 = vld [vmem:[#allocation3 + $0xd0] sm:$0xff]  ;;  %2569 = vst.msk [vmem:[#allocation3 + $0xe0] sm:$0xff] %vm185_vm3, %v2536_v16  ;;  %v3638_v15 = vpop.eup %3637 }
 0x352   : > { %3645 = vlog2.f32 %v2666_v9  ;;  %v2497_v19 = vpop.xlane.xlu1 %2496  ;;  %v2346_v22 = vmul.f32 %v3638_v15, %v2314_v36 }
 0x353   : > { %v2759_v39 = vadd.f32 %v2719_v62, %v2631_v14  ;;  %v2537_v7 = vadd.f32 %v2497_v19, %v2345_v25 }
 0x354   : > { %v3640_v35 = vpop.eup %3639 }
 0x355   : > { %2791 = vst.msk [vmem:[%s5040_s8 + $0xb8] sm:$0xff] %vm185_vm3, %v2759_v39  ;;  %v2721_v17 = vmul.f32 0.6931472, %v3640_v35  ;;  %v2667_v31 = vld [vmem:[#allocation3 + $0xd8] sm:$0xff]  ;;  %2570 = vst.msk [vmem:[#allocation3 + $0xe8] sm:$0xff] %vm185_vm3, %v2537_v7  ;;  %v3642_v37 = vpop.eup %3641 }
 0x356   : > { %3647 = vlog2.f32 %v2667_v31  ;;  %v2502_v12 = vpop.xlane.xlu0 %2501  ;;  %v2347_v20 = vmul.f32 %v3642_v37, %v2315_v50 }
 0x357   : > { %v2760_v27 = vadd.f32 %v2721_v17, %v2632_v46  ;;  %v2538_v53 = vadd.f32 %v2502_v12, %v2346_v22 }
 0x358   : > { %v3644_v61 = vpop.eup %3643  ;;  %v2668_v43 = vld [vmem:[#allocation3 + $0xe0] sm:$0xff] }
 0x359   : > { %2792 = vst.msk [vmem:[%s5040_s8 + $0xc0] sm:$0xff] %vm185_vm3, %v2760_v27  ;;  %v2723_v18 = vmul.f32 0.6931472, %v3644_v61  ;;  %3649 = vlog2.f32 %v2668_v43  ;;  %2571 = vst.msk [vmem:[#allocation3 + $0xf0] sm:$0xff] %vm185_vm3, %v2538_v53 }
 0x35a   : > { %v2507_v4 = vpop.xlane.xlu1 %2506 }
 0x35b   : > { %v2761_v32 = vadd.f32 %v2723_v18, %v2633_v54  ;;  %v2539_v34 = vadd.f32 %v2507_v4, %v2347_v20 }
 0x35c   : > { %v3646_v3 = vpop.eup %3645  ;;  %v2669_v6 = vld [vmem:[#allocation3 + $0xe8] sm:$0xff] }
 0x35d   : > { %2793 = vst.msk [vmem:[%s5040_s8 + $0xc8] sm:$0xff] %vm185_vm3, %v2761_v32  ;;  %v2725_v56 = vmul.f32 0.6931472, %v3646_v3  ;;  %3651 = vlog2.f32 %v2669_v6  ;;  %2572 = vst.msk [vmem:[#allocation3 + $0xf8] sm:$0xff] %vm185_vm3, %v2539_v34 }
 0x35f   : > { %v2762_v33 = vadd.f32 %v2725_v56, %v2634_v30 }
 0x360   : > { %v3648_v45 = vpop.eup %3647  ;;  %v2670_v48 = vld [vmem:[#allocation3 + $0xf0] sm:$0xff] }
 0x361   : > { %2794 = vst.msk [vmem:[%s5040_s8 + $0xd0] sm:$0xff] %vm185_vm3, %v2762_v33  ;;  %v2727_v58 = vmul.f32 0.6931472, %v3648_v45  ;;  %3653 = vlog2.f32 %v2670_v48 }
 0x363   : > { %v3650_v60 = vpop.eup %3649  ;;  %v2763_v5 = vadd.f32 %v2727_v58, %v2635_v55 }
 0x364   : > { %v2729_v23 = vmul.f32 0.6931472, %v3650_v60  ;;  %v2671_v63 = vld [vmem:[#allocation3 + $0xf8] sm:$0xff] }
 0x365   : > { %2795 = vst.msk [vmem:[%s5040_s8 + $0xd8] sm:$0xff] %vm185_vm3, %v2763_v5  ;;  %3655 = vlog2.f32 %v2671_v63 }
 0x366   : > { %v2764_v57 = vadd.f32 %v2729_v23, %v2636_v38 }
 0x367   : > { %v3652_v26 = vpop.eup %3651 }
 0x368   : > { %2796 = vst.msk [vmem:[%s5040_s8 + $0xe0] sm:$0xff] %vm185_vm3, %v2764_v57  ;;  %v2731_v29 = vmul.f32 0.6931472, %v3652_v26 }
 0x36a   : > { %v2765_v42 = vadd.f32 %v2731_v29, %v2637_v2 }
 0x36b   : > { %v3654_v47 = vpop.eup %3653 }
 0x36c   : > { %2797 = vst.msk [vmem:[%s5040_s8 + $0xe8] sm:$0xff] %vm185_vm3, %v2765_v42  ;;  %v2733_v40 = vmul.f32 0.6931472, %v3654_v47 }
 0x36e   : > { %v2766_v8 = vadd.f32 %v2733_v40, %v2638_v41 }
 0x36f   : > { %v3656_v10 = vpop.eup %3655 }
 0x370   : > { %2798 = vst.msk [vmem:[%s5040_s8 + $0xf0] sm:$0xff] %vm185_vm3, %v2766_v8  ;;  %v2735_v11 = vmul.f32 0.6931472, %v3656_v10 }
 0x372   : > { %v2767_v49 = vadd.f32 %v2735_v11, %v2639_v24 }
 0x374   : > { %2799 = vst.msk [vmem:[%s5040_s8 + $0xf8] sm:$0xff] %vm185_vm3, %v2767_v49 }
 0x375 PF: > { %s12_s11 = sadd.s32 1, %s3694_s11   ;;  %s5475_s9 = smov %s3690_s10 }
 0x376   : > { %p9_p5 = scmp.ge.s32.totalorder %s12_s11, 4   ;;  %s5476_s10 = smov %s5478_s12 }
 0x378   :  { %11 = sbr.rel (!%p9_p5) target bundleno = 2 (0x2), region = 69 }

</bundles_post_ra>
